<compile_context>
chip_gen: v6e
topology: v6e:2x2x1
jax: 0.10.0
libtpu: 0.0.40
codegen_flags: <defaults>
</compile_context>

<pallas_src>
import jax
import jax.numpy as jnp
from jax.experimental import pallas as pl
from jax.experimental.pallas import tpu as pltpu

EPS = 1e-5


def _round_up(x, m):
    return (x + m - 1) // m * m


# ------------------------------ Pallas kernel -------------------------------

def _make_invert_kernel(B, rows_in, m_rows, lane_w, cm, P, offs, has_res,
                        mid_dtype):
    """Fused expand -> depthwise -> shrink on P-pixel-packed flat tiles.

    B        : batch size (per-image work is a static Python loop)
    rows_in  : packed rows per image of the padded/flat input & mid scratch
    m_rows   : packed rows per image of the (flat) output
    lane_w   : P * Cm, the packed lane width of the mid activation
    cm       : expanded (middle) channel count
    P        : pixels packed per vreg row
    offs     : 9 static flat-pixel tap offsets (dh*3+dw order)
    """

    def kernel(*refs):
        if has_res:
            (xp_ref, we_ref, wd_ref, sd_ref, bd_ref, ws_ref, bs_ref, res_ref,
             o_ref, mid_ref) = refs
        else:
            (xp_ref, we_ref, wd_ref, sd_ref, bd_ref, ws_ref, bs_ref,
             o_ref, mid_ref) = refs

        # ---- expand 1x1 conv (BN scale/bias + pad mask folded into the
        #      block-diagonal weights via the indicator channel) + ReLU.
        #      One bf16 MXU matmul over ALL images, f32 accumulate. ----
        mid = jnp.dot(xp_ref[...], we_ref[...],
                      preferred_element_type=jnp.float32)
        mid = jnp.maximum(mid, 0.0)
        mid_ref[...] = mid.astype(mid_dtype)     # mid never leaves VMEM

        # ---- 3x3 depthwise conv + BN + ReLU, then shrink 1x1 + BN, per image ----
        for b in range(B):
            base = b * rows_in
            loaded = {}

            def load(row0):
                # row-shifted packed slice of mid (bf16 load, f32 math)
                if row0 not in loaded:
                    loaded[row0] = mid_ref[row0:row0 + m_rows, :].astype(
                        jnp.float32)
                return loaded[row0]

            acc = jnp.zeros((m_rows, lane_w), jnp.float32)
            for t, off in enumerate(offs):
                q, s = off // P, off % P
                cur = load(base + q)
                if s == 0:
                    tap = cur
                else:
                    # sub-row pixel shift = lane-axis shift by s*Cm: take the
                    # tail blocks of `cur` and the head blocks of the next
                    # packed row (exact, no wrap garbage).
                    nxt = load(base + q + 1)
                    tap = jnp.concatenate(
                        [cur[:, s * cm:], nxt[:, :s * cm]], axis=1)
                acc = acc + tap * wd_ref[t:t + 1, :]
            dwo = jnp.maximum(acc * sd_ref[...] + bd_ref[...], 0.0)

            # shrink 1x1 conv (BN scale folded into the bf16 weights) + bias
            y = jnp.dot(dwo.astype(jnp.bfloat16), ws_ref[...],
                        preferred_element_type=jnp.float32)
            y = y + bs_ref[...]
            if has_res:
                y = y + res_ref[b]
            o_ref[b] = y

    return kernel


# ------------------------------ host wrapper --------------------------------

def invert_block(x, params, stride, *, mid_dtype=jnp.bfloat16):
    """Fused InvertBlock forward.  x: (B, H, W, Cin) float32, NHWC.

    mid_dtype: bf16 by default (halves tap bandwidth on v6e/v7x); use float32
               on v5e (no bf16 VALU).
    """
    B, H, W, Cin = x.shape
    we, se, be = params["expand"]
    wd, sd, bd = params["dw"]
    ws, ss, bs = params["shrink"]
    Cm, Cout = we.shape[1], ws.shape[1]
    assert stride in (1, 2)

    # pixels packed per vreg row so the expanded activation fills the lanes
    P = max(1, 128 // Cm) if Cm < 128 else 1
    lane_w = P * Cm

    # indicator channel: 1 at real pixels, 0 at padding -> carries the expand
    # BN bias through the matmul and zeroes the pad pixels exactly (no mask).
    ind = jnp.ones((B, H, W, 1), x.dtype)
    xi = jnp.concatenate([x, ind], axis=-1)                       # (B,H,W,Cin+1)

    if stride == 1:
        Wf = _round_up(W + 2, 8)                 # 8-aligned flat row stride
        H_out, W_out, Wf_out = H, W, Wf
        # rows: 1 top pad + H real + 2 bottom (pad + guard); cols: 1 left pad,
        # the rest right pad.  Pad/guard pixels are all-zero (indicator too).
        xpad = jnp.pad(xi, ((0, 0), (1, 2), (1, Wf - 1 - W), (0, 0)))
        xf = xpad.reshape(B, (H + 3) * Wf, Cin + 1)
        offs = [dh * Wf + dw for dh in range(3) for dw in range(3)]
        has_res = (Cout == Cin)
    else:
        Ho, Wo = H // 2, W // 2
        Hq, Wq = Ho + 1, Wo + 1
        H_out, W_out, Wf_out = Ho, Wo, Wq
        # parity-split the padded image into 4 planes so every strided tap is a
        # small constant flat offset; the pointwise expand commutes with this
        # permutation so the kernel computes ONLY the strided outputs.
        xpad = jnp.pad(xi, ((0, 0), (1, 1), (1, 1), (0, 0)))      # (B,2Hq,2Wq,C+1)
        xpar = xpad.reshape(B, Hq, 2, Wq, 2, Cin + 1).transpose(0, 2, 4, 1, 3, 5)
        S = Hq * Wq
        xf = xpar.reshape(B, 4 * S, Cin + 1)
        offs = [((dh % 2) * 2 + (dw % 2)) * S + (dh // 2) * Wq + (dw // 2)
                for dh in range(3) for dw in range(3)]
        has_res = False                           # spatial size changes

    n_out_flat = H_out * Wf_out
    assert n_out_flat % P == 0, (n_out_flat, P)
    m_rows = n_out_flat // P

    # per-image flat length: covers every tap slice (incl. the "next row" read)
    # and keeps every image's packed base row sublane-aligned (multiple of 8*P).
    needed = P * (max(offs) // P + m_rows + 1)
    n_flat = _round_up(needed, 8 * P)
    if xf.shape[1] >= n_flat:
        xf = xf[:, :n_flat, :]                    # trailing guard zeros, unread
    else:
        xf = jnp.pad(xf, ((0, 0), (0, n_flat - xf.shape[1]), (0, 0)))
    rows_in = n_flat // P

    # pack P consecutive flat pixels per row; bf16 HBM transport.
    xp = xf.reshape(B * rows_in, P * (Cin + 1)).astype(jnp.bfloat16)

    # fold BN into the weights: expand scale into columns + bias onto the
    # indicator row, shrink scale into columns.  kron(I_P, .) makes the MXU emit
    # the packed layout directly.
    eyeP = jnp.eye(P, dtype=jnp.float32)
    we_aug = jnp.concatenate([we * se[None, :], be[None, :]], axis=0)  # (Cin+1,Cm)
    we_bd = jnp.kron(eyeP, we_aug).astype(jnp.bfloat16)     # (P*(Cin+1), P*Cm)
    ws_bd = jnp.kron(eyeP, ws * ss[None, :]).astype(jnp.bfloat16)  # (P*Cm, P*Cout)

    wdp = jnp.tile(wd, (1, P)).astype(jnp.float32)           # (9, P*Cm)
    sdp = jnp.tile(sd, P).reshape(1, lane_w).astype(jnp.float32)
    bdp = jnp.tile(bd, P).reshape(1, lane_w).astype(jnp.float32)
    bsp = jnp.tile(bs, P).reshape(1, P * Cout).astype(jnp.float32)

    operands = [xp, we_bd, wdp, sdp, bdp, ws_bd, bsp]
    in_specs = [
        pl.BlockSpec((B * rows_in, P * (Cin + 1)), lambda i: (0, 0)),
        pl.BlockSpec((P * (Cin + 1), lane_w), lambda i: (0, 0)),
        pl.BlockSpec((9, lane_w), lambda i: (0, 0)),
        pl.BlockSpec((1, lane_w), lambda i: (0, 0)),
        pl.BlockSpec((1, lane_w), lambda i: (0, 0)),
        pl.BlockSpec((lane_w, P * Cout), lambda i: (0, 0)),
        pl.BlockSpec((1, P * Cout), lambda i: (0, 0)),
    ]
    if has_res:
        # residual fed in the packed OUTPUT layout (exact f32 add).
        xr = jnp.pad(x, ((0, 0), (0, 0), (0, Wf_out - W), (0, 0)))
        res = xr.reshape(B, m_rows, P * Cin).astype(jnp.float32)
        operands.append(res)
        in_specs.append(pl.BlockSpec((B, m_rows, P * Cin), lambda i: (0, 0, 0)))

    kernel = _make_invert_kernel(B, rows_in, m_rows, lane_w, Cm, P, offs,
                                 has_res, mid_dtype)

    out = pl.pallas_call(
        kernel,
        out_shape=jax.ShapeDtypeStruct((B, m_rows, P * Cout), jnp.float32),
        grid=(1,),
        in_specs=in_specs,
        out_specs=pl.BlockSpec((B, m_rows, P * Cout), lambda i: (0, 0, 0)),
        scratch_shapes=[pltpu.VMEM((B * rows_in, lane_w), mid_dtype)],
        compiler_params=pltpu.CompilerParams(
            dimension_semantics=("arbitrary",)),
    )(*operands)

    # unpack the flat packed layout and drop the padding columns (XLA glue).
    out = out.reshape(B, H_out, Wf_out, Cout)[:, :, :W_out, :]
    return out


# -------------------------- pure-JAX reference ------------------------------

def invert_block_ref(x, params, stride):
    we, se, be = params["expand"]
    wd, sd, bd = params["dw"]
    ws, ss, bs = params["shrink"]
    Cm = we.shape[1]
    # mirror the kernel's bf16 rounding of the BN-folded matmul weights
    # (activations stay f32 here; the kernel's bf16 activations are covered by
    # the test tolerance).
    we_f = (we * se[None, :]).astype(jnp.bfloat16).astype(jnp.float32)
    ws_f = (ws * ss[None, :]).astype(jnp.bfloat16).astype(jnp.float32)
    be_f = be.astype(jnp.bfloat16).astype(jnp.float32)
    h = jnp.maximum(jnp.einsum("bhwc,cm->bhwm", x, we_f) + be_f, 0.0)
    k = wd.reshape(3, 3, Cm)[:, :, None, :]            # HWIO, I=1, groups=Cm
    h = jax.lax.conv_general_dilated(
        h, k, window_strides=(stride, stride), padding=((1, 1), (1, 1)),
        dimension_numbers=("NHWC", "HWIO", "NHWC"), feature_group_count=Cm)
    h = jnp.maximum(h * sd + bd, 0.0)
    y = jnp.einsum("bhwm,mo->bhwo", h, ws_f) + bs
    if y.shape == x.shape:
        y = y + x
    return y


# ------------------------------ parameters ----------------------------------

def _bn_fold(key, c):
    k1, k2, k3, k4 = jax.random.split(key, 4)
    gamma = 1.0 + 0.1 * jax.random.normal(k1, (c,), jnp.float32)
    beta = 0.1 * jax.random.normal(k2, (c,), jnp.float32)
    mean = 0.1 * jax.random.normal(k3, (c,), jnp.float32)
    var = 1.0 + 0.1 * jax.random.uniform(k4, (c,), jnp.float32)
    scale = gamma * jax.lax.rsqrt(var + EPS)
    return scale, beta - mean * scale


def init_invert_block(key, cin, expand_ratio, cout):
    mid = expand_ratio * cin
    k1, k2, k3, k4, k5, k6 = jax.random.split(key, 6)
    we = 0.1 * jax.random.normal(k1, (cin, mid), jnp.float32)   # 1x1 expand
    se, be = _bn_fold(k2, mid)
    wd = 0.1 * jax.random.normal(k3, (9, mid), jnp.float32)     # 3x3 depthwise
    sd, bd = _bn_fold(k4, mid)
    ws = 0.1 * jax.random.normal(k5, (mid, cout), jnp.float32)  # 1x1 shrink
    ss, bs = _bn_fold(k6, cout)
    return {"expand": (we, se, be), "dw": (wd, sd, bd), "shrink": (ws, ss, bs)}


# --------------------------------- main --------------------------------------

if __name__ == "__main__":
    key = jax.random.PRNGKey(0)
    kx, k1, k2 = jax.random.split(key, 3)

    B, H, W, Cin = 2, 16, 16, 8
    # NHWC here == PyTorch NCHW input of shape (2, 8, 16, 16)
    x = jax.random.normal(kx, (B, H, W, Cin), jnp.float32)

    # stride-1 residual block (out == in) and a stride-2 downsampling block
    p_res = init_invert_block(k1, Cin, 4, Cin)        # mid=32, residual path
    p_dn = init_invert_block(k2, Cin, 4, 2 * Cin)     # mid=32, stride 2

    fwd = jax.jit(lambda xx: (invert_block(xx, p_res, 1),
                              invert_block(xx, p_dn, 2)))
    y1, y2 = fwd(x)
    jax.block_until_ready((y1, y2))

    assert y1.shape == (B, H, W, Cin), y1.shape
    assert y2.shape == (B, H // 2, W // 2, 2 * Cin), y2.shape

    r1 = invert_block_ref(x, p_res, 1)
    r2 = invert_block_ref(x, p_dn, 2)
    assert float(jnp.max(jnp.abs(y1 - r1))) < 5e-2
    assert float(jnp.max(jnp.abs(y2 - r2))) < 5e-2

    print("KERNEL_OK")
</pallas_src>

<mosaic_0001>
module attributes {stable_mosaic.version = 11 : i64} {
  func.func @kernel(%arg0: i32, %arg1: memref<160x36xbf16, #tpu.memory_space<vmem>>, %arg2: memref<36x128xbf16, #tpu.memory_space<vmem>>, %arg3: memref<9x128xf32, #tpu.memory_space<vmem>>, %arg4: memref<1x128xf32, #tpu.memory_space<vmem>>, %arg5: memref<1x128xf32, #tpu.memory_space<vmem>>, %arg6: memref<128x64xbf16, #tpu.memory_space<vmem>>, %arg7: memref<1x64xf32, #tpu.memory_space<vmem>>, %arg8: memref<2x18x64xf32, #tpu.memory_space<vmem>>, %arg9: memref<160x128xbf16, #tpu.memory_space<vmem>>) attributes {dimension_semantics = [#tpu.dimension_semantics<arbitrary>], iteration_bounds = array<i64: 1>, scalar_prefetch = 0 : i64, scratch_operands = 1 : i64, tpu.core_type = #tpu.core_type<tc>, window_params = [{pipeline_mode = #tpu.pipeline_mode<synchronous>, transform_indices = @transform_0, window_bounds = array<i64: 160, 36>}, {pipeline_mode = #tpu.pipeline_mode<synchronous>, transform_indices = @transform_1, window_bounds = array<i64: 36, 128>}, {pipeline_mode = #tpu.pipeline_mode<synchronous>, transform_indices = @transform_2, window_bounds = array<i64: 9, 128>}, {pipeline_mode = #tpu.pipeline_mode<synchronous>, transform_indices = @transform_3, window_bounds = array<i64: 1, 128>}, {pipeline_mode = #tpu.pipeline_mode<synchronous>, transform_indices = @transform_4, window_bounds = array<i64: 1, 128>}, {pipeline_mode = #tpu.pipeline_mode<synchronous>, transform_indices = @transform_5, window_bounds = array<i64: 128, 64>}, {pipeline_mode = #tpu.pipeline_mode<synchronous>, transform_indices = @transform_6, window_bounds = array<i64: 1, 64>}, {pipeline_mode = #tpu.pipeline_mode<synchronous>, transform_indices = @transform_7, window_bounds = array<i64: 2, 18, 64>}]} {
    %c0 = arith.constant 0 : index
    %c0_0 = arith.constant 0 : index
    %0 = vector.load %arg1[%c0, %c0_0] : memref<160x36xbf16, #tpu.memory_space<vmem>>, vector<160x36xbf16>
    %c0_1 = arith.constant 0 : index
    %c0_2 = arith.constant 0 : index
    %1 = vector.load %arg2[%c0_1, %c0_2] : memref<36x128xbf16, #tpu.memory_space<vmem>>, vector<36x128xbf16>
    %cst = arith.constant dense<0.000000e+00> : vector<160x128xf32>
    %2 = tpu.matmul %0, %1, %cst {dimension_numbers = #tpu.dot_dimension_numbers<[1], [0], [0], [1], [0, 0, 1, 1], [], []>} : vector<160x36xbf16>, vector<36x128xbf16>, vector<160x128xf32> -> vector<160x128xf32>
    %cst_3 = arith.constant 0.000000e+00 : f32
    %3 = vector.broadcast %cst_3 : f32 to vector<160x128xf32>
    %4 = arith.maximumf %2, %3 : vector<160x128xf32>
    %5 = arith.truncf %4 : vector<160x128xf32> to vector<160x128xbf16>
    %c0_4 = arith.constant 0 : index
    %c0_5 = arith.constant 0 : index
    %6 = vector.load %arg9[%c0_4, %c0_5] : memref<160x128xbf16, #tpu.memory_space<vmem>>, vector<160x128xbf16>
    tpu.vector_store %arg9[%c0_4, %c0_5], %5 {strides = array<i32>} : memref<160x128xbf16, #tpu.memory_space<vmem>>, vector<160x128xbf16>,
    %cst_6 = arith.constant 0.000000e+00 : f32
    %7 = vector.broadcast %cst_6 : f32 to vector<18x128xf32>
    %c0_7 = arith.constant 0 : index
    %c0_8 = arith.constant 0 : index
    %8 = vector.load %arg9[%c0_7, %c0_8] : memref<160x128xbf16, #tpu.memory_space<vmem>>, vector<18x128xbf16>
    %9 = arith.extf %8 : vector<18x128xbf16> to vector<18x128xf32>
    %c0_9 = arith.constant 0 : index
    %c0_10 = arith.constant 0 : index
    %10 = vector.load %arg3[%c0_9, %c0_10] : memref<9x128xf32, #tpu.memory_space<vmem>>, vector<1x128xf32>
    %11 = vector.broadcast %10 : vector<1x128xf32> to vector<18x128xf32>
    %12 = arith.mulf %9, %11 : vector<18x128xf32>
    %13 = arith.addf %7, %12 : vector<18x128xf32>
    %c20 = arith.constant 20 : index
    %c0_11 = arith.constant 0 : index
    %14 = vector.load %arg9[%c20, %c0_11] : memref<160x128xbf16, #tpu.memory_space<vmem>>, vector<18x128xbf16>
    %15 = arith.extf %14 : vector<18x128xbf16> to vector<18x128xf32>
    %c21 = arith.constant 21 : index
    %c0_12 = arith.constant 0 : index
    %16 = vector.load %arg9[%c21, %c0_12] : memref<160x128xbf16, #tpu.memory_space<vmem>>, vector<18x128xbf16>
    %17 = arith.extf %16 : vector<18x128xbf16> to vector<18x128xf32>
    %18 = vector.extract_strided_slice %15 {offsets = [0, 32], sizes = [18, 96], strides = [1, 1]} : vector<18x128xf32> to vector<18x96xf32>
    %19 = vector.extract_strided_slice %17 {offsets = [0, 0], sizes = [18, 32], strides = [1, 1]} : vector<18x128xf32> to vector<18x32xf32>
    %20 = tpu.concatenate %18, %19 in 1 : vector<18x96xf32>, vector<18x32xf32> -> vector<18x128xf32>
    %c1 = arith.constant 1 : index
    %c0_13 = arith.constant 0 : index
    %21 = vector.load %arg3[%c1, %c0_13] : memref<9x128xf32, #tpu.memory_space<vmem>>, vector<1x128xf32>
    %22 = vector.broadcast %21 : vector<1x128xf32> to vector<18x128xf32>
    %23 = arith.mulf %20, %22 : vector<18x128xf32>
    %24 = arith.addf %13, %23 : vector<18x128xf32>
    %c1_14 = arith.constant 1 : index
    %c0_15 = arith.constant 0 : index
    %25 = vector.load %arg9[%c1_14, %c0_15] : memref<160x128xbf16, #tpu.memory_space<vmem>>, vector<18x128xbf16>
    %26 = arith.extf %25 : vector<18x128xbf16> to vector<18x128xf32>
    %27 = vector.extract_strided_slice %9 {offsets = [0, 32], sizes = [18, 96], strides = [1, 1]} : vector<18x128xf32> to vector<18x96xf32>
    %28 = vector.extract_strided_slice %26 {offsets = [0, 0], sizes = [18, 32], strides = [1, 1]} : vector<18x128xf32> to vector<18x32xf32>
    %29 = tpu.concatenate %27, %28 in 1 : vector<18x96xf32>, vector<18x32xf32> -> vector<18x128xf32>
    %c2 = arith.constant 2 : index
    %c0_16 = arith.constant 0 : index
    %30 = vector.load %arg3[%c2, %c0_16] : memref<9x128xf32, #tpu.memory_space<vmem>>, vector<1x128xf32>
    %31 = vector.broadcast %30 : vector<1x128xf32> to vector<18x128xf32>
    %32 = arith.mulf %29, %31 : vector<18x128xf32>
    %33 = arith.addf %24, %32 : vector<18x128xf32>
    %c40 = arith.constant 40 : index
    %c0_17 = arith.constant 0 : index
    %34 = vector.load %arg9[%c40, %c0_17] : memref<160x128xbf16, #tpu.memory_space<vmem>>, vector<18x128xbf16>
    %35 = arith.extf %34 : vector<18x128xbf16> to vector<18x128xf32>
    %c41 = arith.constant 41 : index
    %c0_18 = arith.constant 0 : index
    %36 = vector.load %arg9[%c41, %c0_18] : memref<160x128xbf16, #tpu.memory_space<vmem>>, vector<18x128xbf16>
    %37 = arith.extf %36 : vector<18x128xbf16> to vector<18x128xf32>
    %38 = vector.extract_strided_slice %35 {offsets = [0, 64], sizes = [18, 64], strides = [1, 1]} : vector<18x128xf32> to vector<18x64xf32>
    %39 = vector.extract_strided_slice %37 {offsets = [0, 0], sizes = [18, 64], strides = [1, 1]} : vector<18x128xf32> to vector<18x64xf32>
    %40 = tpu.concatenate %38, %39 in 1 : vector<18x64xf32>, vector<18x64xf32> -> vector<18x128xf32>
    %c3 = arith.constant 3 : index
    %c0_19 = arith.constant 0 : index
    %41 = vector.load %arg3[%c3, %c0_19] : memref<9x128xf32, #tpu.memory_space<vmem>>, vector<1x128xf32>
    %42 = vector.broadcast %41 : vector<1x128xf32> to vector<18x128xf32>
    %43 = arith.mulf %40, %42 : vector<18x128xf32>
    %44 = arith.addf %33, %43 : vector<18x128xf32>
    %c60 = arith.constant 60 : index
    %c0_20 = arith.constant 0 : index
    %45 = vector.load %arg9[%c60, %c0_20] : memref<160x128xbf16, #tpu.memory_space<vmem>>, vector<18x128xbf16>
    %46 = arith.extf %45 : vector<18x128xbf16> to vector<18x128xf32>
    %c61 = arith.constant 61 : index
    %c0_21 = arith.constant 0 : index
    %47 = vector.load %arg9[%c61, %c0_21] : memref<160x128xbf16, #tpu.memory_space<vmem>>, vector<18x128xbf16>
    %48 = arith.extf %47 : vector<18x128xbf16> to vector<18x128xf32>
    %49 = vector.extract_strided_slice %46 {offsets = [0, 96], sizes = [18, 32], strides = [1, 1]} : vector<18x128xf32> to vector<18x32xf32>
    %50 = vector.extract_strided_slice %48 {offsets = [0, 0], sizes = [18, 96], strides = [1, 1]} : vector<18x128xf32> to vector<18x96xf32>
    %51 = tpu.concatenate %49, %50 in 1 : vector<18x32xf32>, vector<18x96xf32> -> vector<18x128xf32>
    %c4 = arith.constant 4 : index
    %c0_22 = arith.constant 0 : index
    %52 = vector.load %arg3[%c4, %c0_22] : memref<9x128xf32, #tpu.memory_space<vmem>>, vector<1x128xf32>
    %53 = vector.broadcast %52 : vector<1x128xf32> to vector<18x128xf32>
    %54 = arith.mulf %51, %53 : vector<18x128xf32>
    %55 = arith.addf %44, %54 : vector<18x128xf32>
    %56 = vector.extract_strided_slice %35 {offsets = [0, 96], sizes = [18, 32], strides = [1, 1]} : vector<18x128xf32> to vector<18x32xf32>
    %57 = vector.extract_strided_slice %37 {offsets = [0, 0], sizes = [18, 96], strides = [1, 1]} : vector<18x128xf32> to vector<18x96xf32>
    %58 = tpu.concatenate %56, %57 in 1 : vector<18x32xf32>, vector<18x96xf32> -> vector<18x128xf32>
    %c5 = arith.constant 5 : index
    %c0_23 = arith.constant 0 : index
    %59 = vector.load %arg3[%c5, %c0_23] : memref<9x128xf32, #tpu.memory_space<vmem>>, vector<1x128xf32>
    %60 = vector.broadcast %59 : vector<1x128xf32> to vector<18x128xf32>
    %61 = arith.mulf %58, %60 : vector<18x128xf32>
    %62 = arith.addf %55, %61 : vector<18x128xf32>
    %c2_24 = arith.constant 2 : index
    %c0_25 = arith.constant 0 : index
    %63 = vector.load %arg9[%c2_24, %c0_25] : memref<160x128xbf16, #tpu.memory_space<vmem>>, vector<18x128xbf16>
    %64 = arith.extf %63 : vector<18x128xbf16> to vector<18x128xf32>
    %c3_26 = arith.constant 3 : index
    %c0_27 = arith.constant 0 : index
    %65 = vector.load %arg9[%c3_26, %c0_27] : memref<160x128xbf16, #tpu.memory_space<vmem>>, vector<18x128xbf16>
    %66 = arith.extf %65 : vector<18x128xbf16> to vector<18x128xf32>
    %67 = vector.extract_strided_slice %64 {offsets = [0, 32], sizes = [18, 96], strides = [1, 1]} : vector<18x128xf32> to vector<18x96xf32>
    %68 = vector.extract_strided_slice %66 {offsets = [0, 0], sizes = [18, 32], strides = [1, 1]} : vector<18x128xf32> to vector<18x32xf32>
    %69 = tpu.concatenate %67, %68 in 1 : vector<18x96xf32>, vector<18x32xf32> -> vector<18x128xf32>
    %c6 = arith.constant 6 : index
    %c0_28 = arith.constant 0 : index
    %70 = vector.load %arg3[%c6, %c0_28] : memref<9x128xf32, #tpu.memory_space<vmem>>, vector<1x128xf32>
    %71 = vector.broadcast %70 : vector<1x128xf32> to vector<18x128xf32>
    %72 = arith.mulf %69, %71 : vector<18x128xf32>
    %73 = arith.addf %62, %72 : vector<18x128xf32>
    %c22 = arith.constant 22 : index
    %c0_29 = arith.constant 0 : index
    %74 = vector.load %arg9[%c22, %c0_29] : memref<160x128xbf16, #tpu.memory_space<vmem>>, vector<18x128xbf16>
    %75 = arith.extf %74 : vector<18x128xbf16> to vector<18x128xf32>
    %c23 = arith.constant 23 : index
    %c0_30 = arith.constant 0 : index
    %76 = vector.load %arg9[%c23, %c0_30] : memref<160x128xbf16, #tpu.memory_space<vmem>>, vector<18x128xbf16>
    %77 = arith.extf %76 : vector<18x128xbf16> to vector<18x128xf32>
    %78 = vector.extract_strided_slice %75 {offsets = [0, 64], sizes = [18, 64], strides = [1, 1]} : vector<18x128xf32> to vector<18x64xf32>
    %79 = vector.extract_strided_slice %77 {offsets = [0, 0], sizes = [18, 64], strides = [1, 1]} : vector<18x128xf32> to vector<18x64xf32>
    %80 = tpu.concatenate %78, %79 in 1 : vector<18x64xf32>, vector<18x64xf32> -> vector<18x128xf32>
    %c7 = arith.constant 7 : index
    %c0_31 = arith.constant 0 : index
    %81 = vector.load %arg3[%c7, %c0_31] : memref<9x128xf32, #tpu.memory_space<vmem>>, vector<1x128xf32>
    %82 = vector.broadcast %81 : vector<1x128xf32> to vector<18x128xf32>
    %83 = arith.mulf %80, %82 : vector<18x128xf32>
    %84 = arith.addf %73, %83 : vector<18x128xf32>
    %85 = vector.extract_strided_slice %64 {offsets = [0, 64], sizes = [18, 64], strides = [1, 1]} : vector<18x128xf32> to vector<18x64xf32>
    %86 = vector.extract_strided_slice %66 {offsets = [0, 0], sizes = [18, 64], strides = [1, 1]} : vector<18x128xf32> to vector<18x64xf32>
    %87 = tpu.concatenate %85, %86 in 1 : vector<18x64xf32>, vector<18x64xf32> -> vector<18x128xf32>
    %c8 = arith.constant 8 : index
    %c0_32 = arith.constant 0 : index
    %88 = vector.load %arg3[%c8, %c0_32] : memref<9x128xf32, #tpu.memory_space<vmem>>, vector<1x128xf32>
    %89 = vector.broadcast %88 : vector<1x128xf32> to vector<18x128xf32>
    %90 = arith.mulf %87, %89 : vector<18x128xf32>
    %91 = arith.addf %84, %90 : vector<18x128xf32>
    %c0_33 = arith.constant 0 : index
    %c0_34 = arith.constant 0 : index
    %92 = vector.load %arg4[%c0_33, %c0_34] : memref<1x128xf32, #tpu.memory_space<vmem>>, vector<1x128xf32>
    %93 = vector.broadcast %92 : vector<1x128xf32> to vector<18x128xf32>
    %94 = arith.mulf %91, %93 : vector<18x128xf32>
    %c0_35 = arith.constant 0 : index
    %c0_36 = arith.constant 0 : index
    %95 = vector.load %arg5[%c0_35, %c0_36] : memref<1x128xf32, #tpu.memory_space<vmem>>, vector<1x128xf32>
    %96 = vector.broadcast %95 : vector<1x128xf32> to vector<18x128xf32>
    %97 = arith.addf %94, %96 : vector<18x128xf32>
    %cst_37 = arith.constant 0.000000e+00 : f32
    %98 = vector.broadcast %cst_37 : f32 to vector<18x128xf32>
    %99 = arith.maximumf %97, %98 : vector<18x128xf32>
    %100 = arith.truncf %99 : vector<18x128xf32> to vector<18x128xbf16>
    %c0_38 = arith.constant 0 : index
    %c0_39 = arith.constant 0 : index
    %101 = vector.load %arg6[%c0_38, %c0_39] : memref<128x64xbf16, #tpu.memory_space<vmem>>, vector<128x64xbf16>
    %cst_40 = arith.constant dense<0.000000e+00> : vector<18x64xf32>
    %102 = tpu.matmul %100, %101, %cst_40 {dimension_numbers = #tpu.dot_dimension_numbers<[1], [0], [0], [1], [0, 0, 1, 1], [], []>} : vector<18x128xbf16>, vector<128x64xbf16>, vector<18x64xf32> -> vector<18x64xf32>
    %c0_41 = arith.constant 0 : index
    %c0_42 = arith.constant 0 : index
    %103 = vector.load %arg7[%c0_41, %c0_42] : memref<1x64xf32, #tpu.memory_space<vmem>>, vector<1x64xf32>
    %104 = vector.broadcast %103 : vector<1x64xf32> to vector<18x64xf32>
    %105 = arith.addf %102, %104 : vector<18x64xf32>
    %c0_43 = arith.constant 0 : index
    %c0_44 = arith.constant 0 : index
    %c0_45 = arith.constant 0 : index
    %106 = vector.load %arg8[%c0_43, %c0_44, %c0_45] : memref<2x18x64xf32, #tpu.memory_space<vmem>>, vector<1x18x64xf32>
    %107 = vector.shape_cast %106 : vector<1x18x64xf32> to vector<18x64xf32>
    %108 = vector.shape_cast %105 : vector<18x64xf32> to vector<1x18x64xf32>
    tpu.vector_store %arg8[%c0_43, %c0_44, %c0_45], %108 {strides = array<i32>} : memref<2x18x64xf32, #tpu.memory_space<vmem>>, vector<1x18x64xf32>,
    %cst_46 = arith.constant 0.000000e+00 : f32
    %109 = vector.broadcast %cst_46 : f32 to vector<18x128xf32>
    %c80 = arith.constant 80 : index
    %c0_47 = arith.constant 0 : index
    %110 = vector.load %arg9[%c80, %c0_47] : memref<160x128xbf16, #tpu.memory_space<vmem>>, vector<18x128xbf16>
    %111 = arith.extf %110 : vector<18x128xbf16> to vector<18x128xf32>
    %c0_48 = arith.constant 0 : index
    %c0_49 = arith.constant 0 : index
    %112 = vector.load %arg3[%c0_48, %c0_49] : memref<9x128xf32, #tpu.memory_space<vmem>>, vector<1x128xf32>
    %113 = vector.broadcast %112 : vector<1x128xf32> to vector<18x128xf32>
    %114 = arith.mulf %111, %113 : vector<18x128xf32>
    %115 = arith.addf %109, %114 : vector<18x128xf32>
    %c100 = arith.constant 100 : index
    %c0_50 = arith.constant 0 : index
    %116 = vector.load %arg9[%c100, %c0_50] : memref<160x128xbf16, #tpu.memory_space<vmem>>, vector<18x128xbf16>
    %117 = arith.extf %116 : vector<18x128xbf16> to vector<18x128xf32>
    %c101 = arith.constant 101 : index
    %c0_51 = arith.constant 0 : index
    %118 = vector.load %arg9[%c101, %c0_51] : memref<160x128xbf16, #tpu.memory_space<vmem>>, vector<18x128xbf16>
    %119 = arith.extf %118 : vector<18x128xbf16> to vector<18x128xf32>
    %120 = vector.extract_strided_slice %117 {offsets = [0, 32], sizes = [18, 96], strides = [1, 1]} : vector<18x128xf32> to vector<18x96xf32>
    %121 = vector.extract_strided_slice %119 {offsets = [0, 0], sizes = [18, 32], strides = [1, 1]} : vector<18x128xf32> to vector<18x32xf32>
    %122 = tpu.concatenate %120, %121 in 1 : vector<18x96xf32>, vector<18x32xf32> -> vector<18x128xf32>
    %c1_52 = arith.constant 1 : index
    %c0_53 = arith.constant 0 : index
    %123 = vector.load %arg3[%c1_52, %c0_53] : memref<9x128xf32, #tpu.memory_space<vmem>>, vector<1x128xf32>
    %124 = vector.broadcast %123 : vector<1x128xf32> to vector<18x128xf32>
    %125 = arith.mulf %122, %124 : vector<18x128xf32>
    %126 = arith.addf %115, %125 : vector<18x128xf32>
    %c81 = arith.constant 81 : index
    %c0_54 = arith.constant 0 : index
    %127 = vector.load %arg9[%c81, %c0_54] : memref<160x128xbf16, #tpu.memory_space<vmem>>, vector<18x128xbf16>
    %128 = arith.extf %127 : vector<18x128xbf16> to vector<18x128xf32>
    %129 = vector.extract_strided_slice %111 {offsets = [0, 32], sizes = [18, 96], strides = [1, 1]} : vector<18x128xf32> to vector<18x96xf32>
    %130 = vector.extract_strided_slice %128 {offsets = [0, 0], sizes = [18, 32], strides = [1, 1]} : vector<18x128xf32> to vector<18x32xf32>
    %131 = tpu.concatenate %129, %130 in 1 : vector<18x96xf32>, vector<18x32xf32> -> vector<18x128xf32>
    %c2_55 = arith.constant 2 : index
    %c0_56 = arith.constant 0 : index
    %132 = vector.load %arg3[%c2_55, %c0_56] : memref<9x128xf32, #tpu.memory_space<vmem>>, vector<1x128xf32>
    %133 = vector.broadcast %132 : vector<1x128xf32> to vector<18x128xf32>
    %134 = arith.mulf %131, %133 : vector<18x128xf32>
    %135 = arith.addf %126, %134 : vector<18x128xf32>
    %c120 = arith.constant 120 : index
    %c0_57 = arith.constant 0 : index
    %136 = vector.load %arg9[%c120, %c0_57] : memref<160x128xbf16, #tpu.memory_space<vmem>>, vector<18x128xbf16>
    %137 = arith.extf %136 : vector<18x128xbf16> to vector<18x128xf32>
    %c121 = arith.constant 121 : index
    %c0_58 = arith.constant 0 : index
    %138 = vector.load %arg9[%c121, %c0_58] : memref<160x128xbf16, #tpu.memory_space<vmem>>, vector<18x128xbf16>
    %139 = arith.extf %138 : vector<18x128xbf16> to vector<18x128xf32>
    %140 = vector.extract_strided_slice %137 {offsets = [0, 64], sizes = [18, 64], strides = [1, 1]} : vector<18x128xf32> to vector<18x64xf32>
    %141 = vector.extract_strided_slice %139 {offsets = [0, 0], sizes = [18, 64], strides = [1, 1]} : vector<18x128xf32> to vector<18x64xf32>
    %142 = tpu.concatenate %140, %141 in 1 : vector<18x64xf32>, vector<18x64xf32> -> vector<18x128xf32>
    %c3_59 = arith.constant 3 : index
    %c0_60 = arith.constant 0 : index
    %143 = vector.load %arg3[%c3_59, %c0_60] : memref<9x128xf32, #tpu.memory_space<vmem>>, vector<1x128xf32>
    %144 = vector.broadcast %143 : vector<1x128xf32> to vector<18x128xf32>
    %145 = arith.mulf %142, %144 : vector<18x128xf32>
    %146 = arith.addf %135, %145 : vector<18x128xf32>
    %c140 = arith.constant 140 : index
    %c0_61 = arith.constant 0 : index
    %147 = vector.load %arg9[%c140, %c0_61] : memref<160x128xbf16, #tpu.memory_space<vmem>>, vector<18x128xbf16>
    %148 = arith.extf %147 : vector<18x128xbf16> to vector<18x128xf32>
    %c141 = arith.constant 141 : index
    %c0_62 = arith.constant 0 : index
    %149 = vector.load %arg9[%c141, %c0_62] : memref<160x128xbf16, #tpu.memory_space<vmem>>, vector<18x128xbf16>
    %150 = arith.extf %149 : vector<18x128xbf16> to vector<18x128xf32>
    %151 = vector.extract_strided_slice %148 {offsets = [0, 96], sizes = [18, 32], strides = [1, 1]} : vector<18x128xf32> to vector<18x32xf32>
    %152 = vector.extract_strided_slice %150 {offsets = [0, 0], sizes = [18, 96], strides = [1, 1]} : vector<18x128xf32> to vector<18x96xf32>
    %153 = tpu.concatenate %151, %152 in 1 : vector<18x32xf32>, vector<18x96xf32> -> vector<18x128xf32>
    %c4_63 = arith.constant 4 : index
    %c0_64 = arith.constant 0 : index
    %154 = vector.load %arg3[%c4_63, %c0_64] : memref<9x128xf32, #tpu.memory_space<vmem>>, vector<1x128xf32>
    %155 = vector.broadcast %154 : vector<1x128xf32> to vector<18x128xf32>
    %156 = arith.mulf %153, %155 : vector<18x128xf32>
    %157 = arith.addf %146, %156 : vector<18x128xf32>
    %158 = vector.extract_strided_slice %137 {offsets = [0, 96], sizes = [18, 32], strides = [1, 1]} : vector<18x128xf32> to vector<18x32xf32>
    %159 = vector.extract_strided_slice %139 {offsets = [0, 0], sizes = [18, 96], strides = [1, 1]} : vector<18x128xf32> to vector<18x96xf32>
    %160 = tpu.concatenate %158, %159 in 1 : vector<18x32xf32>, vector<18x96xf32> -> vector<18x128xf32>
    %c5_65 = arith.constant 5 : index
    %c0_66 = arith.constant 0 : index
    %161 = vector.load %arg3[%c5_65, %c0_66] : memref<9x128xf32, #tpu.memory_space<vmem>>, vector<1x128xf32>
    %162 = vector.broadcast %161 : vector<1x128xf32> to vector<18x128xf32>
    %163 = arith.mulf %160, %162 : vector<18x128xf32>
    %164 = arith.addf %157, %163 : vector<18x128xf32>
    %c82 = arith.constant 82 : index
    %c0_67 = arith.constant 0 : index
    %165 = vector.load %arg9[%c82, %c0_67] : memref<160x128xbf16, #tpu.memory_space<vmem>>, vector<18x128xbf16>
    %166 = arith.extf %165 : vector<18x128xbf16> to vector<18x128xf32>
    %c83 = arith.constant 83 : index
    %c0_68 = arith.constant 0 : index
    %167 = vector.load %arg9[%c83, %c0_68] : memref<160x128xbf16, #tpu.memory_space<vmem>>, vector<18x128xbf16>
    %168 = arith.extf %167 : vector<18x128xbf16> to vector<18x128xf32>
    %169 = vector.extract_strided_slice %166 {offsets = [0, 32], sizes = [18, 96], strides = [1, 1]} : vector<18x128xf32> to vector<18x96xf32>
    %170 = vector.extract_strided_slice %168 {offsets = [0, 0], sizes = [18, 32], strides = [1, 1]} : vector<18x128xf32> to vector<18x32xf32>
    %171 = tpu.concatenate %169, %170 in 1 : vector<18x96xf32>, vector<18x32xf32> -> vector<18x128xf32>
    %c6_69 = arith.constant 6 : index
    %c0_70 = arith.constant 0 : index
    %172 = vector.load %arg3[%c6_69, %c0_70] : memref<9x128xf32, #tpu.memory_space<vmem>>, vector<1x128xf32>
    %173 = vector.broadcast %172 : vector<1x128xf32> to vector<18x128xf32>
    %174 = arith.mulf %171, %173 : vector<18x128xf32>
    %175 = arith.addf %164, %174 : vector<18x128xf32>
    %c102 = arith.constant 102 : index
    %c0_71 = arith.constant 0 : index
    %176 = vector.load %arg9[%c102, %c0_71] : memref<160x128xbf16, #tpu.memory_space<vmem>>, vector<18x128xbf16>
    %177 = arith.extf %176 : vector<18x128xbf16> to vector<18x128xf32>
    %c103 = arith.constant 103 : index
    %c0_72 = arith.constant 0 : index
    %178 = vector.load %arg9[%c103, %c0_72] : memref<160x128xbf16, #tpu.memory_space<vmem>>, vector<18x128xbf16>
    %179 = arith.extf %178 : vector<18x128xbf16> to vector<18x128xf32>
    %180 = vector.extract_strided_slice %177 {offsets = [0, 64], sizes = [18, 64], strides = [1, 1]} : vector<18x128xf32> to vector<18x64xf32>
    %181 = vector.extract_strided_slice %179 {offsets = [0, 0], sizes = [18, 64], strides = [1, 1]} : vector<18x128xf32> to vector<18x64xf32>
    %182 = tpu.concatenate %180, %181 in 1 : vector<18x64xf32>, vector<18x64xf32> -> vector<18x128xf32>
    %c7_73 = arith.constant 7 : index
    %c0_74 = arith.constant 0 : index
    %183 = vector.load %arg3[%c7_73, %c0_74] : memref<9x128xf32, #tpu.memory_space<vmem>>, vector<1x128xf32>
    %184 = vector.broadcast %183 : vector<1x128xf32> to vector<18x128xf32>
    %185 = arith.mulf %182, %184 : vector<18x128xf32>
    %186 = arith.addf %175, %185 : vector<18x128xf32>
    %187 = vector.extract_strided_slice %166 {offsets = [0, 64], sizes = [18, 64], strides = [1, 1]} : vector<18x128xf32> to vector<18x64xf32>
    %188 = vector.extract_strided_slice %168 {offsets = [0, 0], sizes = [18, 64], strides = [1, 1]} : vector<18x128xf32> to vector<18x64xf32>
    %189 = tpu.concatenate %187, %188 in 1 : vector<18x64xf32>, vector<18x64xf32> -> vector<18x128xf32>
    %c8_75 = arith.constant 8 : index
    %c0_76 = arith.constant 0 : index
    %190 = vector.load %arg3[%c8_75, %c0_76] : memref<9x128xf32, #tpu.memory_space<vmem>>, vector<1x128xf32>
    %191 = vector.broadcast %190 : vector<1x128xf32> to vector<18x128xf32>
    %192 = arith.mulf %189, %191 : vector<18x128xf32>
    %193 = arith.addf %186, %192 : vector<18x128xf32>
    %c0_77 = arith.constant 0 : index
    %c0_78 = arith.constant 0 : index
    %194 = vector.load %arg4[%c0_77, %c0_78] : memref<1x128xf32, #tpu.memory_space<vmem>>, vector<1x128xf32>
    %195 = vector.broadcast %194 : vector<1x128xf32> to vector<18x128xf32>
    %196 = arith.mulf %193, %195 : vector<18x128xf32>
    %c0_79 = arith.constant 0 : index
    %c0_80 = arith.constant 0 : index
    %197 = vector.load %arg5[%c0_79, %c0_80] : memref<1x128xf32, #tpu.memory_space<vmem>>, vector<1x128xf32>
    %198 = vector.broadcast %197 : vector<1x128xf32> to vector<18x128xf32>
    %199 = arith.addf %196, %198 : vector<18x128xf32>
    %cst_81 = arith.constant 0.000000e+00 : f32
    %200 = vector.broadcast %cst_81 : f32 to vector<18x128xf32>
    %201 = arith.maximumf %199, %200 : vector<18x128xf32>
    %202 = arith.truncf %201 : vector<18x128xf32> to vector<18x128xbf16>
    %c0_82 = arith.constant 0 : index
    %c0_83 = arith.constant 0 : index
    %203 = vector.load %arg6[%c0_82, %c0_83] : memref<128x64xbf16, #tpu.memory_space<vmem>>, vector<128x64xbf16>
    %cst_84 = arith.constant dense<0.000000e+00> : vector<18x64xf32>
    %204 = tpu.matmul %202, %203, %cst_84 {dimension_numbers = #tpu.dot_dimension_numbers<[1], [0], [0], [1], [0, 0, 1, 1], [], []>} : vector<18x128xbf16>, vector<128x64xbf16>, vector<18x64xf32> -> vector<18x64xf32>
    %c0_85 = arith.constant 0 : index
    %c0_86 = arith.constant 0 : index
    %205 = vector.load %arg7[%c0_85, %c0_86] : memref<1x64xf32, #tpu.memory_space<vmem>>, vector<1x64xf32>
    %206 = vector.broadcast %205 : vector<1x64xf32> to vector<18x64xf32>
    %207 = arith.addf %204, %206 : vector<18x64xf32>
    %c1_87 = arith.constant 1 : index
    %c0_88 = arith.constant 0 : index
    %c0_89 = arith.constant 0 : index
    %208 = vector.load %arg8[%c1_87, %c0_88, %c0_89] : memref<2x18x64xf32, #tpu.memory_space<vmem>>, vector<1x18x64xf32>
    %209 = vector.shape_cast %208 : vector<1x18x64xf32> to vector<18x64xf32>
    %210 = vector.shape_cast %207 : vector<18x64xf32> to vector<1x18x64xf32>
    tpu.vector_store %arg8[%c1_87, %c0_88, %c0_89], %210 {strides = array<i32>} : memref<2x18x64xf32, #tpu.memory_space<vmem>>, vector<1x18x64xf32>,
    return
  }
  func.func @transform_0(%arg0: i32) -> (i32, i32) {
    %c0_i32 = arith.constant 0 : i32
    %c0_i32_0 = arith.constant 0 : i32
    %c0_i32_1 = arith.constant 0 : i32
    return %c0_i32, %c0_i32_0 : i32, i32
  }
  func.func @transform_1(%arg0: i32) -> (i32, i32) {
    %c0_i32 = arith.constant 0 : i32
    %c0_i32_0 = arith.constant 0 : i32
    %c0_i32_1 = arith.constant 0 : i32
    return %c0_i32, %c0_i32_0 : i32, i32
  }
  func.func @transform_2(%arg0: i32) -> (i32, i32) {
    %c0_i32 = arith.constant 0 : i32
    %c0_i32_0 = arith.constant 0 : i32
    %c0_i32_1 = arith.constant 0 : i32
    return %c0_i32, %c0_i32_0 : i32, i32
  }
  func.func @transform_3(%arg0: i32) -> (i32, i32) {
    %c0_i32 = arith.constant 0 : i32
    %c0_i32_0 = arith.constant 0 : i32
    %c0_i32_1 = arith.constant 0 : i32
    return %c0_i32, %c0_i32_0 : i32, i32
  }
  func.func @transform_4(%arg0: i32) -> (i32, i32) {
    %c0_i32 = arith.constant 0 : i32
    %c0_i32_0 = arith.constant 0 : i32
    %c0_i32_1 = arith.constant 0 : i32
    return %c0_i32, %c0_i32_0 : i32, i32
  }
  func.func @transform_5(%arg0: i32) -> (i32, i32) {
    %c0_i32 = arith.constant 0 : i32
    %c0_i32_0 = arith.constant 0 : i32
    %c0_i32_1 = arith.constant 0 : i32
    return %c0_i32, %c0_i32_0 : i32, i32
  }
  func.func @transform_6(%arg0: i32) -> (i32, i32) {
    %c0_i32 = arith.constant 0 : i32
    %c0_i32_0 = arith.constant 0 : i32
    %c0_i32_1 = arith.constant 0 : i32
    return %c0_i32, %c0_i32_0 : i32, i32
  }
  func.func @transform_7(%arg0: i32) -> (i32, i32, i32) {
    %c0_i32 = arith.constant 0 : i32
    %c0_i32_0 = arith.constant 0 : i32
    %c0_i32_1 = arith.constant 0 : i32
    %c0_i32_2 = arith.constant 0 : i32
    return %c0_i32, %c0_i32_0, %c0_i32_1 : i32, i32, i32
  }
}

module attributes {stable_mosaic.version = 11 : i64} {
  func.func @kernel(%arg0: i32, %arg1: memref<224x36xbf16, #tpu.memory_space<vmem>>, %arg2: memref<36x128xbf16, #tpu.memory_space<vmem>>, %arg3: memref<9x128xf32, #tpu.memory_space<vmem>>, %arg4: memref<1x128xf32, #tpu.memory_space<vmem>>, %arg5: memref<1x128xf32, #tpu.memory_space<vmem>>, %arg6: memref<128x32xbf16, #tpu.memory_space<vmem>>, %arg7: memref<1x32xf32, #tpu.memory_space<vmem>>, %arg8: memref<2x96x32xf32, #tpu.memory_space<vmem>>, %arg9: memref<2x96x32xf32, #tpu.memory_space<vmem>>, %arg10: memref<224x128xbf16, #tpu.memory_space<vmem>>) attributes {dimension_semantics = [#tpu.dimension_semantics<arbitrary>], iteration_bounds = array<i64: 1>, scalar_prefetch = 0 : i64, scratch_operands = 1 : i64, tpu.core_type = #tpu.core_type<tc>, window_params = [{pipeline_mode = #tpu.pipeline_mode<synchronous>, transform_indices = @transform_0, window_bounds = array<i64: 224, 36>}, {pipeline_mode = #tpu.pipeline_mode<synchronous>, transform_indices = @transform_1, window_bounds = array<i64: 36, 128>}, {pipeline_mode = #tpu.pipeline_mode<synchronous>, transform_indices = @transform_2, window_bounds = array<i64: 9, 128>}, {pipeline_mode = #tpu.pipeline_mode<synchronous>, transform_indices = @transform_3, window_bounds = array<i64: 1, 128>}, {pipeline_mode = #tpu.pipeline_mode<synchronous>, transform_indices = @transform_4, window_bounds = array<i64: 1, 128>}, {pipeline_mode = #tpu.pipeline_mode<synchronous>, transform_indices = @transform_5, window_bounds = array<i64: 128, 32>}, {pipeline_mode = #tpu.pipeline_mode<synchronous>, transform_indices = @transform_6, window_bounds = array<i64: 1, 32>}, {pipeline_mode = #tpu.pipeline_mode<synchronous>, transform_indices = @transform_7, window_bounds = array<i64: 2, 96, 32>}, {pipeline_mode = #tpu.pipeline_mode<synchronous>, transform_indices = @transform_8, window_bounds = array<i64: 2, 96, 32>}]} {
    %c0 = arith.constant 0 : index
    %c0_0 = arith.constant 0 : index
    %0 = vector.load %arg1[%c0, %c0_0] : memref<224x36xbf16, #tpu.memory_space<vmem>>, vector<224x36xbf16>
    %c0_1 = arith.constant 0 : index
    %c0_2 = arith.constant 0 : index
    %1 = vector.load %arg2[%c0_1, %c0_2] : memref<36x128xbf16, #tpu.memory_space<vmem>>, vector<36x128xbf16>
    %cst = arith.constant dense<0.000000e+00> : vector<224x128xf32>
    %2 = tpu.matmul %0, %1, %cst {dimension_numbers = #tpu.dot_dimension_numbers<[1], [0], [0], [1], [0, 0, 1, 1], [], []>} : vector<224x36xbf16>, vector<36x128xbf16>, vector<224x128xf32> -> vector<224x128xf32>
    %cst_3 = arith.constant 0.000000e+00 : f32
    %3 = vector.broadcast %cst_3 : f32 to vector<224x128xf32>
    %4 = arith.maximumf %2, %3 : vector<224x128xf32>
    %5 = arith.truncf %4 : vector<224x128xf32> to vector<224x128xbf16>
    %c0_4 = arith.constant 0 : index
    %c0_5 = arith.constant 0 : index
    %6 = vector.load %arg10[%c0_4, %c0_5] : memref<224x128xbf16, #tpu.memory_space<vmem>>, vector<224x128xbf16>
    tpu.vector_store %arg10[%c0_4, %c0_5], %5 {strides = array<i32>} : memref<224x128xbf16, #tpu.memory_space<vmem>>, vector<224x128xbf16>,
    %cst_6 = arith.constant 0.000000e+00 : f32
    %7 = vector.broadcast %cst_6 : f32 to vector<96x128xf32>
    %c0_7 = arith.constant 0 : index
    %c0_8 = arith.constant 0 : index
    %8 = vector.load %arg10[%c0_7, %c0_8] : memref<224x128xbf16, #tpu.memory_space<vmem>>, vector<96x128xbf16>
    %9 = arith.extf %8 : vector<96x128xbf16> to vector<96x128xf32>
    %c0_9 = arith.constant 0 : index
    %c0_10 = arith.constant 0 : index
    %10 = vector.load %arg3[%c0_9, %c0_10] : memref<9x128xf32, #tpu.memory_space<vmem>>, vector<1x128xf32>
    %11 = vector.broadcast %10 : vector<1x128xf32> to vector<96x128xf32>
    %12 = arith.mulf %9, %11 : vector<96x128xf32>
    %13 = arith.addf %7, %12 : vector<96x128xf32>
    %c1 = arith.constant 1 : index
    %c0_11 = arith.constant 0 : index
    %14 = vector.load %arg10[%c1, %c0_11] : memref<224x128xbf16, #tpu.memory_space<vmem>>, vector<96x128xbf16>
    %15 = arith.extf %14 : vector<96x128xbf16> to vector<96x128xf32>
    %16 = vector.extract_strided_slice %9 {offsets = [0, 32], sizes = [96, 96], strides = [1, 1]} : vector<96x128xf32> to vector<96x96xf32>
    %17 = vector.extract_strided_slice %15 {offsets = [0, 0], sizes = [96, 32], strides = [1, 1]} : vector<96x128xf32> to vector<96x32xf32>
    %18 = tpu.concatenate %16, %17 in 1 : vector<96x96xf32>, vector<96x32xf32> -> vector<96x128xf32>
    %c1_12 = arith.constant 1 : index
    %c0_13 = arith.constant 0 : index
    %19 = vector.load %arg3[%c1_12, %c0_13] : memref<9x128xf32, #tpu.memory_space<vmem>>, vector<1x128xf32>
    %20 = vector.broadcast %19 : vector<1x128xf32> to vector<96x128xf32>
    %21 = arith.mulf %18, %20 : vector<96x128xf32>
    %22 = arith.addf %13, %21 : vector<96x128xf32>
    %23 = vector.extract_strided_slice %9 {offsets = [0, 64], sizes = [96, 64], strides = [1, 1]} : vector<96x128xf32> to vector<96x64xf32>
    %24 = vector.extract_strided_slice %15 {offsets = [0, 0], sizes = [96, 64], strides = [1, 1]} : vector<96x128xf32> to vector<96x64xf32>
    %25 = tpu.concatenate %23, %24 in 1 : vector<96x64xf32>, vector<96x64xf32> -> vector<96x128xf32>
    %c2 = arith.constant 2 : index
    %c0_14 = arith.constant 0 : index
    %26 = vector.load %arg3[%c2, %c0_14] : memref<9x128xf32, #tpu.memory_space<vmem>>, vector<1x128xf32>
    %27 = vector.broadcast %26 : vector<1x128xf32> to vector<96x128xf32>
    %28 = arith.mulf %25, %27 : vector<96x128xf32>
    %29 = arith.addf %22, %28 : vector<96x128xf32>
    %c6 = arith.constant 6 : index
    %c0_15 = arith.constant 0 : index
    %30 = vector.load %arg10[%c6, %c0_15] : memref<224x128xbf16, #tpu.memory_space<vmem>>, vector<96x128xbf16>
    %31 = arith.extf %30 : vector<96x128xbf16> to vector<96x128xf32>
    %c3 = arith.constant 3 : index
    %c0_16 = arith.constant 0 : index
    %32 = vector.load %arg3[%c3, %c0_16] : memref<9x128xf32, #tpu.memory_space<vmem>>, vector<1x128xf32>
    %33 = vector.broadcast %32 : vector<1x128xf32> to vector<96x128xf32>
    %34 = arith.mulf %31, %33 : vector<96x128xf32>
    %35 = arith.addf %29, %34 : vector<96x128xf32>
    %c7 = arith.constant 7 : index
    %c0_17 = arith.constant 0 : index
    %36 = vector.load %arg10[%c7, %c0_17] : memref<224x128xbf16, #tpu.memory_space<vmem>>, vector<96x128xbf16>
    %37 = arith.extf %36 : vector<96x128xbf16> to vector<96x128xf32>
    %38 = vector.extract_strided_slice %31 {offsets = [0, 32], sizes = [96, 96], strides = [1, 1]} : vector<96x128xf32> to vector<96x96xf32>
    %39 = vector.extract_strided_slice %37 {offsets = [0, 0], sizes = [96, 32], strides = [1, 1]} : vector<96x128xf32> to vector<96x32xf32>
    %40 = tpu.concatenate %38, %39 in 1 : vector<96x96xf32>, vector<96x32xf32> -> vector<96x128xf32>
    %c4 = arith.constant 4 : index
    %c0_18 = arith.constant 0 : index
    %41 = vector.load %arg3[%c4, %c0_18] : memref<9x128xf32, #tpu.memory_space<vmem>>, vector<1x128xf32>
    %42 = vector.broadcast %41 : vector<1x128xf32> to vector<96x128xf32>
    %43 = arith.mulf %40, %42 : vector<96x128xf32>
    %44 = arith.addf %35, %43 : vector<96x128xf32>
    %45 = vector.extract_strided_slice %31 {offsets = [0, 64], sizes = [96, 64], strides = [1, 1]} : vector<96x128xf32> to vector<96x64xf32>
    %46 = vector.extract_strided_slice %37 {offsets = [0, 0], sizes = [96, 64], strides = [1, 1]} : vector<96x128xf32> to vector<96x64xf32>
    %47 = tpu.concatenate %45, %46 in 1 : vector<96x64xf32>, vector<96x64xf32> -> vector<96x128xf32>
    %c5 = arith.constant 5 : index
    %c0_19 = arith.constant 0 : index
    %48 = vector.load %arg3[%c5, %c0_19] : memref<9x128xf32, #tpu.memory_space<vmem>>, vector<1x128xf32>
    %49 = vector.broadcast %48 : vector<1x128xf32> to vector<96x128xf32>
    %50 = arith.mulf %47, %49 : vector<96x128xf32>
    %51 = arith.addf %44, %50 : vector<96x128xf32>
    %c12 = arith.constant 12 : index
    %c0_20 = arith.constant 0 : index
    %52 = vector.load %arg10[%c12, %c0_20] : memref<224x128xbf16, #tpu.memory_space<vmem>>, vector<96x128xbf16>
    %53 = arith.extf %52 : vector<96x128xbf16> to vector<96x128xf32>
    %c6_21 = arith.constant 6 : index
    %c0_22 = arith.constant 0 : index
    %54 = vector.load %arg3[%c6_21, %c0_22] : memref<9x128xf32, #tpu.memory_space<vmem>>, vector<1x128xf32>
    %55 = vector.broadcast %54 : vector<1x128xf32> to vector<96x128xf32>
    %56 = arith.mulf %53, %55 : vector<96x128xf32>
    %57 = arith.addf %51, %56 : vector<96x128xf32>
    %c13 = arith.constant 13 : index
    %c0_23 = arith.constant 0 : index
    %58 = vector.load %arg10[%c13, %c0_23] : memref<224x128xbf16, #tpu.memory_space<vmem>>, vector<96x128xbf16>
    %59 = arith.extf %58 : vector<96x128xbf16> to vector<96x128xf32>
    %60 = vector.extract_strided_slice %53 {offsets = [0, 32], sizes = [96, 96], strides = [1, 1]} : vector<96x128xf32> to vector<96x96xf32>
    %61 = vector.extract_strided_slice %59 {offsets = [0, 0], sizes = [96, 32], strides = [1, 1]} : vector<96x128xf32> to vector<96x32xf32>
    %62 = tpu.concatenate %60, %61 in 1 : vector<96x96xf32>, vector<96x32xf32> -> vector<96x128xf32>
    %c7_24 = arith.constant 7 : index
    %c0_25 = arith.constant 0 : index
    %63 = vector.load %arg3[%c7_24, %c0_25] : memref<9x128xf32, #tpu.memory_space<vmem>>, vector<1x128xf32>
    %64 = vector.broadcast %63 : vector<1x128xf32> to vector<96x128xf32>
    %65 = arith.mulf %62, %64 : vector<96x128xf32>
    %66 = arith.addf %57, %65 : vector<96x128xf32>
    %67 = vector.extract_strided_slice %53 {offsets = [0, 64], sizes = [96, 64], strides = [1, 1]} : vector<96x128xf32> to vector<96x64xf32>
    %68 = vector.extract_strided_slice %59 {offsets = [0, 0], sizes = [96, 64], strides = [1, 1]} : vector<96x128xf32> to vector<96x64xf32>
    %69 = tpu.concatenate %67, %68 in 1 : vector<96x64xf32>, vector<96x64xf32> -> vector<96x128xf32>
    %c8 = arith.constant 8 : index
    %c0_26 = arith.constant 0 : index
    %70 = vector.load %arg3[%c8, %c0_26] : memref<9x128xf32, #tpu.memory_space<vmem>>, vector<1x128xf32>
    %71 = vector.broadcast %70 : vector<1x128xf32> to vector<96x128xf32>
    %72 = arith.mulf %69, %71 : vector<96x128xf32>
    %73 = arith.addf %66, %72 : vector<96x128xf32>
    %c0_27 = arith.constant 0 : index
    %c0_28 = arith.constant 0 : index
    %74 = vector.load %arg4[%c0_27, %c0_28] : memref<1x128xf32, #tpu.memory_space<vmem>>, vector<1x128xf32>
    %75 = vector.broadcast %74 : vector<1x128xf32> to vector<96x128xf32>
    %76 = arith.mulf %73, %75 : vector<96x128xf32>
    %c0_29 = arith.constant 0 : index
    %c0_30 = arith.constant 0 : index
    %77 = vector.load %arg5[%c0_29, %c0_30] : memref<1x128xf32, #tpu.memory_space<vmem>>, vector<1x128xf32>
    %78 = vector.broadcast %77 : vector<1x128xf32> to vector<96x128xf32>
    %79 = arith.addf %76, %78 : vector<96x128xf32>
    %cst_31 = arith.constant 0.000000e+00 : f32
    %80 = vector.broadcast %cst_31 : f32 to vector<96x128xf32>
    %81 = arith.maximumf %79, %80 : vector<96x128xf32>
    %82 = arith.truncf %81 : vector<96x128xf32> to vector<96x128xbf16>
    %c0_32 = arith.constant 0 : index
    %c0_33 = arith.constant 0 : index
    %83 = vector.load %arg6[%c0_32, %c0_33] : memref<128x32xbf16, #tpu.memory_space<vmem>>, vector<128x32xbf16>
    %cst_34 = arith.constant dense<0.000000e+00> : vector<96x32xf32>
    %84 = tpu.matmul %82, %83, %cst_34 {dimension_numbers = #tpu.dot_dimension_numbers<[1], [0], [0], [1], [0, 0, 1, 1], [], []>} : vector<96x128xbf16>, vector<128x32xbf16>, vector<96x32xf32> -> vector<96x32xf32>
    %c0_35 = arith.constant 0 : index
    %c0_36 = arith.constant 0 : index
    %85 = vector.load %arg7[%c0_35, %c0_36] : memref<1x32xf32, #tpu.memory_space<vmem>>, vector<1x32xf32>
    %86 = vector.broadcast %85 : vector<1x32xf32> to vector<96x32xf32>
    %87 = arith.addf %84, %86 : vector<96x32xf32>
    %c0_37 = arith.constant 0 : index
    %c0_38 = arith.constant 0 : index
    %c0_39 = arith.constant 0 : index
    %88 = vector.load %arg8[%c0_37, %c0_38, %c0_39] : memref<2x96x32xf32, #tpu.memory_space<vmem>>, vector<1x96x32xf32>
    %89 = vector.shape_cast %88 : vector<1x96x32xf32> to vector<96x32xf32>
    %90 = arith.addf %87, %89 : vector<96x32xf32>
    %c0_40 = arith.constant 0 : index
    %c0_41 = arith.constant 0 : index
    %c0_42 = arith.constant 0 : index
    %91 = vector.load %arg9[%c0_40, %c0_41, %c0_42] : memref<2x96x32xf32, #tpu.memory_space<vmem>>, vector<1x96x32xf32>
    %92 = vector.shape_cast %91 : vector<1x96x32xf32> to vector<96x32xf32>
    %93 = vector.shape_cast %90 : vector<96x32xf32> to vector<1x96x32xf32>
    tpu.vector_store %arg9[%c0_40, %c0_41, %c0_42], %93 {strides = array<i32>} : memref<2x96x32xf32, #tpu.memory_space<vmem>>, vector<1x96x32xf32>,
    %cst_43 = arith.constant 0.000000e+00 : f32
    %94 = vector.broadcast %cst_43 : f32 to vector<96x128xf32>
    %c112 = arith.constant 112 : index
    %c0_44 = arith.constant 0 : index
    %95 = vector.load %arg10[%c112, %c0_44] : memref<224x128xbf16, #tpu.memory_space<vmem>>, vector<96x128xbf16>
    %96 = arith.extf %95 : vector<96x128xbf16> to vector<96x128xf32>
    %c0_45 = arith.constant 0 : index
    %c0_46 = arith.constant 0 : index
    %97 = vector.load %arg3[%c0_45, %c0_46] : memref<9x128xf32, #tpu.memory_space<vmem>>, vector<1x128xf32>
    %98 = vector.broadcast %97 : vector<1x128xf32> to vector<96x128xf32>
    %99 = arith.mulf %96, %98 : vector<96x128xf32>
    %100 = arith.addf %94, %99 : vector<96x128xf32>
    %c113 = arith.constant 113 : index
    %c0_47 = arith.constant 0 : index
    %101 = vector.load %arg10[%c113, %c0_47] : memref<224x128xbf16, #tpu.memory_space<vmem>>, vector<96x128xbf16>
    %102 = arith.extf %101 : vector<96x128xbf16> to vector<96x128xf32>
    %103 = vector.extract_strided_slice %96 {offsets = [0, 32], sizes = [96, 96], strides = [1, 1]} : vector<96x128xf32> to vector<96x96xf32>
    %104 = vector.extract_strided_slice %102 {offsets = [0, 0], sizes = [96, 32], strides = [1, 1]} : vector<96x128xf32> to vector<96x32xf32>
    %105 = tpu.concatenate %103, %104 in 1 : vector<96x96xf32>, vector<96x32xf32> -> vector<96x128xf32>
    %c1_48 = arith.constant 1 : index
    %c0_49 = arith.constant 0 : index
    %106 = vector.load %arg3[%c1_48, %c0_49] : memref<9x128xf32, #tpu.memory_space<vmem>>, vector<1x128xf32>
    %107 = vector.broadcast %106 : vector<1x128xf32> to vector<96x128xf32>
    %108 = arith.mulf %105, %107 : vector<96x128xf32>
    %109 = arith.addf %100, %108 : vector<96x128xf32>
    %110 = vector.extract_strided_slice %96 {offsets = [0, 64], sizes = [96, 64], strides = [1, 1]} : vector<96x128xf32> to vector<96x64xf32>
    %111 = vector.extract_strided_slice %102 {offsets = [0, 0], sizes = [96, 64], strides = [1, 1]} : vector<96x128xf32> to vector<96x64xf32>
    %112 = tpu.concatenate %110, %111 in 1 : vector<96x64xf32>, vector<96x64xf32> -> vector<96x128xf32>
    %c2_50 = arith.constant 2 : index
    %c0_51 = arith.constant 0 : index
    %113 = vector.load %arg3[%c2_50, %c0_51] : memref<9x128xf32, #tpu.memory_space<vmem>>, vector<1x128xf32>
    %114 = vector.broadcast %113 : vector<1x128xf32> to vector<96x128xf32>
    %115 = arith.mulf %112, %114 : vector<96x128xf32>
    %116 = arith.addf %109, %115 : vector<96x128xf32>
    %c118 = arith.constant 118 : index
    %c0_52 = arith.constant 0 : index
    %117 = vector.load %arg10[%c118, %c0_52] : memref<224x128xbf16, #tpu.memory_space<vmem>>, vector<96x128xbf16>
    %118 = arith.extf %117 : vector<96x128xbf16> to vector<96x128xf32>
    %c3_53 = arith.constant 3 : index
    %c0_54 = arith.constant 0 : index
    %119 = vector.load %arg3[%c3_53, %c0_54] : memref<9x128xf32, #tpu.memory_space<vmem>>, vector<1x128xf32>
    %120 = vector.broadcast %119 : vector<1x128xf32> to vector<96x128xf32>
    %121 = arith.mulf %118, %120 : vector<96x128xf32>
    %122 = arith.addf %116, %121 : vector<96x128xf32>
    %c119 = arith.constant 119 : index
    %c0_55 = arith.constant 0 : index
    %123 = vector.load %arg10[%c119, %c0_55] : memref<224x128xbf16, #tpu.memory_space<vmem>>, vector<96x128xbf16>
    %124 = arith.extf %123 : vector<96x128xbf16> to vector<96x128xf32>
    %125 = vector.extract_strided_slice %118 {offsets = [0, 32], sizes = [96, 96], strides = [1, 1]} : vector<96x128xf32> to vector<96x96xf32>
    %126 = vector.extract_strided_slice %124 {offsets = [0, 0], sizes = [96, 32], strides = [1, 1]} : vector<96x128xf32> to vector<96x32xf32>
    %127 = tpu.concatenate %125, %126 in 1 : vector<96x96xf32>, vector<96x32xf32> -> vector<96x128xf32>
    %c4_56 = arith.constant 4 : index
    %c0_57 = arith.constant 0 : index
    %128 = vector.load %arg3[%c4_56, %c0_57] : memref<9x128xf32, #tpu.memory_space<vmem>>, vector<1x128xf32>
    %129 = vector.broadcast %128 : vector<1x128xf32> to vector<96x128xf32>
    %130 = arith.mulf %127, %129 : vector<96x128xf32>
    %131 = arith.addf %122, %130 : vector<96x128xf32>
    %132 = vector.extract_strided_slice %118 {offsets = [0, 64], sizes = [96, 64], strides = [1, 1]} : vector<96x128xf32> to vector<96x64xf32>
    %133 = vector.extract_strided_slice %124 {offsets = [0, 0], sizes = [96, 64], strides = [1, 1]} : vector<96x128xf32> to vector<96x64xf32>
    %134 = tpu.concatenate %132, %133 in 1 : vector<96x64xf32>, vector<96x64xf32> -> vector<96x128xf32>
    %c5_58 = arith.constant 5 : index
    %c0_59 = arith.constant 0 : index
    %135 = vector.load %arg3[%c5_58, %c0_59] : memref<9x128xf32, #tpu.memory_space<vmem>>, vector<1x128xf32>
    %136 = vector.broadcast %135 : vector<1x128xf32> to vector<96x128xf32>
    %137 = arith.mulf %134, %136 : vector<96x128xf32>
    %138 = arith.addf %131, %137 : vector<96x128xf32>
    %c124 = arith.constant 124 : index
    %c0_60 = arith.constant 0 : index
    %139 = vector.load %arg10[%c124, %c0_60] : memref<224x128xbf16, #tpu.memory_space<vmem>>, vector<96x128xbf16>
    %140 = arith.extf %139 : vector<96x128xbf16> to vector<96x128xf32>
    %c6_61 = arith.constant 6 : index
    %c0_62 = arith.constant 0 : index
    %141 = vector.load %arg3[%c6_61, %c0_62] : memref<9x128xf32, #tpu.memory_space<vmem>>, vector<1x128xf32>
    %142 = vector.broadcast %141 : vector<1x128xf32> to vector<96x128xf32>
    %143 = arith.mulf %140, %142 : vector<96x128xf32>
    %144 = arith.addf %138, %143 : vector<96x128xf32>
    %c125 = arith.constant 125 : index
    %c0_63 = arith.constant 0 : index
    %145 = vector.load %arg10[%c125, %c0_63] : memref<224x128xbf16, #tpu.memory_space<vmem>>, vector<96x128xbf16>
    %146 = arith.extf %145 : vector<96x128xbf16> to vector<96x128xf32>
    %147 = vector.extract_strided_slice %140 {offsets = [0, 32], sizes = [96, 96], strides = [1, 1]} : vector<96x128xf32> to vector<96x96xf32>
    %148 = vector.extract_strided_slice %146 {offsets = [0, 0], sizes = [96, 32], strides = [1, 1]} : vector<96x128xf32> to vector<96x32xf32>
    %149 = tpu.concatenate %147, %148 in 1 : vector<96x96xf32>, vector<96x32xf32> -> vector<96x128xf32>
    %c7_64 = arith.constant 7 : index
    %c0_65 = arith.constant 0 : index
    %150 = vector.load %arg3[%c7_64, %c0_65] : memref<9x128xf32, #tpu.memory_space<vmem>>, vector<1x128xf32>
    %151 = vector.broadcast %150 : vector<1x128xf32> to vector<96x128xf32>
    %152 = arith.mulf %149, %151 : vector<96x128xf32>
    %153 = arith.addf %144, %152 : vector<96x128xf32>
    %154 = vector.extract_strided_slice %140 {offsets = [0, 64], sizes = [96, 64], strides = [1, 1]} : vector<96x128xf32> to vector<96x64xf32>
    %155 = vector.extract_strided_slice %146 {offsets = [0, 0], sizes = [96, 64], strides = [1, 1]} : vector<96x128xf32> to vector<96x64xf32>
    %156 = tpu.concatenate %154, %155 in 1 : vector<96x64xf32>, vector<96x64xf32> -> vector<96x128xf32>
    %c8_66 = arith.constant 8 : index
    %c0_67 = arith.constant 0 : index
    %157 = vector.load %arg3[%c8_66, %c0_67] : memref<9x128xf32, #tpu.memory_space<vmem>>, vector<1x128xf32>
    %158 = vector.broadcast %157 : vector<1x128xf32> to vector<96x128xf32>
    %159 = arith.mulf %156, %158 : vector<96x128xf32>
    %160 = arith.addf %153, %159 : vector<96x128xf32>
    %c0_68 = arith.constant 0 : index
    %c0_69 = arith.constant 0 : index
    %161 = vector.load %arg4[%c0_68, %c0_69] : memref<1x128xf32, #tpu.memory_space<vmem>>, vector<1x128xf32>
    %162 = vector.broadcast %161 : vector<1x128xf32> to vector<96x128xf32>
    %163 = arith.mulf %160, %162 : vector<96x128xf32>
    %c0_70 = arith.constant 0 : index
    %c0_71 = arith.constant 0 : index
    %164 = vector.load %arg5[%c0_70, %c0_71] : memref<1x128xf32, #tpu.memory_space<vmem>>, vector<1x128xf32>
    %165 = vector.broadcast %164 : vector<1x128xf32> to vector<96x128xf32>
    %166 = arith.addf %163, %165 : vector<96x128xf32>
    %cst_72 = arith.constant 0.000000e+00 : f32
    %167 = vector.broadcast %cst_72 : f32 to vector<96x128xf32>
    %168 = arith.maximumf %166, %167 : vector<96x128xf32>
    %169 = arith.truncf %168 : vector<96x128xf32> to vector<96x128xbf16>
    %c0_73 = arith.constant 0 : index
    %c0_74 = arith.constant 0 : index
    %170 = vector.load %arg6[%c0_73, %c0_74] : memref<128x32xbf16, #tpu.memory_space<vmem>>, vector<128x32xbf16>
    %cst_75 = arith.constant dense<0.000000e+00> : vector<96x32xf32>
    %171 = tpu.matmul %169, %170, %cst_75 {dimension_numbers = #tpu.dot_dimension_numbers<[1], [0], [0], [1], [0, 0, 1, 1], [], []>} : vector<96x128xbf16>, vector<128x32xbf16>, vector<96x32xf32> -> vector<96x32xf32>
    %c0_76 = arith.constant 0 : index
    %c0_77 = arith.constant 0 : index
    %172 = vector.load %arg7[%c0_76, %c0_77] : memref<1x32xf32, #tpu.memory_space<vmem>>, vector<1x32xf32>
    %173 = vector.broadcast %172 : vector<1x32xf32> to vector<96x32xf32>
    %174 = arith.addf %171, %173 : vector<96x32xf32>
    %c1_78 = arith.constant 1 : index
    %c0_79 = arith.constant 0 : index
    %c0_80 = arith.constant 0 : index
    %175 = vector.load %arg8[%c1_78, %c0_79, %c0_80] : memref<2x96x32xf32, #tpu.memory_space<vmem>>, vector<1x96x32xf32>
    %176 = vector.shape_cast %175 : vector<1x96x32xf32> to vector<96x32xf32>
    %177 = arith.addf %174, %176 : vector<96x32xf32>
    %c1_81 = arith.constant 1 : index
    %c0_82 = arith.constant 0 : index
    %c0_83 = arith.constant 0 : index
    %178 = vector.load %arg9[%c1_81, %c0_82, %c0_83] : memref<2x96x32xf32, #tpu.memory_space<vmem>>, vector<1x96x32xf32>
    %179 = vector.shape_cast %178 : vector<1x96x32xf32> to vector<96x32xf32>
    %180 = vector.shape_cast %177 : vector<96x32xf32> to vector<1x96x32xf32>
    tpu.vector_store %arg9[%c1_81, %c0_82, %c0_83], %180 {strides = array<i32>} : memref<2x96x32xf32, #tpu.memory_space<vmem>>, vector<1x96x32xf32>,
    return
  }
  func.func @transform_0(%arg0: i32) -> (i32, i32) {
    %c0_i32 = arith.constant 0 : i32
    %c0_i32_0 = arith.constant 0 : i32
    %c0_i32_1 = arith.constant 0 : i32
    return %c0_i32, %c0_i32_0 : i32, i32
  }
  func.func @transform_1(%arg0: i32) -> (i32, i32) {
    %c0_i32 = arith.constant 0 : i32
    %c0_i32_0 = arith.constant 0 : i32
    %c0_i32_1 = arith.constant 0 : i32
    return %c0_i32, %c0_i32_0 : i32, i32
  }
  func.func @transform_2(%arg0: i32) -> (i32, i32) {
    %c0_i32 = arith.constant 0 : i32
    %c0_i32_0 = arith.constant 0 : i32
    %c0_i32_1 = arith.constant 0 : i32
    return %c0_i32, %c0_i32_0 : i32, i32
  }
  func.func @transform_3(%arg0: i32) -> (i32, i32) {
    %c0_i32 = arith.constant 0 : i32
    %c0_i32_0 = arith.constant 0 : i32
    %c0_i32_1 = arith.constant 0 : i32
    return %c0_i32, %c0_i32_0 : i32, i32
  }
  func.func @transform_4(%arg0: i32) -> (i32, i32) {
    %c0_i32 = arith.constant 0 : i32
    %c0_i32_0 = arith.constant 0 : i32
    %c0_i32_1 = arith.constant 0 : i32
    return %c0_i32, %c0_i32_0 : i32, i32
  }
  func.func @transform_5(%arg0: i32) -> (i32, i32) {
    %c0_i32 = arith.constant 0 : i32
    %c0_i32_0 = arith.constant 0 : i32
    %c0_i32_1 = arith.constant 0 : i32
    return %c0_i32, %c0_i32_0 : i32, i32
  }
  func.func @transform_6(%arg0: i32) -> (i32, i32) {
    %c0_i32 = arith.constant 0 : i32
    %c0_i32_0 = arith.constant 0 : i32
    %c0_i32_1 = arith.constant 0 : i32
    return %c0_i32, %c0_i32_0 : i32, i32
  }
  func.func @transform_7(%arg0: i32) -> (i32, i32, i32) {
    %c0_i32 = arith.constant 0 : i32
    %c0_i32_0 = arith.constant 0 : i32
    %c0_i32_1 = arith.constant 0 : i32
    %c0_i32_2 = arith.constant 0 : i32
    return %c0_i32, %c0_i32_0, %c0_i32_1 : i32, i32, i32
  }
  func.func @transform_8(%arg0: i32) -> (i32, i32, i32) {
    %c0_i32 = arith.constant 0 : i32
    %c0_i32_0 = arith.constant 0 : i32
    %c0_i32_1 = arith.constant 0 : i32
    %c0_i32_2 = arith.constant 0 : i32
    return %c0_i32, %c0_i32_0, %c0_i32_1 : i32, i32, i32
  }
}

</mosaic_0001>

<bundles_post_ra>
// kernel: tile.38
= control target key start
LH: loop header
LB: loop body
LE: loop exit
PB: predicated region body
PF: predicated region fallthrough
CT: control target
= control target key end

     0   :  { %s22_s0 = inlined_call_operand.vmem [shape: f32[32], index: 0, kind: input, shape index: {}]   ;;  %s23_s1 = inlined_call_operand.vmem [shape: f32[4,32], index: 1, kind: output, shape index: {}]  }
   0x1   :  { %v4_v0 = vld [vmem:[%s22_s0] ss:$0 sm:$0xff] }
   0x2   :  { %5 = vst [vmem:[%s23_s1] sm:$0xf] %v4_v0 }

// kernel: tile.39
= control target key start
LH: loop header
LB: loop body
LE: loop exit
PB: predicated region body
PF: predicated region fallthrough
CT: control target
= control target key end

     0   :  { %vm8_vm0 = vcmask 261120   ;;  %s40_s8 = smov 32   ;;  %s41_s9 = smov 64   ;;  %vm14_vm1 = vcmask 1048320   ;;  %vm20_vm2 = vcmask 785920   ;;  %vm26_vm3 = vcmask 523520   ;;  %s58_s0 = inlined_call_operand.vmem [shape: f32[4,32], index: 0, kind: input, shape index: {}]   ;;  %s59_s1 = inlined_call_operand.vmem [shape: f32[1,128], index: 1, kind: output, shape index: {}]  }
   0x1   :  { %v5_v0 = vld [vmem:[%s58_s0] sm:$0xf]  ;;  %s39_s0 = smov 96  }
   0x2   :  { %6 = vst [vmem:[#allocation1] sm:$0xf] %v5_v0 }
   0x9   :  { %v11_v1 = vld [vmem:[#allocation1 + $0x3] sm:$0x1]   ;;  %v23_v2 = vld [vmem:[#allocation1 + $0x1] sm:$0x1]   ;;  %v7_v3 = vld [vmem:[#allocation1] sm:$0x1]  }
   0xa   :  { %12 = vrot.lane.b32.xlu0 %v11_v1, %s39_s0  ;;  %24 = vrot.lane.b32.xlu1 %v23_v2, %s40_s8  ;;  %v17_v4 = vld [vmem:[#allocation1 + $0x2] sm:$0x1]   ;;  %9 = vst.msk [vmem:[#allocation0] sm:$0x1] %vm8_vm0, %v7_v3  }
   0xe   :  { %18 = vrot.lane.b32.xlu0 %v17_v4, %s41_s9 }
  0x7c   :  { %v13_v5 = vpop.permute.xlu0 %12   ;;  %v25_v6 = vpop.permute.xlu1 %24  }
  0x7d   :  { %15 = vst.msk [vmem:[#allocation0] sm:$0x1] %vm14_vm1, %v13_v5  }
  0x80   :  { %v19_v7 = vpop.permute.xlu0 %18  }
  0x81   :  { %21 = vst.msk [vmem:[#allocation0] sm:$0x1] %vm20_vm2, %v19_v7  }
  0x82   :  { %27 = vst.msk [vmem:[#allocation0] sm:$0x1] %vm26_vm3, %v25_v6  }
  0x89   :  { %v32_v8 = vld [vmem:[#allocation0] sm:$0x1] }
  0x8a   :  { %35 = vst [vmem:[%s59_s1] sm:$0x1] %v32_v8 }

// kernel: tile.47
= control target key start
LH: loop header
LB: loop body
LE: loop exit
PB: predicated region body
PF: predicated region fallthrough
CT: control target
= control target key end

     0   :  { %vm8_vm0 = vcmask 64512   ;;  %s40_s8 = smov 8   ;;  %s41_s9 = smov 16   ;;  %vm14_vm1 = vcmask 261312   ;;  %vm20_vm2 = vcmask 195712   ;;  %vm26_vm3 = vcmask 130112   ;;  %s58_s0 = inlined_call_operand.vmem [shape: f32[4,8], index: 0, kind: input, shape index: {}]   ;;  %s59_s1 = inlined_call_operand.vmem [shape: f32[1,32], index: 1, kind: output, shape index: {}]  }
   0x1   :  { %v5_v0 = vld [vmem:[%s58_s0] sm:$0xf]  ;;  %s39_s0 = smov 24  }
   0x2   :  { %6 = vst [vmem:[#allocation1] sm:$0xf] %v5_v0 }
   0x9   :  { %v11_v1 = vld [vmem:[#allocation1 + $0x3] sm:$0x1]   ;;  %v23_v2 = vld [vmem:[#allocation1 + $0x1] sm:$0x1]   ;;  %v7_v3 = vld [vmem:[#allocation1] sm:$0x1]  }
   0xa   :  { %12 = vrot.lane.b32.xlu0 %v11_v1, %s39_s0  ;;  %24 = vrot.lane.b32.xlu1 %v23_v2, %s40_s8  ;;  %v17_v4 = vld [vmem:[#allocation1 + $0x2] sm:$0x1]   ;;  %9 = vst.msk [vmem:[#allocation0] sm:$0x1] %vm8_vm0, %v7_v3  }
   0xe   :  { %18 = vrot.lane.b32.xlu0 %v17_v4, %s41_s9 }
  0x7c   :  { %v13_v5 = vpop.permute.xlu0 %12   ;;  %v25_v6 = vpop.permute.xlu1 %24  }
  0x7d   :  { %15 = vst.msk [vmem:[#allocation0] sm:$0x1] %vm14_vm1, %v13_v5  }
  0x80   :  { %v19_v7 = vpop.permute.xlu0 %18  }
  0x81   :  { %21 = vst.msk [vmem:[#allocation0] sm:$0x1] %vm20_vm2, %v19_v7  }
  0x82   :  { %27 = vst.msk [vmem:[#allocation0] sm:$0x1] %vm26_vm3, %v25_v6  }
  0x89   :  { %v32_v8 = vld [vmem:[#allocation0] sm:$0x1] }
  0x8a   :  { %35 = vst [vmem:[%s59_s1] sm:$0x1] %v32_v8 }

// kernel: tile.46
= control target key start
LH: loop header
LB: loop body
LE: loop exit
PB: predicated region body
PF: predicated region fallthrough
CT: control target
= control target key end

     0   :  { %s22_s0 = inlined_call_operand.vmem [shape: f32[8], index: 0, kind: input, shape index: {}]   ;;  %s23_s1 = inlined_call_operand.vmem [shape: f32[4,8], index: 1, kind: output, shape index: {}]  }
   0x1   :  { %v4_v0 = vld [vmem:[%s22_s0] ss:$0 sm:$0xff] }
   0x2   :  { %5 = vst [vmem:[%s23_s1] sm:$0xf] %v4_v0 }

// kernel: tile.62
= control target key start
LH: loop header
LB: loop body
LE: loop exit
PB: predicated region body
PF: predicated region fallthrough
CT: control target
= control target key end

     0   :  { %s22_s0 = inlined_call_operand.vmem [shape: f32[16], index: 0, kind: input, shape index: {}]   ;;  %s23_s1 = inlined_call_operand.vmem [shape: f32[4,16], index: 1, kind: output, shape index: {}]  }
   0x1   :  { %v4_v0 = vld [vmem:[%s22_s0] ss:$0 sm:$0xff] }
   0x2   :  { %5 = vst [vmem:[%s23_s1] sm:$0xf] %v4_v0 }

// kernel: tile.63
= control target key start
LH: loop header
LB: loop body
LE: loop exit
PB: predicated region body
PF: predicated region fallthrough
CT: control target
= control target key end

     0   :  { %vm8_vm0 = vcmask 130048   ;;  %s40_s8 = smov 16   ;;  %s41_s9 = smov 32   ;;  %vm14_vm1 = vcmask 523648   ;;  %vm20_vm2 = vcmask 392448   ;;  %vm26_vm3 = vcmask 261248   ;;  %s58_s0 = inlined_call_operand.vmem [shape: f32[4,16], index: 0, kind: input, shape index: {}]   ;;  %s59_s1 = inlined_call_operand.vmem [shape: f32[1,64], index: 1, kind: output, shape index: {}]  }
   0x1   :  { %v5_v0 = vld [vmem:[%s58_s0] sm:$0xf]  ;;  %s39_s0 = smov 48  }
   0x2   :  { %6 = vst [vmem:[#allocation1] sm:$0xf] %v5_v0 }
   0x9   :  { %v11_v1 = vld [vmem:[#allocation1 + $0x3] sm:$0x1]   ;;  %v23_v2 = vld [vmem:[#allocation1 + $0x1] sm:$0x1]   ;;  %v7_v3 = vld [vmem:[#allocation1] sm:$0x1]  }
   0xa   :  { %12 = vrot.lane.b32.xlu0 %v11_v1, %s39_s0  ;;  %24 = vrot.lane.b32.xlu1 %v23_v2, %s40_s8  ;;  %v17_v4 = vld [vmem:[#allocation1 + $0x2] sm:$0x1]   ;;  %9 = vst.msk [vmem:[#allocation0] sm:$0x1] %vm8_vm0, %v7_v3  }
   0xe   :  { %18 = vrot.lane.b32.xlu0 %v17_v4, %s41_s9 }
  0x7c   :  { %v13_v5 = vpop.permute.xlu0 %12   ;;  %v25_v6 = vpop.permute.xlu1 %24  }
  0x7d   :  { %15 = vst.msk [vmem:[#allocation0] sm:$0x1] %vm14_vm1, %v13_v5  }
  0x80   :  { %v19_v7 = vpop.permute.xlu0 %18  }
  0x81   :  { %21 = vst.msk [vmem:[#allocation0] sm:$0x1] %vm20_vm2, %v19_v7  }
  0x82   :  { %27 = vst.msk [vmem:[#allocation0] sm:$0x1] %vm26_vm3, %v25_v6  }
  0x89   :  { %v32_v8 = vld [vmem:[#allocation0] sm:$0x1] }
  0x8a   :  { %35 = vst [vmem:[%s59_s1] sm:$0x1] %v32_v8 }

// kernel: tile.35
= control target key start
LH: loop header
LB: loop body
LE: loop exit
PB: predicated region body
PF: predicated region fallthrough
CT: control target
= control target key end

     0   :  { %vm48_vm0 = vcmask 1047556   ;;  %vm50_vm1 = vcmask 261120   ;;  %s131_s24 = smov 96   ;;  %s132_s29 = smov 32   ;;  %vm65_vm2 = vcmask 1048320   ;;  %vm82_vm3 = vcmask 785920   ;;  %s200_s0 = inlined_call_operand.vmem [shape: f32[9,4,32], index: 0, kind: input, shape index: {}]   ;;  %s201_s1 = inlined_call_operand.vmem [shape: f32[9,128], index: 1, kind: output, shape index: {}]  }
   0x1   :  { %v115_v0 = vld [vmem:[%s200_s0 + $0x20] sm:$0xf]  ;;  %v116_v1 = vld [vmem:[%s200_s0 + $0x1c] sm:$0xf]  ;;  %v117_v2 = vld [vmem:[%s200_s0 + $0x18] sm:$0xf] }
   0x2   :  { %9 = vst [vmem:[#allocation0 + $0x40] sm:$0xf] %v115_v0  ;;  %14 = vst [vmem:[#allocation0 + $0x38] sm:$0xf] %v116_v1  ;;  %v118_v3 = vld [vmem:[%s200_s0 + $0x14] sm:$0xf] }
   0x3   :  { %v119_v4 = vld [vmem:[%s200_s0 + $0x10] sm:$0xf]  ;;  %19 = vst [vmem:[#allocation0 + $0x30] sm:$0xf] %v117_v2  ;;  %24 = vst [vmem:[#allocation0 + $0x28] sm:$0xf] %v118_v3 }
   0x4   :  { %29 = vst [vmem:[#allocation0 + $0x20] sm:$0xf] %v119_v4  ;;  %v120_v5 = vld [vmem:[%s200_s0 + $0xc] sm:$0xf]  ;;  %v121_v6 = vld [vmem:[%s200_s0 + $0x8] sm:$0xf] }
   0x5   :  { %v122_v7 = vld [vmem:[%s200_s0 + $0x4] sm:$0xf]  ;;  %34 = vst [vmem:[#allocation0 + $0x18] sm:$0xf] %v120_v5  ;;  %39 = vst [vmem:[#allocation0 + $0x10] sm:$0xf] %v121_v6 }
   0x6   :  { %43 = vst [vmem:[#allocation0 + $0x8] sm:$0xf] %v122_v7  ;;  %v44_v8 = vld [vmem:[%s200_s0] sm:$0xf]  ;;  %s130_s0 = smov 64   ;;  %vm99_vm4 = vcmask 523520  }
   0x7   :  { %45 = vst [vmem:[#allocation0] sm:$0xf] %v44_v8 }
   0x9   :  { %v85_v9 = vld [vmem:[#allocation0 + $0x42] sm:$0x1]   ;;  %v68_v10 = vld [vmem:[#allocation0 + $0x43] sm:$0x1]   ;;  %v53_v14 = vld [vmem:[#allocation0 + $0x40] sm:$0x1]  }
   0xa   :  { %86 = vrot.lane.b32.xlu1 %v85_v9, %s130_s0  ;;  %69 = vrot.lane.b32.xlu0 %v68_v10, %s131_s24  ;;  %123 = vst.msk [vmem:[%s201_s1 + $0x8] sm:$0x1] %vm50_vm1, %v53_v14   ;;  %v102_v22 = vld [vmem:[#allocation0 + $0x41] sm:$0x1]  }
   0xb   :  { %v77_v11 = vld [vmem:[#allocation0 + $0x2] ss:$8 sm:$0xf0]   ;;  %v60_v12 = vld [vmem:[#allocation0 + $0x3] ss:$8 sm:$0xf0]  }
   0xc   :  { %v94_v13 = vld [vmem:[#allocation0 + $0x1] ss:$8 sm:$0xf0]   ;;  %v47_v21 = vld [vmem:[#allocation0] ss:$8 sm:$0xf0]  }
   0xe   :  { %v75_v15 = vld [vmem:[#allocation0 + $0x2] ss:$8 sm:$0xf]   ;;  %v58_v16 = vld [vmem:[#allocation0 + $0x3] ss:$8 sm:$0xf]  }
   0xf   :  { %v79_v17 = vsel %vm48_vm0, %v77_v11, %v75_v15  ;;  %v62_v18 = vsel %vm48_vm0, %v60_v12, %v58_v16  ;;  %v92_v19 = vld [vmem:[#allocation0 + $0x1] ss:$8 sm:$0xf]   ;;  %v46_v20 = vld [vmem:[#allocation0] ss:$8 sm:$0xf]  }
  0x10   :  { %80 = vrot.lane.b32.xlu1 %v79_v17, %s130_s0  ;;  %63 = vrot.lane.b32.xlu0 %v62_v18, %s131_s24  ;;  %v96_v23 = vsel %vm48_vm0, %v94_v13, %v92_v19  ;;  %v49_v24 = vsel %vm48_vm0, %v47_v21, %v46_v20 }
  0x11   :  { %51 = vst.msk [vmem:[%s201_s1] sm:$0xff] %vm50_vm1, %v49_v24  }
  0x14   :  { %103 = vrot.lane.b32.xlu1 %v102_v22, %s132_s29  ;;  %97 = vrot.lane.b32.xlu0 %v96_v23, %s132_s29 }
  0x7c   :  { %v87_v25 = vpop.permute.xlu1 %86   ;;  %v70_v26 = vpop.permute.xlu0 %69  }
  0x7d   :  { %124 = vst.msk [vmem:[%s201_s1 + $0x8] sm:$0x1] %vm65_vm2, %v70_v26  }
  0x7e   :  { %125 = vst.msk [vmem:[%s201_s1 + $0x8] sm:$0x1] %vm82_vm3, %v87_v25  }
  0x82   :  { %v81_v27 = vpop.permute.xlu1 %80   ;;  %v64_v28 = vpop.permute.xlu0 %63  }
  0x83   :  { %66 = vst.msk [vmem:[%s201_s1] sm:$0xff] %vm65_vm2, %v64_v28  }
  0x84   :  { %83 = vst.msk [vmem:[%s201_s1] sm:$0xff] %vm82_vm3, %v81_v27  }
  0x86   :  { %v104_v29 = vpop.permute.xlu1 %103   ;;  %v98_v30 = vpop.permute.xlu0 %97  }
  0x87   :  { %126 = vst.msk [vmem:[%s201_s1 + $0x8] sm:$0x1] %vm99_vm4, %v104_v29   ;;  %100 = vst.msk [vmem:[%s201_s1] sm:$0xff] %vm99_vm4, %v98_v30  }

// kernel: _lambda_.3
= control target key start
LH: loop header
LB: loop body
LE: loop exit
PB: predicated region body
PF: predicated region fallthrough
CT: control target
= control target key end

     0   :  { %vm148_vm0 = vcmask 1041408   ;;  %vm117_vm1 = vcmask 293888   ;;  %s2054_s26 = smov 32   ;;  %s2055_s27 = smov 64   ;;  %vm423_vm2 = vcmask 1046528   ;;  %vm593_vm3 = vcmask 261120   ;;  %s2743_s1 = inlined_call_operand.vmem [shape: bf16[36,128], index: 1, kind: input, shape index: {}]   ;;  %s2744_s0 = inlined_call_operand.vmem [shape: bf16[160,36], index: 0, kind: input, shape index: {}]   ;;  %s2745_s5 = inlined_call_operand.vmem [shape: bf16[128,64], index: 5, kind: input, shape index: {}]   ;;  %s2746_s2 = inlined_call_operand.vmem [shape: f32[9,128], index: 2, kind: input, shape index: {}]   ;;  %s2747_s3 = inlined_call_operand.vmem [shape: f32[1,128], index: 3, kind: input, shape index: {}]   ;;  %s2748_s4 = inlined_call_operand.vmem [shape: f32[1,128], index: 4, kind: input, shape index: {}]   ;;  %s2749_s6 = inlined_call_operand.vmem [shape: f32[1,64], index: 6, kind: input, shape index: {}]   ;;  %s2750_s7 = inlined_call_operand.vmem [shape: f32[2,18,64], index: 7, kind: output, shape index: {}]  }
   0x1   :  { %v2024_v0 = vld [vmem:[%s2743_s1 + $0x10] ss:$0 sps:$4 sm:$0x33]   ;;  %v2025_v1 = vld [vmem:[%s2743_s1 + $0x8] sm:$0xff]   ;;  %v2026_v3 = vld [vmem:[%s2743_s1] sm:$0xff]   ;;  %vm453_vm4 = vcmask 1043456  }
   0x2   :  { %1784 = vmatprep.subr.msk.bf16.mxu0 %vm148_vm0, %v2024_v0  ;;  %1785 = vmatprep.subr.msk.bf16.mxu1 %vm148_vm0, %v2024_v0  ;;  %v150_v2 = vsel %vm148_vm0, %v2024_v0, 0  ;;  %v2027_v4 = vld [vmem:[%s2744_s0] sm:$0xff]   ;;  %v2029_v6 = vld [vmem:[%s2744_s0 + $0x8] sm:$0xff]   ;;  %v2031_v8 = vld [vmem:[%s2744_s0 + $0x10] sm:$0xff]   ;;  %vm438_vm5 = vcmask 785408   ;;  %vm690_vm6 = vcmask 1045504  }
   0x3   :  { %1713 = vmatpush3.bf16.msra.mxu0 %v150_v2  ;;  %1781 = vmatpush3.bf16.msra.mxu1 %v150_v2  ;;  %v2028_v5 = vld [vmem:[%s2744_s0 + $0x40] sm:$0xff]   ;;  %v2030_v7 = vld [vmem:[%s2744_s0 + $0x48] sm:$0xff]   ;;  %v2032_v9 = vld [vmem:[%s2744_s0 + $0x18] sm:$0xff]   ;;  %vm543_vm7 = vcmask 523264   ;;  %vm944_vm8 = vcmask 517120  }
   0x4   :  { %1714 = vmatprep.subr.bf16.mxu0 %v2025_v1  ;;  %1779 = vmatprep.subr.bf16.mxu1 %v2025_v1  ;;  %v2033_v10 = vld [vmem:[%s2744_s0 + $0x20] sm:$0xff]   ;;  %v2034_v11 = vld [vmem:[%s2744_s0 + $0x28] sm:$0xff]   ;;  %v2035_v12 = vld [vmem:[%s2744_s0 + $0x30] sm:$0xff]  }
   0x5   :  { %1718 = vmatprep.mubr.msk.bf16.mxu0 %vm117_vm1, %v2027_v4  ;;  %1734 = vmatprep.mubr.msk.bf16.mxu1 %vm117_vm1, %v2028_v5  ;;  %v2036_v13 = vld [vmem:[%s2744_s0 + $0x38] sm:$0xff]   ;;  %s2053_s0 = smov 96  }
   0x7   :  { %1715 = vmatpush3.bf16.msra.mxu0 %v2025_v1  ;;  %1782 = vmatpush3.bf16.msra.mxu1 %v2025_v1 }
   0x8   :  { %1716 = vmatprep.subr.bf16.mxu0 %v2026_v3  ;;  %1780 = vmatprep.subr.bf16.mxu1 %v2026_v3 }
   0xb   :  { %1717 = vmatpush3.bf16.msra.mxu0 %v2026_v3  ;;  %1783 = vmatpush3.bf16.msra.mxu1 %v2026_v3 }
   0xe   :  { %1719 = vmatmul.mubr.msk.bf16.vlgmr.msra.gmra.mxu0 %vm117_vm1, %v2029_v6  ;;  %1735 = vmatmul.mubr.msk.bf16.vlgmr.msra.gmra.mxu1 %vm117_vm1, %v2030_v7 }
   0xf   :  { %1722 = vmatprep.mubr.msk.bf16.mxu0 %vm117_vm1, %v2031_v8 }
  0x16   :  { %1723 = vmatmul.mubr.msk.bf16.gmra.mxu0 %vm117_vm1, %v2032_v9 }
  0x17   :  { %1726 = vmatprep.mubr.msk.bf16.mxu0 %vm117_vm1, %v2033_v10 }
  0x1e   :  { %1727 = vmatmul.mubr.msk.bf16.gmra.mxu0 %vm117_vm1, %v2034_v11 }
  0x1f   :  { %1730 = vmatprep.mubr.msk.bf16.mxu0 %vm117_vm1, %v2035_v12 }
  0x26   :  { %1731 = vmatmul.mubr.msk.bf16.gmra.mxu0 %vm117_vm1, %v2036_v13 }
  0xce   :  { %v1720_v14 = vpop.f32.mrf.mxu0  ;;  %v1736_v15 = vpop.f32.mrf.mxu1 }
  0xcf   :  { %v267_v20 = vmax.f32 %v1720_v14, 0.0  ;;  %v283_v21 = vmax.f32 %v1736_v15, 0.0 }
  0xd0   :  { %v186_v16 = vpop.f32.mrf.mxu0  ;;  %v250_v17 = vpop.f32.mrf.mxu1 }
  0xd1   :  { %v265_v24 = vmax.f32 %v186_v16, 0.0  ;;  %v281_v25 = vmax.f32 %v250_v17, 0.0 }
  0xd2   :  { %v1721_v18 = vpop.f32.mrf.mxu0  ;;  %v1737_v19 = vpop.f32.mrf.mxu1 }
  0xd3   :  { %v268_v22 = vmax.f32 %v1721_v18, 0.0  ;;  %v284_v23 = vmax.f32 %v1737_v19, 0.0 }
  0xd4   :  { %v189_v26 = vpop.f32.mrf.mxu0  ;;  %v253_v27 = vpop.f32.mrf.mxu1 }
  0xd5   :  { %v1619_v28 = vpack.c.bf16 %v268_v22, %v267_v20  ;;  %v1659_v29 = vpack.c.bf16 %v284_v23, %v283_v21  ;;  %v266_v30 = vmax.f32 %v189_v26, 0.0  ;;  %v282_v31 = vmax.f32 %v253_v27, 0.0 }
  0xd6   :  { %v1724_v32 = vpop.f32.mrf.mxu0 }
  0xd7   :  { %1669 = vst [vmem:[#allocation2 + $0x8] sm:$0xff] %v1619_v28   ;;  %1677 = vst [vmem:[#allocation2 + $0x48] sm:$0xff] %v1659_v29   ;;  %v1614_v33 = vpack.c.bf16 %v266_v30, %v265_v24  ;;  %v1654_v34 = vpack.c.bf16 %v282_v31, %v281_v25  ;;  %v271_v36 = vmax.f32 %v1724_v32, 0.0 }
  0xd8   :  { %v202_v35 = vpop.f32.mrf.mxu0 }
  0xd9   :  { %1615 = vst [vmem:[#allocation2] sm:$0xff] %v1614_v33   ;;  %1676 = vst [vmem:[#allocation2 + $0x40] sm:$0xff] %v1654_v34   ;;  %v269_v38 = vmax.f32 %v202_v35, 0.0  ;;  %v2162_v4 = vunpack.c.h.bf16 %v1614_v33  ;;  %v2164_v5 = vunpack.c.l.bf16 %v1614_v33 }
  0xda   :  { %v1725_v37 = vpop.f32.mrf.mxu0 }
  0xdb   :  { %v272_v39 = vmax.f32 %v1725_v37, 0.0  ;;  %v1799_v20 = vpack.i.bf16 %v2162_v4, %v2164_v5 }
  0xdc   :  { %v205_v40 = vpop.f32.mrf.mxu0 }
  0xdd   :  { %v1629_v41 = vpack.c.bf16 %v272_v39, %v271_v36  ;;  %v270_v42 = vmax.f32 %v205_v40, 0.0  ;;  %v480_v40 = vrot.slane %v2164_v5, 1 }
  0xde   :  { %v1728_v43 = vpop.f32.mrf.mxu0  ;;  %v2148_v44 = vld [vmem:[#allocation2 + $0x8] sm:$0xc]  ;;  %v403_v45 = vld [vmem:[#allocation2 + $0xc] sm:$0xf]  ;;  %v465_v61 = vld [vmem:[#allocation2 + $0x8] sm:$0x3] }
  0xdf   :  { %v1116_v46 = vld [vmem:[#allocation2 + $0x48] sm:$0xff]   ;;  %1671 = vst [vmem:[#allocation2 + $0x18] sm:$0xff] %v1629_v41   ;;  %v1624_v47 = vpack.c.bf16 %v270_v42, %v269_v38  ;;  %v405_v48 = vunpack.c.l.bf16 %v2148_v44  ;;  %v2151_v49 = vunpack.c.l.bf16 %v403_v45  ;;  %v275_v56 = vmax.f32 %v1728_v43, 0.0 }
  0xe0   :  { %v2153_v50 = vld [vmem:[#allocation2 + $0x8] sm:$0x8]  ;;  %v218_v51 = vpop.f32.mrf.mxu0  ;;  %v1115_v52 = vld [vmem:[#allocation2 + $0x44] sm:$0xc]  ;;  %v1119_v53 = vunpack.c.l.bf16 %v1116_v46  ;;  %v651_v54 = vld [vmem:[#allocation2] sm:$0xe]  ;;  %v1122_v55 = vunpack.c.h.bf16 %v1116_v46  ;;  %v2172_v11 = vunpack.c.l.bf16 %v465_v61 }
  0xe1   :  { %1670 = vst [vmem:[#allocation2 + $0x10] sm:$0xff] %v1624_v47   ;;  %v1789_v57 = vpack.i.bf16 %v2151_v49, %v405_v48  ;;  %v1118_v58 = vunpack.c.l.bf16 %v1115_v52  ;;  %v703_v59 = vunpack.c.l.bf16 %v2153_v50  ;;  %v273_v62 = vmax.f32 %v218_v51, 0.0  ;;  %v1072_v7 = vld [vmem:[#allocation2 + $0x44] sm:$0x3]  ;;  %v2178_v15 = vld [vmem:[#allocation2 + $0x8] sm:$0x1] }
  0xe2   :  { %v1729_v60 = vpop.f32.mrf.mxu0  ;;  %v2160_v1 = vunpack.c.l.bf16 %v651_v54  ;;  %v1137_v3 = vrot.slane %v1119_v53, 1  ;;  %v1139_v6 = vrot.slane %v1122_v55, 1  ;;  %v1073_v16 = vunpack.c.l.bf16 %v1072_v7  ;;  %v1068_v24 = vld [vmem:[#allocation2 + $0x44] sm:$0x1]  ;;  %v653_v36 = vld [vmem:[#allocation2 + $0x8] sm:$0x7] }
  0xe3   :  { %v276_v63 = vmax.f32 %v1729_v60, 0.0  ;;  %1790 = vrot.lane.b32.xlu0 %v1789_v57, %s2053_s0  ;;  %v1809_v0 = vpack.i.bf16 %v1119_v53, %v1118_v58  ;;  %v1794_v10 = vpack.i.bf16 %v2151_v49, %v703_v59  ;;  %v483_v21 = vrot.slane %v2172_v11, 1  ;;  %v1117_v38 = vld [vmem:[#allocation2 + $0x4c] sm:$0x7] }
  0xe4   :  { %v221_v2 = vpop.f32.mrf.mxu0  ;;  %v1819_v14 = vpack.i.bf16 %v2162_v4, %v2160_v1  ;;  %v1140_v18 = vsel %vm423_vm2, %v1137_v3, %v1139_v6  ;;  %v390_v23 = vunpack.c.l.bf16 %v2178_v15  ;;  %v2187_v28 = vrot.slane %v1073_v16, 1 }
  0xe5   :  { %v2166_v8 = vpack.c.bf16 %v276_v63, %v275_v56  ;;  %v274_v9 = vmax.f32 %v221_v2, 0.0  ;;  %1810 = vrot.lane.b32.xlu1 %v1809_v0, %s2054_s26  ;;  %v1824_v27 = vpack.i.bf16 %v1139_v6, %v1140_v18  ;;  %v1071_v32 = vunpack.c.l.bf16 %v1068_v24 }
  0xe6   :  { %v1732_v12 = vpop.f32.mrf.mxu0  ;;  %v1804_v31 = vpack.i.bf16 %v483_v21, %v390_v23  ;;  %v1136_v34 = vrot.slane %v1118_v58, 1  ;;  %v1814_v39 = vpack.i.bf16 %v2172_v11, %v2160_v1  ;;  %v481_v42 = vrot.slane %v2162_v4, 1  ;;  %v514_v61 = vld [vmem:[#allocation2 + $0x1c] sm:$0x3] }
  0xe7   :  { %1673 = vst [vmem:[#allocation2 + $0x28] sm:$0xff] %v2166_v8   ;;  %v1634_v13 = vpack.c.bf16 %v274_v9, %v273_v62  ;;  %1795 = vrot.lane.b32.xlu0 %v1794_v10, %s2055_s27  ;;  %v279_v19 = vmax.f32 %v1732_v12, 0.0  ;;  %v1829_v35 = vpack.i.bf16 %v2187_v28, %v1071_v32  ;;  %v663_v43 = vrot.slane %v2160_v1, 1 }
  0xe8   :  { %v234_v17 = vpop.f32.mrf.mxu0  ;;  %v1138_v41 = vsel %vm423_vm2, %v1136_v34, %v1137_v3  ;;  %v654_v45 = vunpack.c.l.bf16 %v653_v36  ;;  %v1120_v46 = vunpack.c.l.bf16 %v1117_v38  ;;  %v484_v47 = vsel %vm423_vm2, %v481_v42, %v483_v21  ;;  %v404_v55 = vld [vmem:[#allocation2 + $0x10] sm:$0x7]  ;;  %v508_v60 = vld [vmem:[#allocation2 + $0x14] sm:$0xff]   ;;  %v510_v3 = vld [vmem:[#allocation2 + $0x1c] sm:$0x1] }
  0xe9   :  { %1672 = vst [vmem:[#allocation2 + $0x20] sm:$0xff] %v1634_v13   ;;  %1820 = vrot.lane.b32.xlu1 %v1819_v14, %s2055_s27  ;;  %v277_v25 = vmax.f32 %v234_v17, 0.0  ;;  %v482_v52 = vsel %vm423_vm2, %v480_v40, %v481_v42  ;;  %v664_v53 = vsel %vm423_vm2, %v663_v43, %v481_v42  ;;  %v424_v57 = vrot.slane %v405_v48, 1  ;;  %v408_v7 = vld [vmem:[#allocation2 + $0x10] sm:$0xf] }
  0xea   :  { %v1733_v22 = vpop.f32.mrf.mxu0  ;;  %v1844_v51 = vpack.i.bf16 %v1138_v41, %v1120_v46  ;;  %v2206_v54 = vrot.slane %v654_v45, 1  ;;  %v1839_v56 = vpack.i.bf16 %v484_v47, %v482_v52  ;;  %v425_v58 = vrot.slane %v2151_v49, 1  ;;  %v704_v12 = vld [vmem:[#allocation2 + $0x14] sm:$0x1] }
  0xeb   :  { %v280_v26 = vmax.f32 %v1733_v22, 0.0  ;;  %1800 = vrot.lane.b32.xlu0 %v1799_v20, %s2053_s0  ;;  %v1854_v62 = vpack.i.bf16 %v664_v53, %v2172_v11  ;;  %v407_v63 = vunpack.c.l.bf16 %v404_v55  ;;  %v511_v2 = vunpack.c.l.bf16 %v508_v60 }
  0xec   :  { %v237_v29 = vpop.f32.mrf.mxu0  ;;  %v2216_v0 = vsel %vm423_vm2, %v481_v42, %v2206_v54  ;;  %v512_v44 = vunpack.c.h.bf16 %v508_v60  ;;  %v515_v48 = vunpack.c.l.bf16 %v514_v61  ;;  %v426_v49 = vsel %vm423_vm2, %v424_v57, %v425_v58 }
  0xed   :  { %v1649_v30 = vpack.c.bf16 %v280_v26, %v279_v19  ;;  %1825 = vrot.lane.b32.xlu1 %v1824_v27, %s2054_s26  ;;  %v278_v33 = vmax.f32 %v237_v29, 0.0  ;;  %v1849_v1 = vpack.i.bf16 %v2216_v0, %v664_v53  ;;  %v1859_v6 = vpack.i.bf16 %v426_v49, %v407_v63 }
  0xee   :  { %v1874_v9 = vpack.i.bf16 %v512_v44, %v511_v2  ;;  %v513_v10 = vunpack.c.l.bf16 %v510_v3  ;;  %v532_v11 = vrot.slane %v515_v48, 1  ;;  %v409_v13 = vunpack.c.l.bf16 %v408_v7  ;;  %v1207_v38 = vld [vmem:[#allocation2 + $0x28] sm:$0xe] }
  0xef   :  { %1675 = vst [vmem:[#allocation2 + $0x38] sm:$0xff] %v1649_v30   ;;  %1805 = vrot.lane.b32.xlu0 %v1804_v31, %s2053_s0  ;;  %v1644_v37 = vpack.c.bf16 %v278_v33, %v277_v25  ;;  %v717_v14 = vrot.slane %v703_v59, 1  ;;  %v529_v16 = vrot.slane %v511_v2, 1  ;;  %v530_v17 = vrot.slane %v512_v44, 1  ;;  %v558_v30 = vld [vmem:[#allocation2 + $0x1c] sm:$0xc] }
  0xf0   :  { %v705_v18 = vunpack.c.l.bf16 %v704_v12  ;;  %v1879_v19 = vpack.i.bf16 %v532_v11, %v513_v10  ;;  %v427_v20 = vrot.slane %v409_v13, 1  ;;  %v559_v31 = vld [vmem:[#allocation2 + $0x20] sm:$0xff]   ;;  %v2238_v34 = vunpack.c.l.bf16 %v2166_v8 }
  0xf1   :  { %1830 = vrot.lane.b32.xlu1 %v1829_v35, %s2055_s27  ;;  %1674 = vst [vmem:[#allocation2 + $0x30] sm:$0xff] %v1644_v37   ;;  %v718_v21 = vsel %vm423_vm2, %v717_v14, %v425_v58  ;;  %v531_v22 = vsel %vm423_vm2, %v529_v16, %v530_v17  ;;  %v533_v24 = vsel %vm423_vm2, %v530_v17, %v532_v11  ;;  %v565_v32 = vunpack.c.h.bf16 %v559_v31  ;;  %v560_v45 = vld [vmem:[#allocation2 + $0x24] sm:$0x7]  ;;  %v2037_v14 = vld [vmem:[%s2745_s5 + $0x38] sm:$0xff]  }
  0xf2   :  { %v719_v25 = vrot.slane %v705_v18, 1  ;;  %v1884_v50 = vpack.i.bf16 %v718_v21, %v409_v13  ;;  %v428_v59 = vsel %vm423_vm2, %v425_v58, %v427_v20  ;;  %v1899_v26 = vpack.i.bf16 %v533_v24, %v531_v22  ;;  %1738 = vmatprep.subr.bf16.mxu1 %v2037_v14  ;;  %v2038_v22 = vld [vmem:[%s2745_s5 + $0x30] sm:$0xff]  }
  0xf3   :  { %1815 = vrot.lane.b32.xlu0 %v1814_v39, %s2053_s0  ;;  %v1889_v29 = vpack.i.bf16 %v427_v20, %v428_v59  ;;  %v561_v36 = vunpack.c.l.bf16 %v558_v30  ;;  %v562_v37 = vunpack.c.l.bf16 %v559_v31  ;;  %v582_v39 = vrot.slane %v565_v32, 1  ;;  %1739 = vmatpush3.bf16.msra.mxu1 %v2037_v14 }
  0xf4   :  { %v720_v27 = vsel %vm423_vm2, %v427_v20, %v719_v25  ;;  %v2247_v41 = vunpack.c.l.bf16 %v1207_v38  ;;  %v563_v52 = vunpack.c.l.bf16 %v560_v45  ;;  %v1038_v13 = vrot.slane %v2238_v34, 1  ;;  %1740 = vmatprep.subr.bf16.mxu1 %v2038_v22 }
  0xf5   :  { %1835 = vrot.lane.b32.xlu1 %v1829_v35, %s2054_s26  ;;  %v1904_v33 = vpack.i.bf16 %v720_v27, %v428_v59  ;;  %v2241_v35 = vunpack.c.h.bf16 %v2166_v8  ;;  %v579_v42 = vrot.slane %v561_v36, 1  ;;  %v580_v43 = vrot.slane %v562_v37, 1 }
  0xf6   :  { %v1919_v8 = vpack.i.bf16 %v562_v37, %v561_v36  ;;  %v1066_v47 = vld [vmem:[#allocation2 + $0x3c] sm:$0xff]   ;;  %v965_v59 = vld [vmem:[#allocation2 + $0x38] sm:$0x7] }
  0xf7   :  { %1845 = vrot.lane.b32.xlu0 %v1844_v51, %s2054_s26  ;;  %v1909_v40 = vpack.i.bf16 %v2241_v35, %v2238_v34  ;;  %v583_v46 = vsel %vm423_vm2, %v580_v43, %v582_v39  ;;  %v1914_v51 = vpack.i.bf16 %v2247_v41, %v2206_v54  ;;  %v581_v55 = vsel %vm423_vm2, %v579_v42, %v580_v43  ;;  %v1259_v37 = vld [vmem:[#allocation2 + $0x3c] sm:$0x1]  ;;  %v2039_v42 = vld [vmem:[%s2745_s5 + $0x28] sm:$0xff]  }
  0xf8   :  { %v963_v53 = vld [vmem:[#allocation2 + $0x30] sm:$0xc]  ;;  %v1023_v57 = vld [vmem:[#allocation2 + $0x30] sm:$0x3]  ;;  %v1929_v58 = vpack.i.bf16 %v582_v39, %v583_v46  ;;  %v1069_v60 = vunpack.c.l.bf16 %v1066_v47  ;;  %v1070_v61 = vunpack.c.h.bf16 %v1066_v47  ;;  %v1924_v63 = vpack.i.bf16 %v581_v55, %v563_v52  ;;  %1741 = vmatpush3.bf16.msra.mxu1 %v2038_v22  ;;  %v2040_v47 = vld [vmem:[%s2745_s5 + $0x38] sm:$0xff]  }
  0xf9   :  { %1840 = vrot.lane.b32.xlu1 %v1839_v56, %s2053_s0  ;;  %v2255_v56 = vld [vmem:[#allocation2 + $0x34] sm:$0xff]   ;;  %v1024_v2 = vunpack.c.l.bf16 %v1023_v57  ;;  %v2262_v48 = vrot.slane %v2241_v35, 1  ;;  %v1257_v3 = vld [vmem:[#allocation2 + $0x30] sm:$0x8]  ;;  %v968_v31 = vunpack.c.l.bf16 %v965_v59  ;;  %v1260_v45 = vunpack.c.l.bf16 %v1259_v37  ;;  %1742 = vmatprep.subr.bf16.mxu1 %v2039_v42 }
  0xfa   :  { %v1939_v44 = vpack.i.bf16 %v1070_v61, %v1069_v60  ;;  %v1087_v7 = vrot.slane %v1069_v60, 1  ;;  %v970_v11 = vunpack.c.h.bf16 %v2255_v56  ;;  %v1258_v17 = vunpack.c.l.bf16 %v1257_v3  ;;  %v2042_v52 = vld [vmem:[%s2745_s5 + $0x30] sm:$0xff]   ;;  %1758 = vmatprep.subr.bf16.mxu0 %v2040_v47  ;;  %v2051_v3 = vld [vmem:[%s2745_s5 + $0x8] sm:$0xff]  }
  0xfb   :  { %1855 = vrot.lane.b32.xlu0 %v1854_v62, %s2055_s27  ;;  %v966_v62 = vunpack.c.l.bf16 %v963_v53  ;;  %v1041_v10 = vrot.slane %v1024_v2, 1  ;;  %v1040_v38 = vsel %vm423_vm2, %v1038_v13, %v2262_v48  ;;  %v1994_v53 = vpack.i.bf16 %v2241_v35, %v2247_v41  ;;  %1759 = vmatpush3.bf16.msra.mxu0 %v2040_v47 }
  0xfc   :  { %v987_v21 = vrot.slane %v970_v11, 1  ;;  %v1272_v46 = vrot.slane %v1258_v17, 1  ;;  %1743 = vmatpush3.bf16.msra.mxu1 %v2039_v42  ;;  %v1274_v57 = vrot.slane %v1260_v45, 1  ;;  %1760 = vmatprep.subr.bf16.mxu0 %v2042_v52 }
  0xfd   :  { %1850 = vrot.lane.b32.xlu1 %v1849_v1, %s2053_s0  ;;  %v967_v1 = vunpack.c.l.bf16 %v2255_v56  ;;  %v984_v49 = vrot.slane %v966_v62, 1  ;;  %v1042_v39 = vsel %vm423_vm2, %v2262_v48, %v1041_v10  ;;  %v2047_v56 = vld [vmem:[%s2745_s5 + $0x8] sm:$0xff]  }
  0xff   :  { %1860 = vrot.lane.b32.xlu0 %v1859_v6, %s2053_s0  ;;  %v1219_v6 = vrot.slane %v2247_v41, 1  ;;  %v985_v12 = vrot.slane %v967_v1, 1  ;;  %v1944_v16 = vpack.i.bf16 %v967_v1, %v966_v62  ;;  %v1954_v20 = vpack.i.bf16 %v967_v1, %v1258_v17  ;;  %v2043_v41 = vld [vmem:[%s2745_s5 + $0x18] sm:$0xff]   ;;  %1761 = vmatpush3.bf16.msra.mxu0 %v2042_v52  ;;  %v2045_v1 = vld [vmem:[%s2745_s5 + $0x10] sm:$0xff]  }
 0x101   :  { %1875 = vrot.lane.b32.xlu1 %v1874_v9, %s2054_s26  ;;  %v1220_v18 = vsel %vm423_vm2, %v1219_v6, %v2262_v48  ;;  %v988_v30 = vsel %vm423_vm2, %v985_v12, %v987_v21  ;;  %v986_v32 = vsel %vm423_vm2, %v984_v49, %v985_v12  ;;  %v1273_v60 = vsel %vm423_vm2, %v1272_v46, %v985_v12  ;;  %v2050_v49 = vld [vmem:[%s2745_s5 + $0x10] sm:$0xff]   ;;  %v2052_v6 = vld [vmem:[%s2745_s5] sm:$0xff]  }
 0x102   :  { %v1979_v36 = vpack.i.bf16 %v987_v21, %v988_v30 }
 0x103   :  { %1865 = vrot.lane.b32.xlu0 %v1874_v9, %s2055_s27  ;;  %v1088_v9 = vrot.slane %v1070_v61, 1  ;;  %v2044_v61 = vld [vmem:[%s2745_s5 + $0x28] sm:$0xff]  }
 0x104   :  { %1762 = vmatprep.subr.bf16.mxu0 %v2044_v61 }
 0x105   :  { %1880 = vrot.lane.b32.xlu1 %v1879_v19, %s2054_s26  ;;  %v1089_v24 = vsel %vm423_vm2, %v1087_v7, %v1088_v9  ;;  %v1091_v25 = vsel %vm423_vm2, %v1088_v9, %v2187_v28  ;;  %1763 = vmatpush3.bf16.msra.mxu0 %v2044_v61 }
 0x107   :  { %1870 = vrot.lane.b32.xlu0 %v1879_v19, %s2055_s27  ;;  %v2274_v19 = vld [vmem:[#allocation2 + $0x30] sm:$0x1] }
 0x108   :  { %v951_v27 = vunpack.c.l.bf16 %v2274_v19 }
 0x109   :  { %1885 = vrot.lane.b32.xlu1 %v1884_v50, %s2055_s27  ;;  %v2286_v50 = vpack.i.bf16 %v1220_v18, %v1024_v2  ;;  %v2046_v2 = vld [vmem:[%s2745_s5 + $0x20] sm:$0xff]  }
 0x10a   :  { %v1969_v28 = vpack.i.bf16 %v1041_v10, %v951_v27  ;;  %1764 = vmatprep.subr.bf16.mxu0 %v2046_v2 }
 0x10b   :  { %1900 = vrot.lane.b32.xlu0 %v1899_v26, %s2054_s26  ;;  %1765 = vmatpush3.bf16.msra.mxu0 %v2046_v2 }
 0x10d   :  { %1890 = vrot.lane.b32.xlu1 %v1889_v29, %s2053_s0  ;;  %v1209_v29 = vld [vmem:[#allocation2 + $0x30] sm:$0x7] }
 0x10f   :  { %1905 = vrot.lane.b32.xlu0 %v1904_v33, %s2055_s27  ;;  %v1210_v33 = vunpack.c.l.bf16 %v1209_v29 }
 0x111   :  { %1895 = vrot.lane.b32.xlu1 %v1899_v26, %s2055_s27  ;;  %v1964_v26 = vpack.i.bf16 %v1091_v25, %v1089_v24  ;;  %v1221_v43 = vrot.slane %v1210_v33, 1  ;;  %v2385_v24 = vld [vmem:[%s2746_s2 + $0x4] ss:$0 sm:$0xff] }
 0x113   :  { %1910 = vrot.lane.b32.xlu0 %v1909_v40, %s2053_s0  ;;  %v1974_v40 = vpack.i.bf16 %v986_v32, %v968_v31  ;;  %v1222_v55 = vsel %vm423_vm2, %v2262_v48, %v1221_v43  ;;  %v2049_v48 = vld [vmem:[%s2745_s5] sm:$0xff]  }
 0x114   :  { %v1999_v62 = vpack.i.bf16 %v1221_v43, %v1222_v55 }
 0x115   :  { %1920 = vrot.lane.b32.xlu1 %v1919_v8, %s2054_s26  ;;  %v1984_v8 = vpack.i.bf16 %v1042_v39, %v1040_v38 }
 0x117   :  { %1915 = vrot.lane.b32.xlu0 %v1914_v51, %s2053_s0  ;;  %v2041_v51 = vld [vmem:[%s2745_s5 + $0x20] sm:$0xff]  }
 0x118   :  { %1744 = vmatprep.subr.bf16.mxu1 %v2041_v51 }
 0x119   :  { %1930 = vrot.lane.b32.xlu1 %v1929_v58, %s2054_s26  ;;  %v1989_v58 = vpack.i.bf16 %v2206_v54, %v2216_v0  ;;  %1745 = vmatpush3.bf16.msra.mxu1 %v2041_v51  ;;  %v2004_v54 = vpack.i.bf16 %v1273_v60, %v970_v11 }
 0x11a   :  { %1746 = vmatprep.subr.bf16.mxu1 %v2043_v41 }
 0x11b   :  { %1925 = vrot.lane.b32.xlu0 %v1924_v63, %s2054_s26  ;;  %v1275_v63 = vsel %vm423_vm2, %v987_v21, %v1274_v57 }
 0x11c   :  { %v2009_v0 = vpack.i.bf16 %v1275_v63, %v988_v30 }
 0x11d   :  { %1940 = vrot.lane.b32.xlu1 %v1939_v44, %s2054_s26  ;;  %1747 = vmatpush3.bf16.msra.mxu1 %v2043_v41 }
 0x11e   :  { %1748 = vmatprep.subr.bf16.mxu1 %v2045_v1 }
 0x11f   :  { %1935 = vrot.lane.b32.xlu0 %v1939_v44, %s2055_s27  ;;  %v2048_v44 = vld [vmem:[%s2745_s5 + $0x18] sm:$0xff]  }
 0x120   :  { %1766 = vmatprep.subr.bf16.mxu0 %v2048_v44 }
 0x121   :  { %1945 = vrot.lane.b32.xlu1 %v1944_v16, %s2053_s0  ;;  %1749 = vmatpush3.bf16.msra.mxu1 %v2045_v1 }
 0x122   :  { %1750 = vmatprep.subr.bf16.mxu1 %v2047_v56  ;;  %1767 = vmatpush3.bf16.msra.mxu0 %v2048_v44 }
 0x123   :  { %1955 = vrot.lane.b32.xlu0 %v1954_v20, %s2055_s27  ;;  %1768 = vmatprep.subr.bf16.mxu0 %v2050_v49 }
 0x125   :  { %1950 = vrot.lane.b32.xlu1 %v2286_v50, %s2053_s0  ;;  %1751 = vmatpush3.bf16.msra.mxu1 %v2047_v56 }
 0x126   :  { %1752 = vmatprep.subr.bf16.mxu1 %v2049_v48  ;;  %1769 = vmatpush3.bf16.msra.mxu0 %v2050_v49 }
 0x127   :  { %1965 = vrot.lane.b32.xlu0 %v1964_v26, %s2054_s26  ;;  %1770 = vmatprep.subr.bf16.mxu0 %v2051_v3 }
 0x129   :  { %1960 = vrot.lane.b32.xlu1 %v1964_v26, %s2055_s27  ;;  %1753 = vmatpush3.bf16.msra.mxu1 %v2049_v48 }
 0x12a   :  { %1771 = vmatpush3.bf16.msra.mxu0 %v2051_v3 }
 0x12b   :  { %1970 = vrot.lane.b32.xlu0 %v1969_v28, %s2053_s0  ;;  %1772 = vmatprep.subr.bf16.mxu0 %v2052_v6 }
 0x12d   :  { %1980 = vrot.lane.b32.xlu1 %v1979_v36, %s2053_s0 }
 0x12e   :  { %1773 = vmatpush3.bf16.msra.mxu0 %v2052_v6 }
 0x12f   :  { %1975 = vrot.lane.b32.xlu0 %v1974_v40, %s2053_s0 }
 0x131   :  { %1985 = vrot.lane.b32.xlu1 %v1984_v8, %s2053_s0  ;;  %v2404_v8 = vld [vmem:[%s2746_s2 + $0x6] ss:$0 sm:$0xff] }
 0x133   :  { %1995 = vrot.lane.b32.xlu0 %v1994_v53, %s2055_s27 }
 0x135   :  { %1990 = vrot.lane.b32.xlu1 %v1989_v58, %s2055_s27 }
 0x137   :  { %2000 = vrot.lane.b32.xlu0 %v1999_v62, %s2053_s0 }
 0x139   :  { %2005 = vrot.lane.b32.xlu1 %v2004_v54, %s2055_s27  ;;  %v1548_v54 = vld [vmem:[%s2746_s2] ss:$0 sm:$0xff] }
 0x13a   :  { %v2436_v44 = vmul.f32 %v2162_v4, %v1548_v54  ;;  %v398_v3 = vmul.f32 %v1548_v54, %v390_v23  ;;  %v396_v6 = vmul.f32 %v2164_v5, %v1548_v54  ;;  %v2454_v4 = vmul.f32 %v1548_v54, %v951_v27 }
 0x13b   :  { %2010 = vrot.lane.b32.xlu0 %v2009_v0, %s2055_s27 }
 0x13d   :  { %2015 = vrot.lane.b32.xlu1 %v2286_v50, %s2055_s27 }
 0x13f   :  { %2020 = vrot.lane.b32.xlu0 %v1999_v62, %s2055_s27 }
 0x155   :  { %v2365_v7 = vpop.permute.xlu0 %1790 }
 0x156   :  { %v1793_v19 = vunpack.i.h.bf16 %v2365_v7 }
 0x157   :  { %v1811_v9 = vpop.permute.xlu1 %1810 }
 0x158   :  { %v1813_v14 = vunpack.i.h.bf16 %v1811_v9  ;;  %v1812_v50 = vunpack.i.l.bf16 %v1811_v9  ;;  %v2444_v9 = vmul.f32 %v2238_v34, %v1548_v54 }
 0x159   :  { %v2367_v10 = vpop.permute.xlu0 %1795 }
 0x15a   :  { %v1798_v27 = vunpack.i.h.bf16 %v2367_v10 }
 0x15b   :  { %v2369_v11 = vpop.permute.xlu1 %1820 }
 0x15d   :  { %v2371_v12 = vpop.permute.xlu0 %1800 }
 0x15e   :  { %v1803_v43 = vunpack.i.h.bf16 %v2371_v12 }
 0x15f   :  { %v1826_v13 = vpop.permute.xlu1 %1825 }
 0x160   :  { %v1827_v16 = vunpack.i.l.bf16 %v1826_v13  ;;  %v1828_v59 = vunpack.i.h.bf16 %v1826_v13  ;;  %v1792_v13 = vunpack.i.l.bf16 %v2365_v7 }
 0x161   :  { %v2373_v17 = vpop.permute.xlu0 %1805 }
 0x162   :  { %v1151_v18 = vsel %vm593_vm3, %v1813_v14, %v1827_v16  ;;  %v1808_v48 = vunpack.i.h.bf16 %v2373_v17  ;;  %v1807_v49 = vunpack.i.l.bf16 %v2373_v17  ;;  %v2450_v16 = vmul.f32 %v2241_v35, %v1548_v54  ;;  %v2463_v17 = vld [vmem:[%s2746_s2 + $0x1] ss:$0 sm:$0xff] }
 0x163   :  { %v2376_v20 = vpop.permute.xlu1 %1830  ;;  %v1159_v30 = vmul.f32 %v2385_v24, %v1151_v18 }
 0x164   :  { %v1833_v15 = vunpack.i.h.bf16 %v2376_v20  ;;  %v1832_v23 = vunpack.i.l.bf16 %v2376_v20  ;;  %v2474_v20 = vld [vmem:[%s2746_s2 + $0x2] ss:$0 sm:$0xff] }
 0x165   :  { %v2378_v21 = vpop.permute.xlu0 %1815  ;;  %v1165_v38 = vrot.slane %v1159_v30, 4 }
 0x166   :  { %v1817_v45 = vunpack.i.l.bf16 %v2378_v21 }
 0x167   :  { %v2380_v22 = vpop.permute.xlu1 %1835 }
 0x168   :  { %v1837_v30 = vunpack.i.l.bf16 %v2380_v22 }
 0x169   :  { %v1846_v25 = vpop.permute.xlu0 %1845 }
 0x16a   :  { %v1848_v26 = vunpack.i.h.bf16 %v1846_v25  ;;  %v1847_v29 = vunpack.i.l.bf16 %v1846_v25  ;;  %v1797_v25 = vunpack.i.l.bf16 %v2367_v10 }
 0x16b   :  { %v2388_v28 = vpop.permute.xlu1 %1840 }
 0x16c   :  { %v1150_v31 = vsel %vm593_vm3, %v1812_v50, %v1848_v26  ;;  %v1152_v32 = vsel %vm593_vm3, %v1847_v29, %v1828_v59  ;;  %v1843_v5 = vunpack.i.h.bf16 %v2388_v28  ;;  %v1842_v34 = vunpack.i.l.bf16 %v2388_v28 }
 0x16d   :  { %v1158_v33 = vmul.f32 %v2385_v24, %v1150_v31  ;;  %v2394_v36 = vmul.f32 %v2385_v24, %v1152_v32  ;;  %v2396_v37 = vpop.permute.xlu0 %1855  ;;  %v496_v50 = vsel %vm438_vm5, %v1807_v49, %v1808_v48  ;;  %v1822_v59 = vunpack.i.l.bf16 %v2369_v11 }
 0x16e   :  { %v1802_v26 = vunpack.i.l.bf16 %v2371_v12  ;;  %v1838_v29 = vunpack.i.h.bf16 %v2380_v22  ;;  %v1858_v22 = vunpack.i.h.bf16 %v2396_v37 }
 0x16f   :  { %v1164_v39 = vrot.slane %v1158_v33, 4  ;;  %v1167_v40 = vrot.slane %v2394_v36, 4  ;;  %v1851_v42 = vpop.permute.xlu1 %1850 }
 0x170   :  { %v1853_v46 = vunpack.i.h.bf16 %v1851_v42  ;;  %v1852_v47 = vunpack.i.l.bf16 %v1851_v42  ;;  %v495_v42 = vsel %vm438_vm5, %v1803_v43, %v1843_v5  ;;  %v2504_v5 = vsel %vm543_vm7, %v1822_v59, %v1858_v22 }
 0x171   :  { %v2407_v51 = vsel %vm453_vm4, %v1164_v39, %v1165_v38  ;;  %v2412_v52 = vsel %vm453_vm4, %v1165_v38, %v1167_v40  ;;  %v1861_v53 = vpop.permute.xlu0 %1860  ;;  %v504_v38 = vmul.f32 %v2474_v20, %v496_v50  ;;  %v2484_v39 = vsel %vm543_vm7, %v1832_v23, %v1833_v15 }
 0x172   :  { %v677_v55 = vsel %vm438_vm5, %v1803_v43, %v1853_v46  ;;  %v676_v57 = vsel %vm438_vm5, %v1817_v45, %v1852_v47  ;;  %v1863_v2 = vunpack.i.h.bf16 %v1861_v53  ;;  %v1862_v31 = vunpack.i.l.bf16 %v1861_v53 }
 0x173   :  { %v2417_v58 = vmul.f32 %v2404_v8, %v677_v55  ;;  %v684_v60 = vmul.f32 %v2404_v8, %v676_v57  ;;  %v2420_v41 = vpop.permute.xlu1 %1875  ;;  %v494_v45 = vsel %vm438_vm5, %v1802_v26, %v1842_v34  ;;  %v1818_v46 = vunpack.i.h.bf16 %v2378_v21 }
 0x174   :  { %v439_v35 = vsel %vm438_vm5, %v1792_v13, %v1863_v2  ;;  %v2495_v43 = vsel %vm593_vm3, %v1837_v30, %v1838_v29  ;;  %v503_v2 = vmul.f32 %v2474_v20, %v495_v42  ;;  %v502_v21 = vmul.f32 %v2474_v20, %v494_v45 }
 0x175   :  { %v692_v61 = vrot.slane %v2417_v58, 2  ;;  %v691_v62 = vrot.slane %v684_v60, 2  ;;  %v2423_v63 = vpop.permute.xlu0 %1865  ;;  %v447_v28 = vmul.f32 %v2463_v17, %v439_v35  ;;  %v1878_v34 = vunpack.i.h.bf16 %v2420_v41 }
 0x176   :  { %v1877_v35 = vunpack.i.l.bf16 %v2420_v41  ;;  %v2518_v41 = vld [vmem:[%s2746_s2 + $0x3] ss:$0 sm:$0xff] }
 0x177   :  { %v2431_v0 = vsel %vm690_vm6, %v691_v62, %v692_v61  ;;  %v2433_v1 = vpop.permute.xlu1 %1880  ;;  %v454_v48 = vrot.slane %v447_v28, 4  ;;  %v1867_v28 = vunpack.i.l.bf16 %v2423_v63 }
 0x178   :  { %v1883_v49 = vunpack.i.h.bf16 %v2433_v1  ;;  %v1882_v13 = vunpack.i.l.bf16 %v2433_v1 }
 0x179   :  { %v1871_v56 = vpop.permute.xlu0 %1870 }
 0x17a   :  { %v1873_v55 = vunpack.i.h.bf16 %v1871_v56  ;;  %v1872_v57 = vunpack.i.l.bf16 %v1871_v56 }
 0x17b   :  { %v2447_v14 = vpop.permute.xlu1 %1885 }
 0x17c   :  { %v546_v50 = vsel %vm543_vm7, %v1872_v57, %v1873_v55 }
 0x17d   :  { %v2466_v18 = vpop.permute.xlu0 %1900  ;;  %v554_v22 = vmul.f32 %v2518_v41, %v546_v50 }
 0x17f   :  { %v1891_v7 = vpop.permute.xlu1 %1890 }
 0x180   :  { %v1893_v32 = vunpack.i.h.bf16 %v1891_v7  ;;  %v1892_v33 = vunpack.i.l.bf16 %v1891_v7  ;;  %v1868_v7 = vunpack.i.h.bf16 %v2423_v63 }
 0x181   :  { %v1906_v12 = vpop.permute.xlu0 %1905 }
 0x182   :  { %v440_v47 = vsel %vm438_vm5, %v1793_v19, %v1892_v33  ;;  %v441_v53 = vsel %vm438_vm5, %v1862_v31, %v1893_v32  ;;  %v1888_v19 = vunpack.i.h.bf16 %v2447_v14  ;;  %v639_v32 = vsel %vm593_vm3, %v1882_v13, %v1883_v49 }
 0x183   :  { %v448_v60 = vmul.f32 %v2463_v17, %v440_v47  ;;  %v449_v62 = vmul.f32 %v2463_v17, %v441_v53  ;;  %v1896_v54 = vpop.permute.xlu1 %1895  ;;  %v1887_v33 = vunpack.i.l.bf16 %v2447_v14  ;;  %v1908_v45 = vunpack.i.h.bf16 %v1906_v12 }
 0x184   :  { %v730_v63 = vsel %vm543_vm7, %v1797_v25, %v1888_v19  ;;  %v1898_v53 = vunpack.i.h.bf16 %v1896_v54  ;;  %v1897_v55 = vunpack.i.l.bf16 %v1896_v54  ;;  %v1902_v14 = vunpack.i.l.bf16 %v2466_v18 }
 0x185   :  { %v455_v15 = vrot.slane %v448_v60, 4  ;;  %v457_v23 = vrot.slane %v449_v62, 4  ;;  %v2501_v56 = vpop.permute.xlu0 %1910  ;;  %v1903_v62 = vunpack.i.h.bf16 %v2466_v18  ;;  %v732_v49 = vsel %vm543_vm7, %v1887_v33, %v1908_v45 }
 0x186   :  { %v544_v18 = vsel %vm543_vm7, %v1867_v28, %v1897_v55  ;;  %v545_v50 = vsel %vm543_vm7, %v1868_v7, %v1898_v53  ;;  %v2552_v7 = vld [vmem:[%s2746_s2 + $0x8] ss:$0 sm:$0xff]  ;;  %v637_v28 = vsel %vm593_vm3, %v1877_v35, %v1902_v14  ;;  %v2571_v35 = vld [vmem:[%s2746_s2 + $0x5] ss:$0 sm:$0xff] }
 0x187   :  { %v456_v26 = vsel %vm453_vm4, %v454_v48, %v455_v15  ;;  %v458_v29 = vsel %vm453_vm4, %v455_v15, %v457_v23  ;;  %v464_v1 = vadd.f32 %v457_v23, %v398_v3  ;;  %v1921_v30 = vpop.permute.xlu1 %1920  ;;  %v553_v53 = vmul.f32 %v2518_v41, %v545_v50 }
 0x188   :  { %v462_v59 = vadd.f32 %v456_v26, %v396_v6  ;;  %v463_v31 = vadd.f32 %v458_v29, %v2436_v44  ;;  %v1907_v44 = vunpack.i.l.bf16 %v1906_v12  ;;  %v1922_v13 = vunpack.i.l.bf16 %v1921_v30 }
 0x189   :  { %v507_v42 = vadd.f32 %v504_v38, %v464_v1  ;;  %v2522_v3 = vpop.permute.xlu0 %1915  ;;  %v1923_v38 = vunpack.i.h.bf16 %v1921_v30  ;;  %v638_v1 = vsel %vm593_vm3, %v1878_v34, %v1903_v62  ;;  %v2595_v50 = vmul.f32 %v2518_v41, %v2484_v39 }
 0x18a   :  { %v505_v6 = vadd.f32 %v502_v21, %v462_v59  ;;  %v506_v47 = vadd.f32 %v503_v2, %v463_v31  ;;  %v1917_v57 = vunpack.i.l.bf16 %v2522_v3  ;;  %v731_v19 = vsel %vm543_vm7, %v1798_v27, %v1907_v44 }
 0x18b   :  { %v1931_v60 = vpop.permute.xlu1 %1930  ;;  %v552_v44 = vmul.f32 %v2518_v41, %v544_v18  ;;  %v1913_v39 = vunpack.i.h.bf16 %v2501_v56 }
 0x18c   :  { %v1932_v48 = vunpack.i.l.bf16 %v1931_v60  ;;  %v678_v15 = vsel %vm438_vm5, %v1818_v46, %v1917_v57  ;;  %v1933_v25 = vunpack.i.h.bf16 %v1931_v60  ;;  %v2544_v46 = vld [vmem:[%s2746_s2 + $0x7] ss:$0 sm:$0xff]  ;;  %v557_v60 = vadd.f32 %v554_v22, %v507_v42 }
 0x18d   :  { %v1926_v21 = vpop.permute.xlu0 %1925  ;;  %v686_v12 = vmul.f32 %v2404_v8, %v678_v15  ;;  %v2556_v59 = vmul.f32 %v2544_v46, %v732_v49  ;;  %v739_v45 = vmul.f32 %v2544_v46, %v731_v19  ;;  %v555_v58 = vadd.f32 %v552_v44, %v505_v6 }
 0x18e   :  { %v595_v54 = vsel %vm593_vm3, %v1923_v38, %v1932_v48  ;;  %v1928_v2 = vunpack.i.h.bf16 %v1926_v21  ;;  %v1927_v23 = vunpack.i.l.bf16 %v1926_v21  ;;  %v2577_v38 = vmul.f32 %v2552_v7, %v2504_v5 }
 0x18f   :  { %v603_v26 = vmul.f32 %v2385_v24, %v595_v54  ;;  %v2539_v29 = vpop.permute.xlu1 %1940  ;;  %v694_v30 = vrot.slane %v686_v12, 2  ;;  %v647_v48 = vmul.f32 %v2571_v35, %v639_v32  ;;  %v556_v49 = vadd.f32 %v553_v53, %v506_v47 }
 0x190   :  { %v594_v10 = vsel %vm593_vm3, %v1922_v13, %v1928_v2  ;;  %v596_v27 = vsel %vm593_vm3, %v1927_v23, %v1933_v25  ;;  %v646_v22 = vmul.f32 %v2571_v35, %v638_v1  ;;  %v645_v21 = vmul.f32 %v2571_v35, %v637_v28 }
 0x191   :  { %v602_v31 = vmul.f32 %v2385_v24, %v594_v10  ;;  %v604_v33 = vmul.f32 %v2385_v24, %v596_v27  ;;  %v2560_v34 = vpop.permute.xlu0 %1935  ;;  %v695_v55 = vsel %vm690_vm6, %v692_v61, %v694_v30  ;;  %v609_v57 = vrot.slane %v603_v26, 4 }
 0x192   :  { %v738_v61 = vmul.f32 %v2544_v46, %v730_v63  ;;  %v1823_v54 = vunpack.i.h.bf16 %v2369_v11  ;;  %v747_v32 = vrot.slane %v2556_v59, 6  ;;  %v745_v6 = vrot.slane %v739_v45, 6 }
 0x193   :  { %v608_v24 = vrot.slane %v602_v31, 4  ;;  %v611_v62 = vrot.slane %v604_v33, 4  ;;  %v2573_v14 = vpop.permute.xlu1 %1945  ;;  %v1918_v2 = vunpack.i.h.bf16 %v2522_v3  ;;  %v2599_v26 = vmul.f32 %v2571_v35, %v2495_v43 }
 0x194   :  { %v744_v1 = vrot.slane %v738_v61, 6  ;;  %v787_v28 = vrot.slane %v2577_v38, 2  ;;  %v1857_v59 = vunpack.i.l.bf16 %v2396_v37  ;;  %v1912_v45 = vunpack.i.l.bf16 %v2501_v56 }
 0x195   :  { %v610_v13 = vsel %vm453_vm4, %v608_v24, %v609_v57  ;;  %v612_v15 = vsel %vm453_vm4, %v609_v57, %v611_v62  ;;  %v618_v25 = vadd.f32 %v611_v62, %v557_v60  ;;  %v2583_v42 = vpop.permute.xlu0 %1955  ;;  %v748_v53 = vsel %vm148_vm0, %v745_v6, %v747_v32 }
 0x196   :  { %v616_v12 = vadd.f32 %v610_v13, %v555_v58  ;;  %v617_v5 = vadd.f32 %v612_v15, %v556_v49  ;;  %v746_v33 = vsel %vm148_vm0, %v744_v1, %v745_v6  ;;  %v1942_v57 = vunpack.i.l.bf16 %v2539_v29 }
 0x197   :  { %v650_v47 = vadd.f32 %v647_v48, %v618_v25  ;;  %v2589_v63 = vpop.permute.xlu1 %1950  ;;  %v1938_v60 = vunpack.i.h.bf16 %v2560_v34  ;;  %v1937_v49 = vunpack.i.l.bf16 %v2560_v34  ;;  %v1947_v61 = vunpack.i.l.bf16 %v2573_v14 }
 0x198   :  { %v648_v23 = vadd.f32 %v645_v21, %v616_v12  ;;  %v649_v19 = vadd.f32 %v646_v22, %v617_v5  ;;  %v1953_v18 = vunpack.i.h.bf16 %v2589_v63  ;;  %v1958_v12 = vunpack.i.h.bf16 %v2583_v42 }
 0x199   :  { %v1966_v10 = vpop.permute.xlu0 %1965  ;;  %v701_v27 = vadd.f32 %v694_v30, %v650_v47  ;;  %v1943_v30 = vunpack.i.h.bf16 %v2539_v29  ;;  %v1957_v5 = vunpack.i.l.bf16 %v2583_v42  ;;  %v1952_v6 = vunpack.i.l.bf16 %v2589_v63  ;;  %v1577_v42 = vld [vmem:[%s2747_s3] ss:$0 sm:$0xff] }
 0x19a   :  { %v1232_v3 = vsel %vm438_vm5, %v1918_v2, %v1953_v18  ;;  %v699_v31 = vadd.f32 %v2431_v0, %v648_v23  ;;  %v700_v43 = vadd.f32 %v695_v55, %v649_v19  ;;  %v1968_v0 = vunpack.i.h.bf16 %v1966_v10 }
 0x19b   :  { %v1961_v44 = vpop.permute.xlu1 %1960  ;;  %v2613_v24 = vmul.f32 %v2404_v8, %v1232_v3  ;;  %v1967_v62 = vunpack.i.l.bf16 %v1966_v10  ;;  %v1948_v55 = vunpack.i.h.bf16 %v2573_v14  ;;  %v2628_v19 = vadd.f32 %v747_v32, %v701_v27 }
 0x19c   :  { %v2615_v58 = vadd.f32 %v746_v33, %v699_v31  ;;  %v1963_v13 = vunpack.i.h.bf16 %v1961_v44  ;;  %v1962_v15 = vunpack.i.l.bf16 %v1961_v44  ;;  %v2620_v21 = vadd.f32 %v748_v53, %v700_v43 }
 0x19d   :  { %v1971_v48 = vpop.permute.xlu0 %1970  ;;  %v1246_v34 = vrot.slane %v2613_v24, 2  ;;  %v1194_v2 = vsel %vm593_vm3, %v1943_v30, %v1968_v0  ;;  %v1193_v14 = vsel %vm593_vm3, %v1942_v57, %v1967_v62 }
 0x19e   :  { %v1973_v25 = vunpack.i.h.bf16 %v1971_v48  ;;  %v1972_v29 = vunpack.i.l.bf16 %v1971_v48  ;;  %v1102_v31 = vsel %vm543_vm7, %v1938_v60, %v1963_v13  ;;  %v1101_v33 = vsel %vm543_vm7, %v1937_v49, %v1962_v15 }
 0x19f   :  { %v1981_v22 = vpop.permute.xlu1 %1980  ;;  %v1202_v57 = vmul.f32 %v2571_v35, %v1194_v2  ;;  %v1201_v0 = vmul.f32 %v2571_v35, %v1193_v14  ;;  %v1110_v49 = vmul.f32 %v2518_v41, %v1102_v31 }
 0x1a0   :  { %v1982_v47 = vunpack.i.l.bf16 %v1981_v22  ;;  %v1983_v18 = vunpack.i.h.bf16 %v1981_v22  ;;  %v1054_v63 = vsel %vm438_vm5, %v1972_v29, %v1973_v25 }
 0x1a1   :  { %v1976_v23 = vpop.permute.xlu0 %1975  ;;  %v1062_v15 = vmul.f32 %v2474_v20, %v1054_v63 }
 0x1a2   :  { %v999_v1 = vsel %vm438_vm5, %v1948_v55, %v1982_v47  ;;  %v1978_v10 = vunpack.i.h.bf16 %v1976_v23  ;;  %v1977_v3 = vunpack.i.l.bf16 %v1976_v23  ;;  %v1109_v55 = vmul.f32 %v2518_v41, %v1101_v33 }
 0x1a3   :  { %v1007_v44 = vmul.f32 %v2463_v17, %v999_v1  ;;  %v1986_v43 = vpop.permute.xlu1 %1985 }
 0x1a4   :  { %v998_v53 = vsel %vm438_vm5, %v1947_v61, %v1978_v10  ;;  %v1000_v30 = vsel %vm438_vm5, %v1977_v3, %v1983_v18  ;;  %v1988_v32 = vunpack.i.h.bf16 %v1986_v43  ;;  %v1987_v27 = vunpack.i.l.bf16 %v1986_v43 }
 0x1a5   :  { %v1006_v62 = vmul.f32 %v2463_v17, %v998_v53  ;;  %v1008_v60 = vmul.f32 %v2463_v17, %v1000_v30  ;;  %v2641_v48 = vpop.permute.xlu0 %1995  ;;  %v1013_v25 = vrot.slane %v1007_v44, 4 }
 0x1a6   :  { %v1053_v61 = vsel %vm438_vm5, %v1913_v39, %v1988_v32  ;;  %v1052_v13 = vsel %vm438_vm5, %v1912_v45, %v1987_v27  ;;  %v1998_v47 = vunpack.i.h.bf16 %v2641_v48  ;;  %v1997_v37 = vunpack.i.l.bf16 %v2641_v48 }
 0x1a7   :  { %v1012_v35 = vrot.slane %v1006_v62, 4  ;;  %v1015_v29 = vrot.slane %v1008_v60, 4  ;;  %v1991_v22 = vpop.permute.xlu1 %1990  ;;  %v1061_v17 = vmul.f32 %v2474_v20, %v1053_v61  ;;  %v1060_v45 = vmul.f32 %v2474_v20, %v1052_v13 }
 0x1a8   :  { %v1993_v2 = vunpack.i.h.bf16 %v1991_v22  ;;  %v1992_v14 = vunpack.i.l.bf16 %v1991_v22 }
 0x1a9   :  { %v1022_v41 = vadd.f32 %v1015_v29, %v2454_v4  ;;  %v1014_v23 = vsel %vm453_vm4, %v1012_v35, %v1013_v25  ;;  %v1016_v18 = vsel %vm453_vm4, %v1013_v25, %v1015_v29  ;;  %v2001_v1 = vpop.permute.xlu0 %2000 }
 0x1aa   :  { %v1020_v10 = vadd.f32 %v1014_v23, %v2444_v9  ;;  %v1021_v3 = vadd.f32 %v1016_v18, %v2450_v16  ;;  %v775_v31 = vsel %vm543_vm7, %v1857_v59, %v1993_v2  ;;  %v774_v33 = vsel %vm543_vm7, %v1823_v54, %v1992_v14 }
 0x1ab   :  { %v1065_v4 = vadd.f32 %v1062_v15, %v1022_v41  ;;  %v783_v63 = vmul.f32 %v2552_v7, %v775_v31  ;;  %v782_v44 = vmul.f32 %v2552_v7, %v774_v33  ;;  %v2003_v43 = vunpack.i.h.bf16 %v2001_v1  ;;  %v2006_v20 = vpop.permute.xlu1 %2005 }
 0x1ac   :  { %v1063_v53 = vadd.f32 %v1060_v45, %v1020_v10  ;;  %v1064_v30 = vadd.f32 %v1061_v17, %v1021_v3  ;;  %v2002_v9 = vunpack.i.l.bf16 %v2001_v1  ;;  %v2008_v32 = vunpack.i.h.bf16 %v2006_v20 }
 0x1ad   :  { %v1114_v16 = vadd.f32 %v2595_v50, %v1065_v4  ;;  %v790_v59 = vrot.slane %v783_v63, 2  ;;  %v1234_v11 = vsel %vm438_vm5, %v1952_v6, %v2003_v43  ;;  %v2011_v27 = vpop.permute.xlu0 %2010  ;;  %v788_v13 = vrot.slane %v782_v44, 2 }
 0x1ae   :  { %v1112_v54 = vadd.f32 %v1109_v55, %v1063_v53  ;;  %v1113_v62 = vadd.f32 %v1110_v49, %v1064_v30  ;;  %v1242_v60 = vmul.f32 %v2404_v8, %v1234_v11  ;;  %v1233_v61 = vsel %vm438_vm5, %v1913_v39, %v2002_v9 }
 0x1af   :  { %v1174_v15 = vadd.f32 %v1167_v40, %v1114_v16  ;;  %v1241_v50 = vmul.f32 %v2404_v8, %v1233_v61  ;;  %v1285_v25 = vsel %vm543_vm7, %v1957_v5, %v2008_v32  ;;  %v2007_v29 = vunpack.i.l.bf16 %v2006_v20  ;;  %v2016_v2 = vpop.permute.xlu1 %2015 }
 0x1b0   :  { %v1172_v6 = vadd.f32 %v2407_v51, %v1112_v54  ;;  %v1173_v49 = vadd.f32 %v2412_v52, %v1113_v62  ;;  %v1249_v55 = vrot.slane %v1242_v60, 2  ;;  %v1293_v35 = vmul.f32 %v2544_v46, %v1285_v25 }
 0x1b1   :  { %v1206_v56 = vadd.f32 %v2599_v26, %v1174_v15  ;;  %v1247_v39 = vrot.slane %v1241_v50, 2  ;;  %v2013_v22 = vunpack.i.h.bf16 %v2011_v27  ;;  %v797_v36 = vadd.f32 %v790_v59, %v2628_v19  ;;  %v2021_v14 = vpop.permute.xlu0 %2020 }
 0x1b2   :  { %v1204_v40 = vadd.f32 %v1201_v0, %v1172_v6  ;;  %v1205_v8 = vadd.f32 %v1202_v57, %v1173_v49  ;;  %v2012_v17 = vunpack.i.l.bf16 %v2011_v27  ;;  %v1299_v5 = vrot.slane %v1293_v35, 6 }
 0x1b3   :  { %v1248_v51 = vsel %vm690_vm6, %v1246_v34, %v1247_v39  ;;  %v1250_v52 = vsel %vm690_vm6, %v1247_v39, %v1249_v55  ;;  %v1287_v41 = vsel %vm543_vm7, %v2007_v29, %v2013_v22  ;;  %v1256_v23 = vadd.f32 %v1249_v55, %v1206_v56 }
 0x1b4   :  { %v1254_v26 = vadd.f32 %v1248_v51, %v1204_v40  ;;  %v1295_v18 = vmul.f32 %v2544_v46, %v1287_v41  ;;  %v1286_v19 = vsel %vm543_vm7, %v1958_v12, %v2012_v17  ;;  %v2018_v0 = vunpack.i.h.bf16 %v2016_v2 }
 0x1b5   :  { %v1294_v57 = vmul.f32 %v2544_v46, %v1286_v19  ;;  %v2017_v45 = vunpack.i.l.bf16 %v2016_v2  ;;  %v2023_v24 = vunpack.i.h.bf16 %v2021_v14  ;;  %v2022_v34 = vunpack.i.l.bf16 %v2021_v14  ;;  %v1559_v14 = vld [vmem:[%s2749_s6] ss:$0 sm:$0xff] }
 0x1b6   :  { %v1302_v1 = vrot.slane %v1295_v18, 6  ;;  %v789_v10 = vsel %vm690_vm6, %v787_v28, %v788_v13  ;;  %v791_v3 = vsel %vm690_vm6, %v788_v13, %v790_v59  ;;  %v1328_v33 = vsel %vm543_vm7, %v1997_v37, %v2018_v0 }
 0x1b7   :  { %v1300_v31 = vrot.slane %v1294_v57, 6  ;;  %v1330_v46 = vsel %vm543_vm7, %v2017_v45, %v2023_v24  ;;  %v795_v12 = vadd.f32 %v789_v10, %v2615_v58  ;;  %v1255_v4 = vadd.f32 %v1250_v52, %v1205_v8  ;;  %v1558_v58 = vld [vmem:[%s2748_s4] ss:$0 sm:$0xff] }
 0x1b8   :  { %v1336_v63 = vmul.f32 %v2552_v7, %v1328_v33  ;;  %v1338_v38 = vmul.f32 %v2552_v7, %v1330_v46  ;;  %v1329_v28 = vsel %vm543_vm7, %v1998_v47, %v2022_v34  ;;  %v1309_v43 = vadd.f32 %v1302_v1, %v1256_v23 }
 0x1b9   :  { %v1301_v44 = vsel %vm148_vm0, %v1299_v5, %v1300_v31  ;;  %v1337_v20 = vmul.f32 %v2552_v7, %v1329_v28  ;;  %v796_v53 = vadd.f32 %v791_v3, %v2620_v21  ;;  %v1303_v30 = vsel %vm148_vm0, %v1300_v31, %v1302_v1 }
 0x1ba   :  { %v1345_v9 = vrot.slane %v1338_v38, 2  ;;  %v805_v32 = vmul.f32 %v1577_v42, %v795_v12  ;;  %v807_v16 = vmul.f32 %v1577_v42, %v797_v36  ;;  %v1342_v37 = vrot.slane %v1336_v63, 2 }
 0x1bb   :  { %v1343_v48 = vrot.slane %v1337_v20, 2  ;;  %v806_v59 = vmul.f32 %v1577_v42, %v796_v53  ;;  %v1307_v54 = vadd.f32 %v1301_v44, %v1254_v26  ;;  %v1308_v60 = vadd.f32 %v1303_v30, %v1255_v4 }
 0x1bc   :  { %v1352_v47 = vadd.f32 %v1345_v9, %v1309_v43  ;;  %v815_v11 = vadd.f32 %v1558_v58, %v805_v32  ;;  %v817_v27 = vadd.f32 %v1558_v58, %v807_v16 }
 0x1bd   :  { %v1344_v7 = vsel %vm690_vm6, %v1342_v37, %v1343_v48  ;;  %v1346_v21 = vsel %vm690_vm6, %v1343_v48, %v1345_v9  ;;  %v816_v62 = vadd.f32 %v1558_v58, %v806_v59 }
 0x1be   :  { %v1362_v61 = vmul.f32 %v1577_v42, %v1352_v47  ;;  %v818_v13 = vmax.f32 %v815_v11, 0.0  ;;  %v820_v15 = vmax.f32 %v817_v27, 0.0  ;;  %v1350_v50 = vadd.f32 %v1344_v7, %v1307_v54 }
 0x1bf   :  { %v819_v25 = vmax.f32 %v816_v62, 0.0  ;;  %v1351_v6 = vadd.f32 %v1346_v21, %v1308_v60 }
 0x1c0   :  { %v1360_v49 = vmul.f32 %v1577_v42, %v1350_v50  ;;  %v1372_v55 = vadd.f32 %v1558_v58, %v1362_v61  ;;  %v822_v39 = vpack.c.bf16 %v820_v15, %v820_v15 }
 0x1c1   :  { %v821_v35 = vpack.c.bf16 %v819_v25, %v818_v13  ;;  %v1361_v56 = vmul.f32 %v1577_v42, %v1351_v6 }
 0x1c2   :  { %v1370_v29 = vadd.f32 %v1558_v58, %v1360_v49  ;;  %v1375_v40 = vmax.f32 %v1372_v55, 0.0 }
 0x1c3   :  { %1754 = vmatprep.mubr.bf16.mxu1 %v821_v35  ;;  %v1371_v22 = vadd.f32 %v1558_v58, %v1361_v56 }
 0x1c4   :  { %1755 = vmatmul.mubr.bf16.vlgmr.msra.gmra.mxu1 %v822_v39  ;;  %v1373_v36 = vmax.f32 %v1370_v29, 0.0  ;;  %v1377_v2 = vpack.c.bf16 %v1375_v40, %v1375_v40 }
 0x1c5   :  { %v1374_v8 = vmax.f32 %v1371_v22, 0.0 }
 0x1c7   :  { %v1376_v17 = vpack.c.bf16 %v1374_v8, %v1373_v36 }
 0x1c9   :  { %1774 = vmatprep.mubr.bf16.mxu0 %v1376_v17 }
 0x1ca   :  { %1775 = vmatmul.mubr.bf16.vlgmr.msra.gmra.mxu0 %v1377_v2 }
 0x284   :  { %v1756_v51 = vpop.f32.mrf.mxu1 }
 0x285   :  { %v937_v52 = vadd.f32 %v1756_v51, %v1559_v14 }
 0x286   :  { %v928_v5 = vpop.f32.mrf.mxu1 }
 0x287   :  { %945 = vst.msk [vmem:[%s2750_s7 + $0x10] sm:$0x3] %vm944_vm8, %v937_v52  ;;  %v929_v41 = vadd.f32 %v1559_v14, %v928_v5 }
 0x288   :  { %v1757_v26 = vpop.f32.mrf.mxu1 }
 0x289   :  { %942 = vst.msk [vmem:[%s2750_s7] sm:$0xff] %vm543_vm7, %v929_v41 }
 0x28a   :  { %v931_v23 = vpop.f32.mrf.mxu1  ;;  %v1776_v18 = vpop.f32.mrf.mxu0 }
 0x28b   :  { %v932_v19 = vadd.f32 %v1559_v14, %v931_v23  ;;  %v1492_v57 = vadd.f32 %v1776_v18, %v1559_v14 }
 0x28c   :  { %v1483_v0 = vpop.f32.mrf.mxu0 }
 0x28d   :  { %943 = vst.msk [vmem:[%s2750_s7 + $0x8] sm:$0xff] %vm543_vm7, %v932_v19  ;;  %v1484_v45 = vadd.f32 %v1559_v14, %v1483_v0 }
 0x28e   :  { %1590 = vst.msk [vmem:[%s2750_s7 + $0x28] sm:$0x3] %vm944_vm8, %v1492_v57  ;;  %v1777_v24 = vpop.f32.mrf.mxu0 }
 0x28f   :  { %1588 = vst.msk [vmem:[%s2750_s7 + $0x18] sm:$0xff] %vm543_vm7, %v1484_v45 }
 0x290   :  { %v1486_v1 = vpop.f32.mrf.mxu0 }
 0x291   :  { %v1487_v34 = vadd.f32 %v1559_v14, %v1486_v1 }
 0x293   :  { %1589 = vst.msk [vmem:[%s2750_s7 + $0x20] sm:$0xff] %vm543_vm7, %v1487_v34 }

// kernel: _lambda_.2
= control target key start
LH: loop header
LB: loop body
LE: loop exit
PB: predicated region body
PF: predicated region fallthrough
CT: control target
= control target key end

     0   :  { %vm191_vm0 = vcmask 1041408   ;;  %vm148_vm1 = vcmask 293888   ;;  %s3967_s16 = smov 96   ;;  %vm612_vm2 = vcmask 1046528   ;;  %vm1154_vm3 = vcmask 1043456   ;;  %s6688_s1 = inlined_call_operand.vmem [shape: bf16[36,128], index: 1, kind: input, shape index: {}]   ;;  %s6689_s0 = inlined_call_operand.vmem [shape: bf16[224,36], index: 0, kind: input, shape index: {}]   ;;  %s6690_s2 = inlined_call_operand.vmem [shape: f32[9,128], index: 2, kind: input, shape index: {}]   ;;  %s6691_s5 = inlined_call_operand.vmem [shape: bf16[128,32], index: 5, kind: input, shape index: {}]   ;;  %s6692_s3 = inlined_call_operand.vmem [shape: f32[1,128], index: 3, kind: input, shape index: {}]   ;;  %s6693_s4 = inlined_call_operand.vmem [shape: f32[1,128], index: 4, kind: input, shape index: {}]   ;;  %s6694_s6 = inlined_call_operand.vmem [shape: f32[1,32], index: 6, kind: input, shape index: {}]   ;;  %s6695_s7 = inlined_call_operand.vmem [shape: f32[2,96,32], index: 7, kind: input, shape index: {}]   ;;  %s6696_s8 = inlined_call_operand.vmem [shape: f32[2,96,32], index: 8, kind: output, shape index: {}]  }
   0x1   :  { %v3929_v0 = vld [vmem:[%s6688_s1 + $0x10] ss:$0 sps:$4 sm:$0x33]   ;;  %v3930_v1 = vld [vmem:[%s6688_s1 + $0x8] sm:$0xff]   ;;  %v3932_v3 = vld [vmem:[%s6689_s0] sm:$0xff]   ;;  %vm674_vm4 = vcmask 785408  }
   0x2   :  { %3476 = vmatprep.subr.msk.bf16.mxu0 %vm191_vm0, %v3929_v0  ;;  %v193_v2 = vsel %vm191_vm0, %v3929_v0, 0  ;;  %v3931_v4 = vld [vmem:[%s6688_s1] sm:$0xff]   ;;  %3376 = vmatprep.mubr.msk.bf16.mxu0 %vm148_vm1, %v3932_v3  ;;  %v3933_v5 = vld [vmem:[%s6689_s0 + $0x8] sm:$0xff]   ;;  %v3934_v6 = vld [vmem:[%s6689_s0 + $0x10] sm:$0xff]   ;;  %vm788_vm5 = vcmask 523264   ;;  %vm1647_vm6 = vcmask 261120  }
   0x3   :  { %3371 = vmatpush3.bf16.msra.mxu0 %v193_v2  ;;  %v3935_v7 = vld [vmem:[%s6689_s0 + $0x18] sm:$0xff]   ;;  %v3936_v8 = vld [vmem:[%s6689_s0 + $0x20] sm:$0xff]   ;;  %v3937_v9 = vld [vmem:[%s6689_s0 + $0x28] sm:$0xff]  }
   0x4   :  { %3372 = vmatprep.subr.bf16.mxu0 %v3930_v1  ;;  %v3938_v10 = vld [vmem:[%s6689_s0 + $0x30] sm:$0xff]   ;;  %v3939_v11 = vld [vmem:[%s6689_s0 + $0x38] sm:$0xff]   ;;  %v3940_v12 = vld [vmem:[%s6689_s0 + $0x40] sm:$0xff]  }
   0x5   :  { %v3941_v13 = vld [vmem:[%s6689_s0 + $0x48] sm:$0xff]   ;;  %v3942_v14 = vld [vmem:[%s6689_s0 + $0x50] sm:$0xff]   ;;  %v3943_v15 = vld [vmem:[%s6689_s0 + $0x58] sm:$0xff]  }
   0x6   :  { %v3944_v16 = vld [vmem:[%s6689_s0 + $0x60] sm:$0xff]   ;;  %v3945_v17 = vld [vmem:[%s6689_s0 + $0x68] sm:$0xff]   ;;  %s3966_s0 = smov 64  }
   0x7   :  { %3373 = vmatpush3.bf16.msra.mxu0 %v3930_v1  ;;  %v4111_v56 = vld [vmem:[%s6690_s2 + $0x3] ss:$0 sm:$0xff] }
   0x8   :  { %3374 = vmatprep.subr.bf16.mxu0 %v3931_v4 }
   0xb   :  { %3375 = vmatpush3.bf16.msra.mxu0 %v3931_v4 }
   0xe   :  { %3377 = vmatmul.mubr.msk.bf16.vlgmr.msra.gmra.mxu0 %vm148_vm1, %v3933_v5 }
   0xf   :  { %3380 = vmatprep.mubr.msk.bf16.mxu0 %vm148_vm1, %v3934_v6 }
  0x16   :  { %3381 = vmatmul.mubr.msk.bf16.gmra.mxu0 %vm148_vm1, %v3935_v7 }
  0x17   :  { %3384 = vmatprep.mubr.msk.bf16.mxu0 %vm148_vm1, %v3936_v8 }
  0x1e   :  { %3385 = vmatmul.mubr.msk.bf16.gmra.mxu0 %vm148_vm1, %v3937_v9 }
  0x1f   :  { %3388 = vmatprep.mubr.msk.bf16.mxu0 %vm148_vm1, %v3938_v10 }
  0x26   :  { %3389 = vmatmul.mubr.msk.bf16.gmra.mxu0 %vm148_vm1, %v3939_v11 }
  0x27   :  { %3392 = vmatprep.mubr.msk.bf16.mxu0 %vm148_vm1, %v3940_v12 }
  0x2e   :  { %3393 = vmatmul.mubr.msk.bf16.gmra.mxu0 %vm148_vm1, %v3941_v13 }
  0x2f   :  { %3396 = vmatprep.mubr.msk.bf16.mxu0 %vm148_vm1, %v3942_v14 }
  0x36   :  { %3397 = vmatmul.mubr.msk.bf16.gmra.mxu0 %vm148_vm1, %v3943_v15 }
  0x37   :  { %3400 = vmatprep.mubr.msk.bf16.mxu0 %vm148_vm1, %v3944_v16 }
  0x3e   :  { %3401 = vmatmul.mubr.msk.bf16.gmra.mxu0 %vm148_vm1, %v3945_v17 }
  0xce   :  { %v3378_v18 = vpop.f32.mrf.mxu0 }
  0xcf   :  { %v342_v21 = vmax.f32 %v3378_v18, 0.0 }
  0xd0   :  { %v229_v19 = vpop.f32.mrf.mxu0 }
  0xd1   :  { %v340_v24 = vmax.f32 %v229_v19, 0.0  ;;  %v3946_v19 = vld [vmem:[%s6691_s5 + $0x38] sm:$0xff]  }
  0xd2   :  { %v3379_v20 = vpop.f32.mrf.mxu0  ;;  %3404 = vmatprep.subr.bf16.mxu1 %v3946_v19 }
  0xd3   :  { %v343_v22 = vmax.f32 %v3379_v20, 0.0  ;;  %3405 = vmatpush3.bf16.msra.mxu1 %v3946_v19 }
  0xd4   :  { %v232_v23 = vpop.f32.mrf.mxu0 }
  0xd5   :  { %v3166_v25 = vpack.c.bf16 %v343_v22, %v342_v21  ;;  %v341_v26 = vmax.f32 %v232_v23, 0.0 }
  0xd6   :  { %v3382_v27 = vpop.f32.mrf.mxu0 }
  0xd7   :  { %v3161_v28 = vpack.c.bf16 %v341_v26, %v340_v24  ;;  %v4080_v29 = vunpack.c.l.bf16 %v3166_v25  ;;  %v4082_v30 = vunpack.c.h.bf16 %v3166_v25  ;;  %v346_v36 = vmax.f32 %v3382_v27, 0.0 }
  0xd8   :  { %v245_v31 = vpop.f32.mrf.mxu0 }
  0xd9   :  { %3162 = vst [vmem:[#allocation2] sm:$0xff] %v3161_v28   ;;  %v3484_v32 = vpack.i.bf16 %v4082_v30, %v4080_v29  ;;  %v4086_v33 = vunpack.c.l.bf16 %v3161_v28  ;;  %v4088_v34 = vunpack.c.h.bf16 %v3161_v28  ;;  %v4095_v41 = vrot.slane %v4080_v29, 1 }
  0xda   :  { %v3383_v35 = vpop.f32.mrf.mxu0  ;;  %v344_v42 = vmax.f32 %v245_v31, 0.0  ;;  %v4120_v1 = vmul.f32 %v4080_v29, %v4111_v56 }
  0xdb   :  { %v347_v37 = vmax.f32 %v3383_v35, 0.0  ;;  %3485 = vrot.lane.b32.xlu1 %v3484_v32, %s3966_s0  ;;  %3480 = vrot.lane.b32.xlu0 %v3484_v32, %s3967_s16  ;;  %v614_v38 = vrot.slane %v4088_v34, 1  ;;  %v613_v39 = vrot.slane %v4086_v33, 1  ;;  %v3494_v45 = vpack.i.bf16 %v4088_v34, %v4086_v33 }
  0xdc   :  { %v248_v40 = vpop.f32.mrf.mxu0  ;;  %v840_v58 = vmul.f32 %v4088_v34, %v4111_v56  ;;  %v6698_v14 = vrot.slane %v4120_v1, 6 }
  0xdd   :  { %v3176_v43 = vpack.c.bf16 %v347_v37, %v346_v36  ;;  %v345_v44 = vmax.f32 %v248_v40, 0.0  ;;  %v615_v47 = vsel %vm612_vm2, %v613_v39, %v614_v38  ;;  %v617_v48 = vsel %vm612_vm2, %v614_v38, %v4095_v41 }
  0xde   :  { %v3386_v46 = vpop.f32.mrf.mxu0  ;;  %v3499_v55 = vpack.i.bf16 %v617_v48, %v615_v47  ;;  %v866_v12 = vrot.slane %v840_v58, 6 }
  0xdf   :  { %v3171_v49 = vpack.c.bf16 %v345_v44, %v344_v42  ;;  %3495 = vrot.lane.b32.xlu1 %v3494_v45, %s3966_s0  ;;  %3490 = vrot.lane.b32.xlu0 %v3494_v45, %s3967_s16  ;;  %v350_v59 = vmax.f32 %v3386_v46, 0.0  ;;  %v4142_v16 = vunpack.c.l.bf16 %v3176_v43  ;;  %v4144_v17 = vunpack.c.h.bf16 %v3176_v43 }
  0xe0   :  { %v261_v50 = vpop.f32.mrf.mxu0  ;;  %v830_v51 = vld [vmem:[#allocation2] sm:$0x8]  ;;  %v1119_v52 = vld [vmem:[#allocation2 + $0x4] sm:$0xc]  ;;  %v4157_v26 = vsel %vm191_vm0, %v866_v12, %v6698_v14  ;;  %v618_v42 = vrot.slane %v4082_v30, 1 }
  0xe1   :  { %v4104_v53 = vunpack.c.l.bf16 %v830_v51  ;;  %v4106_v54 = vunpack.c.l.bf16 %v1119_v52  ;;  %v348_v63 = vmax.f32 %v261_v50, 0.0  ;;  %v4125_v5 = vunpack.c.l.bf16 %v3171_v49  ;;  %6768 = vst [vmem:[#allocation3_spill] sm:$0xff] %v4157_v26 }
  0xe2   :  { %v3387_v57 = vpop.f32.mrf.mxu0  ;;  %v4128_v8 = vunpack.c.h.bf16 %v3171_v49  ;;  %v3524_v36 = vpack.i.bf16 %v4144_v17, %v4142_v16  ;;  %v4185_v50 = vmul.f32 %v4142_v16, %v4111_v56 }
  0xe3   :  { %v351_v60 = vmax.f32 %v3387_v57, 0.0  ;;  %v925_v61 = vrot.slane %v4104_v53, 1  ;;  %3500 = vrot.lane.b32.xlu0 %v3499_v55, %s3967_s16  ;;  %v1218_v62 = vrot.slane %v4106_v54, 1  ;;  %v839_v9 = vmul.f32 %v4111_v56, %v4104_v53 }
  0xe4   :  { %v264_v0 = vpop.f32.mrf.mxu0  ;;  %v620_v18 = vrot.slane %v4125_v5, 1  ;;  %v622_v22 = vrot.slane %v4128_v8, 1  ;;  %v4170_v39 = vmul.f32 %v4125_v5, %v4111_v56  ;;  %v844_v47 = vmul.f32 %v4128_v8, %v4111_v56 }
  0xe5   :  { %v4122_v2 = vpack.c.bf16 %v351_v60, %v350_v59  ;;  %v349_v3 = vmax.f32 %v264_v0, 0.0  ;;  %v926_v4 = vsel %vm612_vm2, %v925_v61, %v614_v38  ;;  %v4136_v11 = vsel %vm612_vm2, %v1218_v62, %v4095_v41 }
  0xe6   :  { %v3390_v6 = vpop.f32.mrf.mxu0  ;;  %v3509_v7 = vpack.i.bf16 %v4106_v54, %v926_v4  ;;  %v3514_v15 = vpack.i.bf16 %v926_v4, %v4104_v53  ;;  %v3519_v21 = vpack.i.bf16 %v4136_v11, %v4106_v54  ;;  %v865_v23 = vrot.slane %v839_v9, 6 }
  0xe7   :  { %v4132_v10 = vpack.c.bf16 %v349_v3, %v348_v63  ;;  %3505 = vrot.lane.b32.xlu0 %v3499_v55, %s3966_s0  ;;  %v354_v24 = vmax.f32 %v3390_v6, 0.0  ;;  %v623_v38 = vsel %vm612_vm2, %v620_v18, %v622_v22  ;;  %v621_v45 = vsel %vm612_vm2, %v618_v42, %v620_v18  ;;  %v3947_v55 = vld [vmem:[%s6691_s5 + $0x30] sm:$0xff]  }
  0xe8   :  { %v277_v13 = vpop.f32.mrf.mxu0  ;;  %3510 = vrot.lane.b32.xlu1 %v3509_v7, %s3967_s16  ;;  %v4161_v28 = vsel %vm191_vm0, %v865_v23, %v866_v12  ;;  %v3544_v44 = vpack.i.bf16 %v4104_v53, %v623_v38  ;;  %v6697_v46 = vrot.slane %v4170_v39, 6  ;;  %v3534_v49 = vpack.i.bf16 %v4128_v8, %v4125_v5  ;;  %3406 = vmatprep.subr.bf16.mxu1 %v3947_v55 }
  0xe9   :  { %6769 = vst [vmem:[#allocation4_spill] sm:$0xff] %v4161_v28  ;;  %v352_v31 = vmax.f32 %v277_v13, 0.0  ;;  %v619_v53 = vsel %vm612_vm2, %v4095_v41, %v618_v42  ;;  %v874_v57 = vrot.slane %v844_v47, 6  ;;  %v624_v60 = vrot.slane %v4142_v16, 1  ;;  %3407 = vmatpush3.bf16.msra.mxu1 %v3947_v55  ;;  %v4251_v47 = vld [vmem:[%s6690_s2 + $0x6] ss:$0 sm:$0xff] }
  0xea   :  { %v3391_v20 = vpop.f32.mrf.mxu0  ;;  %v3539_v59 = vpack.i.bf16 %v621_v45, %v619_v53  ;;  %v6700_v61 = vrot.slane %v4185_v50, 6  ;;  %v4213_v9 = vunpack.c.l.bf16 %v4132_v10  ;;  %v3554_v18 = vpack.i.bf16 %v623_v38, %v4125_v5 }
  0xeb   :  { %v355_v25 = vmax.f32 %v3391_v20, 0.0  ;;  %3515 = vrot.lane.b32.xlu0 %v3514_v15, %s3966_s0  ;;  %v4201_v41 = vsel %vm191_vm0, %v6697_v46, %v874_v57  ;;  %v625_v4 = vsel %vm612_vm2, %v622_v22, %v624_v60  ;;  %v4219_v19 = vunpack.c.l.bf16 %v4122_v2 }
  0xec   :  { %v280_v27 = vpop.f32.mrf.mxu0  ;;  %3520 = vrot.lane.b32.xlu1 %v3519_v21, %s3966_s0  ;;  %6770 = vst [vmem:[#allocation5_spill] sm:$0xff] %v4201_v41  ;;  %v4207_v6 = vsel %vm191_vm0, %v874_v57, %v6700_v61  ;;  %v3559_v13 = vpack.i.bf16 %v625_v4, %v4136_v11  ;;  %v4222_v20 = vunpack.c.h.bf16 %v4122_v2  ;;  %v628_v23 = vrot.slane %v4213_v9, 1 }
  0xed   :  { %v4163_v32 = vpack.c.bf16 %v355_v25, %v354_v24  ;;  %v353_v35 = vmax.f32 %v280_v27, 0.0  ;;  %6771 = vst [vmem:[#allocation6_spill] sm:$0xff] %v4207_v6  ;;  %v4227_v24 = vunpack.c.h.bf16 %v4132_v10  ;;  %v626_v11 = vrot.slane %v4144_v17, 1  ;;  %v3948_v27 = vld [vmem:[%s6691_s5 + $0x28] sm:$0xff]  }
  0xee   :  { %v3394_v37 = vpop.f32.mrf.mxu0  ;;  %v3569_v10 = vpack.i.bf16 %v4222_v20, %v4219_v19  ;;  %3408 = vmatprep.subr.bf16.mxu1 %v3948_v27  ;;  %v632_v55 = vrot.slane %v4219_v19, 1 }
  0xef   :  { %3302 = vst [vmem:[#allocation2 + $0x38] sm:$0xff] %v4163_v32   ;;  %v3191_v40 = vpack.c.bf16 %v353_v35, %v352_v31  ;;  %3530 = vrot.lane.b32.xlu0 %v3524_v36, %s3966_s0  ;;  %v358_v51 = vmax.f32 %v3394_v37, 0.0  ;;  %v630_v42 = vrot.slane %v4227_v24, 1  ;;  %3409 = vmatpush3.bf16.msra.mxu1 %v3948_v27 }
  0xf0   :  { %v293_v43 = vpop.f32.mrf.mxu0  ;;  %3525 = vrot.lane.b32.xlu1 %v3524_v36, %s3967_s16  ;;  %v3564_v36 = vpack.i.bf16 %v625_v4, %v4128_v8 }
  0xf1   :  { %3301 = vst [vmem:[#allocation2 + $0x30] sm:$0xff] %v3191_v40   ;;  %v356_v62 = vmax.f32 %v293_v43, 0.0  ;;  %v629_v40 = vsel %vm612_vm2, %v626_v11, %v628_v23 }
  0xf2   :  { %v3395_v48 = vpop.f32.mrf.mxu0 }
  0xf3   :  { %v359_v52 = vmax.f32 %v3395_v48, 0.0  ;;  %3545 = vrot.lane.b32.xlu0 %v3544_v44, %s3967_s16  ;;  %v3949_v44 = vld [vmem:[%s6691_s5 + $0x20] sm:$0xff]   ;;  %v4254_v48 = vunpack.c.l.bf16 %v4163_v32 }
  0xf4   :  { %v296_v58 = vpop.f32.mrf.mxu0  ;;  %3535 = vrot.lane.b32.xlu1 %v3534_v49, %s3967_s16  ;;  %v4257_v49 = vunpack.c.h.bf16 %v4163_v32  ;;  %3410 = vmatprep.subr.bf16.mxu1 %v3949_v44  ;;  %v4268_v32 = vmul.f32 %v4080_v29, %v4251_v47 }
  0xf5   :  { %v4196_v63 = vpack.c.bf16 %v359_v52, %v358_v51  ;;  %v357_v0 = vmax.f32 %v296_v58, 0.0  ;;  %v627_v51 = vsel %vm612_vm2, %v624_v60, %v626_v11  ;;  %v4262_v58 = vrot.slane %v4222_v20, 1  ;;  %3411 = vmatpush3.bf16.msra.mxu1 %v3949_v44 }
  0xf6   :  { %v3398_v3 = vpop.f32.mrf.mxu0  ;;  %6772 = vst [vmem:[#allocation7_spill] sm:$0xff] %v4257_v49  ;;  %v3584_v53 = vpack.i.bf16 %v629_v40, %v627_v51  ;;  %6773 = vst [vmem:[#allocation8_spill] sm:$0xff] %v4268_v32 }
  0xf7   :  { %v4209_v7 = vpack.c.bf16 %v357_v0, %v356_v62  ;;  %3550 = vrot.lane.b32.xlu0 %v3539_v59, %s3966_s0  ;;  %v362_v21 = vmax.f32 %v3398_v3, 0.0  ;;  %v631_v0 = vsel %vm612_vm2, %v628_v23, %v630_v42  ;;  %v633_v3 = vsel %vm612_vm2, %v630_v42, %v632_v55 }
  0xf8   :  { %v309_v12 = vpop.f32.mrf.mxu0  ;;  %3540 = vrot.lane.b32.xlu1 %v3539_v59, %s3967_s16  ;;  %v561_v43 = vld [vmem:[#allocation2 + $0x30] sm:$0x1]  ;;  %v3579_v23 = vpack.i.bf16 %v4227_v24, %v4213_v9  ;;  %v635_v11 = vsel %vm612_vm2, %v632_v55, %v4262_v58  ;;  %v3599_v42 = vpack.i.bf16 %v631_v0, %v4213_v9  ;;  %v1979_v55 = vld [vmem:[#allocation2 + $0x38] sm:$0x8] }
  0xf9   :  { %v360_v2 = vmax.f32 %v309_v12, 0.0  ;;  %v562_v57 = vunpack.c.l.bf16 %v561_v43  ;;  %v4272_v4 = vld [vmem:[#allocation2 + $0x30] sm:$0x7]  ;;  %v1764_v12 = vrot.slane %v4254_v48, 1  ;;  %v3594_v43 = vpack.i.bf16 %v633_v3, %v631_v0 }
  0xfa   :  { %v3399_v15 = vpop.f32.mrf.mxu0  ;;  %v833_v44 = vunpack.c.l.bf16 %v4272_v4  ;;  %v4319_v4 = vmul.f32 %v4227_v24, %v4111_v56 }
  0xfb   :  { %v363_v22 = vmax.f32 %v3399_v15, 0.0  ;;  %3560 = vrot.lane.b32.xlu0 %v3559_v13, %s3967_s16  ;;  %v4276_v13 = vrot.slane %v4257_v49, 1  ;;  %v4279_v15 = vunpack.c.h.bf16 %v4209_v7  ;;  %v636_v27 = vrot.slane %v562_v57, 1 }
  0xfc   :  { %v312_v25 = vpop.f32.mrf.mxu0  ;;  %3555 = vrot.lane.b32.xlu1 %v3554_v18, %s3966_s0  ;;  %v882_v61 = vrot.slane %v4319_v4, 6 }
  0xfd   :  { %v4234_v31 = vpack.c.bf16 %v363_v22, %v362_v21  ;;  %v361_v35 = vmax.f32 %v312_v25, 0.0  ;;  %v2268_v25 = vld [vmem:[#allocation2 + $0x3c] sm:$0xc]  ;;  %v637_v0 = vsel %vm612_vm2, %v4262_v58, %v636_v27 }
  0xfe   :  { %v3402_v37 = vpop.f32.mrf.mxu0  ;;  %v2281_v51 = vunpack.c.l.bf16 %v2268_v25 }
  0xff   :  { %v4239_v38 = vpack.c.bf16 %v361_v35, %v360_v2  ;;  %3565 = vrot.lane.b32.xlu0 %v3564_v36, %s3966_s0  ;;  %v366_v59 = vmax.f32 %v3402_v37, 0.0  ;;  %v4286_v2 = vunpack.c.l.bf16 %v4196_v63  ;;  %v4288_v35 = vld [vmem:[#allocation2 + $0x34] sm:$0x3]  ;;  %v4291_v37 = vunpack.c.l.bf16 %v4209_v7 }
 0x100   :  { %v325_v45 = vpop.f32.mrf.mxu0  ;;  %3570 = vrot.lane.b32.xlu1 %v3569_v10, %s3967_s16  ;;  %v1204_v36 = vld [vmem:[#allocation2 + $0x34] sm:$0x7]  ;;  %v1766_v7 = vsel %vm612_vm2, %v1764_v12, %v4276_v13  ;;  %v6699_v57 = vunpack.c.l.bf16 %v4288_v35  ;;  %v4323_v12 = vmul.f32 %v4111_v56, %v833_v44  ;;  %v2429_v27 = vrot.slane %v2281_v51, 1 }
 0x101   :  { %v364_v18 = vmax.f32 %v325_v45, 0.0  ;;  %6774 = vst [vmem:[#allocation9_spill] sm:$0xff] %v4291_v37  ;;  %v3604_v45 = vpack.i.bf16 %v633_v3, %v4227_v24  ;;  %v1771_v3 = vrot.slane %v4286_v2, 1 }
 0x102   :  { %v3403_v52 = vpop.f32.mrf.mxu0 }
 0x103   :  { %v367_v62 = vmax.f32 %v3403_v52, 0.0  ;;  %3575 = vrot.lane.b32.xlu0 %v3569_v10, %s3966_s0  ;;  %v3950_v10 = vld [vmem:[%s6691_s5 + $0x18] sm:$0xff]   ;;  %v2432_v52 = vrot.slane %v4279_v15, 1 }
 0x104   :  { %v328_v60 = vpop.f32.mrf.mxu0  ;;  %3585 = vrot.lane.b32.xlu1 %v3584_v53, %s3967_s16  ;;  %3412 = vmatprep.subr.bf16.mxu1 %v3950_v10 }
 0x105   :  { %v3226_v21 = vpack.c.bf16 %v367_v62, %v366_v59  ;;  %v365_v22 = vmax.f32 %v328_v60, 0.0  ;;  %v1205_v59 = vunpack.c.l.bf16 %v1204_v36  ;;  %v4307_v62 = vmul.f32 %v4144_v17, %v4111_v56  ;;  %3413 = vmatpush3.bf16.msra.mxu1 %v3950_v10 }
 0x106   :  { %v1767_v60 = vrot.slane %v4291_v37, 1  ;;  %v1772_v36 = vsel %vm612_vm2, %v2432_v52, %v1771_v3  ;;  %v3614_v10 = vpack.i.bf16 %v637_v0, %v635_v11 }
 0x107   :  { %3308 = vst [vmem:[#allocation2 + $0x68] sm:$0xff] %v3226_v21   ;;  %v3221_v40 = vpack.c.bf16 %v365_v22, %v364_v18  ;;  %3580 = vrot.lane.b32.xlu0 %v3579_v23, %s3967_s16  ;;  %v4326_v18 = vunpack.c.h.bf16 %v4196_v63  ;;  %v4328_v21 = vunpack.c.l.bf16 %v1979_v55  ;;  %v4332_v22 = vmul.f32 %v4219_v19, %v4111_v56 }
 0x108   :  { %3590 = vrot.lane.b32.xlu1 %v3584_v53, %s3966_s0  ;;  %v4311_v53 = vmul.f32 %v4213_v9, %v4111_v56  ;;  %v4343_v63 = vmul.f32 %v4251_v47, %v6699_v57  ;;  %v4346_v55 = vmul.f32 %v4251_v47, %v2281_v51  ;;  %v2431_v0 = vsel %vm612_vm2, %v2429_v27, %v1767_v60 }
 0x109   :  { %v4335_v23 = vunpack.c.h.bf16 %v3221_v40  ;;  %v4337_v25 = vunpack.c.l.bf16 %v3221_v40  ;;  %v4353_v40 = vmul.f32 %v4291_v37, %v4251_v47  ;;  %v1768_v14 = vsel %vm612_vm2, %v4276_v13, %v1767_v60 }
 0x10a   :  { %v4375_v41 = vsel %vm612_vm2, %v1767_v60, %v2432_v52  ;;  %v4380_v26 = vpack.i.bf16 %v1768_v14, %v1766_v7  ;;  %v3952_v52 = vld [vmem:[%s6691_s5 + $0x8] sm:$0xff]   ;;  %v4397_v7 = vunpack.c.l.bf16 %v4234_v31 }
 0x10b   :  { %3595 = vrot.lane.b32.xlu0 %v3594_v43, %s3967_s16  ;;  %v1220_v43 = vrot.slane %v1205_v59, 1  ;;  %v4357_v11 = vpack.i.bf16 %v4337_v25, %v4279_v15  ;;  %v4371_v6 = vpack.i.bf16 %v2431_v0, %v4335_v23  ;;  %6777 = vst [vmem:[#allocation12_spill] sm:$0xff] %v4375_v41  ;;  %v3951_v0 = vld [vmem:[%s6691_s5 + $0x10] sm:$0xff]   ;;  %v1783_v4 = vrot.slane %v4337_v25, 1 }
 0x10c   :  { %3600 = vrot.lane.b32.xlu1 %v3599_v42, %s3966_s0  ;;  %v4349_v42 = vpack.i.bf16 %v4291_v37, %v2281_v51  ;;  %v880_v51 = vrot.slane %v4311_v53, 6  ;;  %v4402_v53 = vpack.i.bf16 %v1772_v36, %v4375_v41  ;;  %3414 = vmatprep.subr.bf16.mxu1 %v3951_v0 }
 0x10d   :  { %6775 = vst [vmem:[#allocation10_spill] sm:$0xff] %v4357_v11  ;;  %6776 = vst [vmem:[#allocation11_spill] sm:$0xff] %v4371_v6  ;;  %v4378_v11 = vunpack.c.h.bf16 %v4234_v31  ;;  %v6779_v6 = vrot.slane %v4326_v18, 1  ;;  %v4413_v31 = vunpack.c.h.bf16 %v4239_v38  ;;  %3415 = vmatpush3.bf16.msra.mxu1 %v3951_v0 }
 0x10e   :  { %v914_v46 = vld [vmem:[#allocation2 + $0x30] ss:$56 sps:$4 sm:$0xff]   ;;  %3416 = vmatprep.subr.bf16.mxu1 %v3952_v52 }
 0x10f   :  { %3610 = vrot.lane.b32.xlu0 %v3614_v10, %s3967_s16  ;;  %v4361_v59 = vunpack.c.l.bf16 %v914_v46  ;;  %v4365_v57 = vunpack.c.h.bf16 %v914_v46  ;;  %v1713_v60 = vld [vmem:[#allocation2 + $0x68] sm:$0x1]  ;;  %v4407_v28 = vsel %vm612_vm2, %v1771_v3, %v6779_v6  ;;  %v6785_v0 = vrot.slane %v4378_v11, 1 }
 0x110   :  { %3605 = vrot.lane.b32.xlu1 %v3604_v45, %s3966_s0  ;;  %v878_v45 = vrot.slane %v4307_v62, 6  ;;  %6780 = vst [vmem:[#allocation14_spill] sm:$0xff] %v4407_v28  ;;  %v1714_v3 = vunpack.c.l.bf16 %v1713_v60  ;;  %v4442_v60 = vsel %vm191_vm0, %v880_v51, %v882_v61 }
 0x111   :  { %v927_v27 = vrot.slane %v4361_v59, 1  ;;  %v4384_v46 = vpack.i.bf16 %v4365_v57, %v4286_v2  ;;  %v4437_v41 = vsel %vm612_vm2, %v6785_v0, %v1783_v4  ;;  %6787 = vst [vmem:[#allocation19_spill] sm:$0xff] %v4442_v60  ;;  %3417 = vmatpush3.bf16.msra.mxu1 %v3952_v52  ;;  %v1128_v60 = vmul.f32 %v4251_v47, %v4106_v54 }
 0x112   :  { %6786 = vst [vmem:[#allocation18_spill] sm:$0xff] %v4437_v41  ;;  %v4508_v54 = vmul.f32 %v4125_v5, %v4251_v47 }
 0x113   :  { %6778 = vst [vmem:[#allocation13_spill] sm:$0xff] %v4384_v46  ;;  %v928_v14 = vsel %vm612_vm2, %v4262_v58, %v927_v27  ;;  %v4410_v46 = vunpack.c.l.bf16 %v4239_v38  ;;  %v3639_v6 = vpack.i.bf16 %v4286_v2, %v927_v27  ;;  %v4428_v38 = vsel %vm191_vm0, %v878_v45, %v880_v51  ;;  %v4462_v51 = vld [vmem:[%s6690_s2] ss:$0 sm:$0xff] }
 0x114   :  { %3615 = vrot.lane.b32.xlu1 %v3614_v10, %s3966_s0  ;;  %v3619_v62 = vpack.i.bf16 %v928_v14, %v833_v44  ;;  %v4418_v44 = vrot.slane %v4335_v23, 1  ;;  %v6782_v10 = vrot.slane %v4185_v50, 6  ;;  %6784 = vst [vmem:[#allocation17_spill] sm:$0xff] %v4428_v38  ;;  %v4432_v58 = vpack.i.bf16 %v4407_v28, %v4326_v18  ;;  %6796 = vst [vmem:[#allocation26_spill] sm:$0xff] %v4508_v54 }
 0x115   :  { %v1787_v38 = vrot.slane %v1714_v3, 1  ;;  %v1221_v0 = vsel %vm612_vm2, %v927_v27, %v1220_v43  ;;  %v884_v28 = vrot.slane %v4332_v22, 6  ;;  %v4475_v27 = vmul.f32 %v4222_v20, %v4462_v51 }
 0x116   :  { %6781 = vst [vmem:[#allocation15_spill] sm:$0xff] %v4418_v44  ;;  %3620 = vrot.lane.b32.xlu0 %v3619_v62, %s3967_s16  ;;  %v4425_v14 = vsel %vm191_vm0, %v6782_v10, %v878_v45  ;;  %v1786_v50 = vsel %vm612_vm2, %v1783_v4, %v4418_v44  ;;  %v4446_v45 = vpack.i.bf16 %v4397_v7, %v1220_v43 }
 0x117   :  { %6783 = vst [vmem:[#allocation16_spill] sm:$0xff] %v4425_v14  ;;  %v4450_v10 = vpack.i.bf16 %v4291_v37, %v4437_v41  ;;  %v4452_v14 = vpack.i.bf16 %v1786_v50, %v1772_v36  ;;  %v4457_v4 = vpack.i.bf16 %v4378_v11, %v4257_v49  ;;  %v1788_v36 = vsel %vm612_vm2, %v4418_v44, %v1787_v38  ;;  %v3953_v38 = vld [vmem:[%s6691_s5] sm:$0xff]  }
 0x118   :  { %3640 = vrot.lane.b32.xlu1 %v3639_v6, %s3967_s16  ;;  %v4471_v43 = vmul.f32 %v4219_v19, %v4462_v51  ;;  %6791 = vst [vmem:[#allocation23_spill] sm:$0xff] %v4475_v27  ;;  %v850_v3 = vmul.f32 %v4222_v20, %v4111_v56  ;;  %v4481_v22 = vmul.f32 %v4413_v31, %v4251_v47 }
 0x119   :  { %6788 = vst [vmem:[#allocation20_spill] sm:$0xff] %v4450_v10  ;;  %6789 = vst [vmem:[#allocation21_spill] sm:$0xff] %v4452_v14  ;;  %v4484_v52 = vpack.i.bf16 %v4326_v18, %v1788_v36  ;;  %v4499_v14 = vpack.i.bf16 %v4413_v31, %v4410_v46  ;;  %3418 = vmatprep.subr.bf16.mxu1 %v3953_v38 }
 0x11a   :  { %3625 = vrot.lane.b32.xlu0 %v3619_v62, %s3966_s0  ;;  %6790 = vst [vmem:[#allocation22_spill] sm:$0xff] %v4471_v43  ;;  %v4487_v62 = vsel %vm191_vm0, %v882_v61, %v884_v28  ;;  %v6794_v43 = vunpack.c.l.bf16 %v4288_v35  ;;  %v886_v36 = vrot.slane %v850_v3, 6  ;;  %v6710_v61 = vrot.slane %v4268_v32, 4  ;;  %3419 = vmatpush3.bf16.msra.mxu1 %v3953_v38  ;;  %v4537_v38 = vld [vmem:[#allocation2 + $0x68] sm:$0x7] }
 0x11b   :  { %6792 = vst [vmem:[#allocation24_spill] sm:$0xff] %v4484_v52  ;;  %6793 = vst [vmem:[#allocation25_spill] sm:$0xff] %v4487_v62  ;;  %v1155_v62 = vrot.slane %v1128_v60, 4  ;;  %v6795_v52 = vrot.slane %v4365_v57, 1  ;;  %v1132_v35 = vmul.f32 %v4128_v8, %v4251_v47  ;;  %v6798_v60 = vrot.slane %v4323_v12, 6 }
 0x11c   :  { %3645 = vrot.lane.b32.xlu1 %v3639_v6, %s3966_s0  ;;  %v3629_v27 = vpack.i.bf16 %v1221_v0, %v6794_v43  ;;  %v4515_v0 = vsel %vm191_vm0, %v884_v28, %v886_v36  ;;  %v6711_v6 = vrot.slane %v4508_v54, 4  ;;  %v4534_v28 = vmul.f32 %v4410_v46, %v4251_v47  ;;  %6802 = vst [vmem:[#allocation31_spill] sm:$0xff] %v4537_v38 }
 0x11d   :  { %v2451_v10 = vsel %vm612_vm2, %v4418_v44, %v6795_v52  ;;  %6797 = vst [vmem:[#allocation27_spill] sm:$0xff] %v4515_v0  ;;  %v4520_v43 = vsel %vm191_vm0, %v886_v36, %v6798_v60  ;;  %v4527_v52 = vsel %vm1154_vm3, %v1155_v62, %v6710_v61  ;;  %v1162_v41 = vrot.slane %v1132_v35, 4 }
 0x11e   :  { %3630 = vrot.lane.b32.xlu0 %v3629_v27, %s3967_s16  ;;  %6799 = vst [vmem:[#allocation28_spill] sm:$0xff] %v4520_v43  ;;  %v4522_v3 = vpack.i.bf16 %v2451_v10, %v1786_v50  ;;  %6801 = vst [vmem:[#allocation30_spill] sm:$0xff] %v4527_v52  ;;  %v4541_v50 = vmul.f32 %v4378_v11, %v4251_v47  ;;  %v1133_v62 = vmul.f32 %v4142_v16, %v4251_v47  ;;  %v4570_v43 = vld [vmem:[#allocation2 + $0x6c] sm:$0x3] }
 0x11f   :  { %v4546_v10 = vsel %vm1154_vm3, %v6711_v6, %v1162_v41  ;;  %v1134_v36 = vmul.f32 %v4144_v17, %v4251_v47  ;;  %v1135_v35 = vmul.f32 %v4213_v9, %v4251_v47  ;;  %v1136_v60 = vmul.f32 %v4227_v24, %v4251_v47  ;;  %6804 = vst [vmem:[#allocation33_spill] sm:$0xff] %v4570_v43 }
 0x120   :  { %6800 = vst [vmem:[#allocation29_spill] sm:$0xff] %v4522_v3  ;;  %3670 = vrot.lane.b32.xlu1 %v4380_v26, %s3967_s16  ;;  %6803 = vst [vmem:[#allocation32_spill] sm:$0xff] %v4546_v10  ;;  %v1137_v61 = vmul.f32 %v4219_v19, %v4251_v47  ;;  %v4561_v6 = vmul.f32 %v4222_v20, %v4251_v47  ;;  %v1164_v10 = vrot.slane %v1133_v62, 4 }
 0x121   :  { %v1166_v0 = vrot.slane %v1134_v36, 4  ;;  %v1168_v52 = vrot.slane %v1135_v35, 4  ;;  %v1170_v3 = vrot.slane %v1136_v60, 4  ;;  %v1993_v36 = vmul.f32 %v4326_v18, %v4111_v56 }
 0x122   :  { %3635 = vrot.lane.b32.xlu0 %v3629_v27, %s3966_s0  ;;  %v4566_v27 = vmul.f32 %v4286_v2, %v4111_v56  ;;  %v1172_v19 = vrot.slane %v1137_v61, 4  ;;  %v1174_v54 = vrot.slane %v4561_v6, 4  ;;  %v4574_v20 = vsel %vm1154_vm3, %v1162_v41, %v1164_v10 }
 0x123   :  { %6805 = vst [vmem:[#allocation34_spill] sm:$0xff] %v4574_v20  ;;  %v4577_v62 = vsel %vm1154_vm3, %v1164_v10, %v1166_v0  ;;  %v4588_v61 = vsel %vm1154_vm3, %v1168_v52, %v1170_v3  ;;  %v2023_v35 = vrot.slane %v1993_v36, 6  ;;  %v1989_v60 = vmul.f32 %v4257_v49, %v4111_v56 }
 0x124   :  { %3675 = vrot.lane.b32.xlu1 %v4380_v26, %s3966_s0  ;;  %6806 = vst [vmem:[#allocation35_spill] sm:$0xff] %v4577_v62  ;;  %v2021_v12 = vrot.slane %v4566_v27, 6  ;;  %v4585_v26 = vsel %vm1154_vm3, %v1166_v0, %v1168_v52  ;;  %6808 = vst [vmem:[#allocation37_spill] sm:$0xff] %v4588_v61  ;;  %v4591_v41 = vsel %vm1154_vm3, %v1170_v3, %v1172_v19  ;;  %v6811_v3 = vrot.slane %v4378_v11, 1 }
 0x125   :  { %6807 = vst [vmem:[#allocation36_spill] sm:$0xff] %v4585_v26  ;;  %6809 = vst [vmem:[#allocation38_spill] sm:$0xff] %v4591_v41  ;;  %v4594_v6 = vsel %vm1154_vm3, %v1172_v19, %v1174_v54  ;;  %v1990_v27 = vmul.f32 %v4291_v37, %v4111_v56  ;;  %v6812_v52 = vrot.slane %v4397_v7, 1  ;;  %v1988_v36 = vmul.f32 %v4111_v56, %v4328_v21 }
 0x126   :  { %3650 = vrot.lane.b32.xlu0 %v4349_v42, %s3967_s16  ;;  %6810 = vst [vmem:[#allocation39_spill] sm:$0xff] %v4594_v6  ;;  %v1996_v10 = vmul.f32 %v4397_v7, %v4111_v56  ;;  %v4616_v6 = vsel %vm191_vm0, %v2021_v12, %v2023_v35  ;;  %v2015_v41 = vrot.slane %v1989_v60, 6  ;;  %v1997_v0 = vmul.f32 %v4378_v11, %v4111_v56 }
 0x127   :  { %v4609_v19 = vsel %vm612_vm2, %v6812_v52, %v6811_v3  ;;  %6813 = vst [vmem:[#allocation40_spill] sm:$0xff] %v4616_v6  ;;  %v2017_v61 = vrot.slane %v1990_v27, 6  ;;  %v6814_v52 = vunpack.c.l.bf16 %v4537_v38  ;;  %v2014_v62 = vrot.slane %v1988_v36, 6 }
 0x128   :  { %3680 = vrot.lane.b32.xlu1 %v4402_v53, %s3967_s16  ;;  %v2029_v20 = vrot.slane %v1996_v10, 6  ;;  %v6815_v37 = vunpack.c.l.bf16 %v4570_v43  ;;  %v2031_v27 = vrot.slane %v1997_v0, 6  ;;  %v1995_v10 = vmul.f32 %v4413_v31, %v4111_v56 }
 0x129   :  { %v2000_v26 = vmul.f32 %v4111_v56, %v6814_v52  ;;  %v4632_v60 = vsel %vm191_vm0, %v2015_v41, %v2017_v61  ;;  %v4639_v3 = vsel %vm191_vm0, %v2014_v62, %v2015_v41  ;;  %v1139_v36 = vmul.f32 %v4251_v47, %v4361_v59 }
 0x12a   :  { %3655 = vrot.lane.b32.xlu0 %v4349_v42, %s3966_s0  ;;  %v4629_v6 = vmul.f32 %v4251_v47, %v6815_v37  ;;  %6816 = vst [vmem:[#allocation41_spill] sm:$0xff] %v4632_v60  ;;  %v1994_v42 = vmul.f32 %v4410_v46, %v4111_v56  ;;  %6817 = vst [vmem:[#allocation42_spill] sm:$0xff] %v4639_v3  ;;  %v2306_v37 = vmul.f32 %v4397_v7, %v4251_v47 }
 0x12b   :  { %v2309_v0 = vmul.f32 %v4335_v23, %v4251_v47  ;;  %v2308_v52 = vmul.f32 %v4337_v25, %v4251_v47  ;;  %v2310_v41 = vmul.f32 %v4251_v47, %v4365_v57  ;;  %v2027_v3 = vrot.slane %v1995_v10, 6 }
 0x12c   :  { %3685 = vrot.lane.b32.xlu1 %v4402_v53, %s3966_s0  ;;  %v4652_v53 = vsel %vm191_vm0, %v2029_v20, %v2031_v27  ;;  %v2025_v62 = vrot.slane %v1994_v42, 6  ;;  %v2338_v60 = vrot.slane %v2306_v37, 4  ;;  %v1176_v49 = vrot.slane %v1139_v36, 4 }
 0x12d   :  { %6818 = vst [vmem:[#allocation43_spill] sm:$0xff] %v4652_v53  ;;  %v2037_v32 = vrot.slane %v2000_v26, 6  ;;  %v2348_v43 = vrot.slane %v4629_v6, 4  ;;  %v1991_v38 = vmul.f32 %v4279_v15, %v4111_v56  ;;  %v4670_v53 = vsel %vm191_vm0, %v2027_v3, %v2029_v20 }
 0x12e   :  { %3660 = vrot.lane.b32.xlu0 %v4432_v58, %s3967_s16  ;;  %v4660_v44 = vsel %vm191_vm0, %v2023_v35, %v2025_v62  ;;  %v4667_v42 = vsel %vm191_vm0, %v2025_v62, %v2027_v3  ;;  %6821 = vst [vmem:[#allocation46_spill] sm:$0xff] %v4670_v53  ;;  %v6822_v10 = vrot.slane %v4481_v22, 4  ;;  %v4678_v6 = vsel %vm1154_vm3, %v1174_v54, %v1176_v49 }
 0x12f   :  { %6819 = vst [vmem:[#allocation44_spill] sm:$0xff] %v4660_v44  ;;  %6820 = vst [vmem:[#allocation45_spill] sm:$0xff] %v4667_v42  ;;  %v6825_v35 = vrot.slane %v4343_v63, 4  ;;  %v1998_v36 = vmul.f32 %v4337_v25, %v4111_v56  ;;  %v1999_v20 = vmul.f32 %v4335_v23, %v4111_v56  ;;  %v2019_v3 = vrot.slane %v1991_v38, 6 }
 0x130   :  { %3690 = vrot.lane.b32.xlu1 %v4446_v45, %s3967_s16  ;;  %v4675_v26 = vsel %vm1154_vm3, %v6822_v10, %v2338_v60  ;;  %6824 = vst [vmem:[#allocation48_spill] sm:$0xff] %v4678_v6  ;;  %v2302_v62 = vmul.f32 %v4286_v2, %v4251_v47  ;;  %v2303_v54 = vmul.f32 %v4326_v18, %v4251_v47  ;;  %v6827_v63 = vrot.slane %v4541_v50, 4 }
 0x131   :  { %6823 = vst [vmem:[#allocation47_spill] sm:$0xff] %v4675_v26  ;;  %v4683_v37 = vsel %vm1154_vm3, %v1176_v49, %v6825_v35  ;;  %v2301_v49 = vmul.f32 %v4279_v15, %v4251_v47  ;;  %v4703_v35 = vsel %vm191_vm0, %v2019_v3, %v2021_v12  ;;  %v2033_v38 = vrot.slane %v1998_v36, 6 }
 0x132   :  { %6826 = vst [vmem:[#allocation49_spill] sm:$0xff] %v4683_v37  ;;  %3665 = vrot.lane.b32.xlu0 %v4432_v58, %s3966_s0  ;;  %v4700_v10 = vsel %vm1154_vm3, %v2338_v60, %v6827_v63  ;;  %6829 = vst [vmem:[#allocation51_spill] sm:$0xff] %v4703_v35  ;;  %v2035_v37 = vrot.slane %v1999_v20, 6  ;;  %v4706_v58 = vsel %vm191_vm0, %v2017_v61, %v2019_v3  ;;  %v2330_v6 = vrot.slane %v2302_v62, 4 }
 0x133   :  { %6828 = vst [vmem:[#allocation50_spill] sm:$0xff] %v4700_v10  ;;  %6830 = vst [vmem:[#allocation52_spill] sm:$0xff] %v4706_v58  ;;  %v2332_v26 = vrot.slane %v2303_v54, 4  ;;  %v2328_v53 = vrot.slane %v2301_v49, 4  ;;  %v2334_v42 = vrot.slane %v4534_v28, 4  ;;  %v4715_v60 = vsel %vm191_vm0, %v2031_v27, %v2033_v38 }
 0x134   :  { %3695 = vrot.lane.b32.xlu1 %v4446_v45, %s3966_s0  ;;  %v4712_v44 = vsel %vm191_vm0, %v2033_v38, %v2035_v37  ;;  %6832 = vst [vmem:[#allocation54_spill] sm:$0xff] %v4715_v60  ;;  %v4718_v12 = vsel %vm191_vm0, %v2035_v37, %v2037_v32  ;;  %v2325_v61 = vrot.slane %v4346_v55, 4  ;;  %v6837_v27 = vrot.slane %v4481_v22, 4 }
 0x135   :  { %6831 = vst [vmem:[#allocation53_spill] sm:$0xff] %v4712_v44  ;;  %6833 = vst [vmem:[#allocation55_spill] sm:$0xff] %v4718_v12  ;;  %v4724_v45 = vsel %vm1154_vm3, %v2330_v6, %v2332_v26  ;;  %v4727_v36 = vsel %vm1154_vm3, %v2328_v53, %v2330_v6  ;;  %v4730_v28 = vsel %vm1154_vm3, %v2332_v26, %v2334_v42  ;;  %v2326_v32 = vrot.slane %v4353_v40, 4 }
 0x136   :  { %3700 = vrot.lane.b32.xlu0 %v4457_v4, %s3967_s16  ;;  %6834 = vst [vmem:[#allocation56_spill] sm:$0xff] %v4724_v45  ;;  %6835 = vst [vmem:[#allocation57_spill] sm:$0xff] %v4727_v36  ;;  %v4735_v20 = vsel %vm1154_vm3, %v2334_v42, %v6837_v27  ;;  %v2342_v55 = vrot.slane %v2308_v52, 4  ;;  %v2344_v37 = vrot.slane %v2309_v0, 4  ;;  %v2346_v3 = vrot.slane %v2310_v41, 4 }
 0x137   :  { %6836 = vst [vmem:[#allocation58_spill] sm:$0xff] %v4730_v28  ;;  %6838 = vst [vmem:[#allocation59_spill] sm:$0xff] %v4735_v20  ;;  %v4741_v62 = vsel %vm1154_vm3, %v2325_v61, %v2326_v32  ;;  %v4744_v6 = vsel %vm1154_vm3, %v2326_v32, %v2328_v53  ;;  %v6841_v26 = vmov %v6827_v63  ;;  %v3724_v40 = vpack.i.bf16 %v4254_v48, %v4609_v19  ;;  %v2374_v61 = vld [vmem:[#allocation2 + $0x6c] sm:$0x7] }
 0x138   :  { %3710 = vrot.lane.b32.xlu1 %v4499_v14, %s3967_s16  ;;  %6839 = vst [vmem:[#allocation60_spill] sm:$0xff] %v4741_v62  ;;  %6840 = vst [vmem:[#allocation61_spill] sm:$0xff] %v4744_v6  ;;  %v4749_v22 = vsel %vm1154_vm3, %v6841_v26, %v2342_v55  ;;  %v4752_v42 = vsel %vm1154_vm3, %v2342_v55, %v2344_v37  ;;  %v4759_v0 = vsel %vm1154_vm3, %v2344_v37, %v2346_v3  ;;  %v2063_v37 = vld [vmem:[#allocation2 + $0x68] sm:$0xf]  ;;  %v6864_v6 = vld [vmem:[#allocation7_spill] sm:$0xff] }
 0x139   :  { %6842 = vst [vmem:[#allocation62_spill] sm:$0xff] %v4749_v22  ;;  %6843 = vst [vmem:[#allocation63_spill] sm:$0xff] %v4752_v42  ;;  %v4762_v52 = vsel %vm1154_vm3, %v2346_v3, %v2348_v43  ;;  %v1775_v50 = vrot.slane %v4410_v46, 1  ;;  %v3729_v53 = vpack.i.bf16 %v4609_v19, %v4378_v11  ;;  %v1777_v54 = vrot.slane %v4413_v31, 1  ;;  %v6855_v42 = vld [vmem:[#allocation33_spill] sm:$0xff]  ;;  %v6857_v22 = vld [vmem:[#allocation14_spill] sm:$0xff] }
 0x13a   :  { %3705 = vrot.lane.b32.xlu0 %v4457_v4, %s3966_s0  ;;  %6844 = vst [vmem:[#allocation64_spill] sm:$0xff] %v4759_v0  ;;  %6845 = vst [vmem:[#allocation65_spill] sm:$0xff] %v4762_v52  ;;  %v6846_v4 = vrot.slane %v4326_v18, 1  ;;  %v6847_v49 = vrot.slane %v4397_v7, 1  ;;  %v842_v27 = vmul.f32 %v4082_v30, %v4111_v56  ;;  %v2375_v55 = vunpack.c.l.bf16 %v2374_v61  ;;  %v6854_v52 = vld [vmem:[#allocation15_spill] sm:$0xff] }
 0x13b   :  { %v1778_v19 = vsel %vm612_vm2, %v1775_v50, %v1777_v54  ;;  %v4802_v56 = vmul.f32 %v4080_v29, %v4462_v51  ;;  %v4819_v29 = vmul.f32 %v4128_v8, %v4462_v51 }
 0x13c   :  { %3725 = vrot.lane.b32.xlu1 %v3724_v40, %s3966_s0  ;;  %v1776_v41 = vsel %vm612_vm2, %v6846_v4, %v1775_v50  ;;  %v3744_v38 = vpack.i.bf16 %v1778_v19, %v4413_v31  ;;  %v870_v26 = vrot.slane %v842_v27, 6  ;;  %v2452_v4 = vrot.slane %v2375_v55, 1 }
 0x13d   :  { %v3739_v43 = vpack.i.bf16 %v4410_v46, %v1776_v41  ;;  %v3769_v3 = vpack.i.bf16 %v1778_v19, %v1776_v41  ;;  %v537_v41 = vmul.f32 %v4086_v33, %v4462_v51  ;;  %v6848_v33 = vrot.slane %v4120_v1, 6 }
 0x13e   :  { %3715 = vrot.lane.b32.xlu0 %v4499_v14, %s3966_s0  ;;  %v1780_v14 = vsel %vm612_vm2, %v1777_v54, %v6847_v49  ;;  %v4815_v49 = vmul.f32 %v4125_v5, %v4462_v51  ;;  %v4836_v5 = vmul.f32 %v4142_v16, %v4462_v51  ;;  %v4843_v1 = vmul.f32 %v4144_v17, %v4462_v51 }
 0x13f   :  { %v3749_v63 = vpack.i.bf16 %v4361_v59, %v1780_v14  ;;  %v3774_v54 = vpack.i.bf16 %v4397_v7, %v1780_v14  ;;  %v1130_v14 = vmul.f32 %v4082_v30, %v4251_v47  ;;  %v4827_v19 = vsel %vm191_vm0, %v6848_v33, %v870_v26 }
 0x140   :  { %3730 = vrot.lane.b32.xlu1 %v3729_v53, %s3967_s16  ;;  %v4851_v27 = vmul.f32 %v4213_v9, %v4462_v51 }
 0x141   :  { %v1158_v9 = vrot.slane %v1130_v14, 4 }
 0x142   :  { %3720 = vrot.lane.b32.xlu0 %v3724_v40, %s3967_s16  ;;  %v2064_v40 = vunpack.c.l.bf16 %v2063_v37 }
 0x144   :  { %3740 = vrot.lane.b32.xlu1 %v3739_v43, %s3967_s16  ;;  %v2076_v8 = vrot.slane %v2064_v40, 1  ;;  %v6851_v40 = vld [vmem:[#allocation12_spill] sm:$0xff] }
 0x145   :  { %v4863_v33 = vpack.i.bf16 %v6851_v40, %v4335_v23  ;;  %v6856_v40 = vunpack.c.l.bf16 %v6855_v42 }
 0x146   :  { %3735 = vrot.lane.b32.xlu0 %v3729_v53, %s3966_s0  ;;  %v4798_v53 = vmul.f32 %v4088_v34, %v4462_v51  ;;  %v2074_v34 = vrot.slane %v4328_v21, 1 }
 0x147   :  { %v4876_v14 = vpack.i.bf16 %v6857_v22, %v6856_v40  ;;  %v6858_v22 = vld [vmem:[#allocation18_spill] sm:$0xff] }
 0x148   :  { %3750 = vrot.lane.b32.xlu1 %v3749_v63, %s3967_s16 }
 0x14a   :  { %3745 = vrot.lane.b32.xlu0 %v3744_v38, %s3967_s16 }
 0x14c   :  { %3755 = vrot.lane.b32.xlu1 %v3739_v43, %s3966_s0  ;;  %v4810_v43 = vmul.f32 %v4082_v30, %v4462_v51  ;;  %v6850_v30 = vrot.slane %v4365_v57, 1  ;;  %v4857_v57 = vld [vmem:[%s6690_s2 + $0x1] ss:$0 sm:$0xff] }
 0x14d   :  { %v4790_v32 = vpop.permute.xlu0 %3480  ;;  %v4794_v59 = vpop.permute.xlu1 %3485 }
 0x14e   :  { %3760 = vrot.lane.b32.xlu0 %v3744_v38, %s3966_s0  ;;  %v2453_v47 = vsel %vm612_vm2, %v6850_v30, %v2452_v4 }
 0x150   :  { %3765 = vrot.lane.b32.xlu1 %v3749_v63, %s3966_s0  ;;  %v6849_v63 = vrot.slane %v4170_v39, 6  ;;  %v4847_v39 = vmul.f32 %v4227_v24, %v4462_v51  ;;  %v2075_v24 = vsel %vm612_vm2, %v2074_v34, %v4276_v13 }
 0x151   :  { %v3491_v50 = vpop.permute.xlu0 %3490  ;;  %v3496_v16 = vpop.permute.xlu1 %3495 }
 0x152   :  { %3770 = vrot.lane.b32.xlu0 %v3769_v3, %s3967_s16  ;;  %v4832_v38 = vsel %vm191_vm0, %v870_v26, %v6849_v63  ;;  %v3493_v55 = vunpack.i.h.bf16 %v3491_v50  ;;  %v3492_v37 = vunpack.i.l.bf16 %v3491_v50  ;;  %v3498_v0 = vunpack.i.h.bf16 %v3496_v16 }
 0x154   :  { %3775 = vrot.lane.b32.xlu1 %v3774_v54, %s3967_s16 }
 0x155   :  { %v3501_v61 = vpop.permute.xlu0 %3500 }
 0x156   :  { %3785 = vrot.lane.b32.xlu0 %v3774_v54, %s3966_s0  ;;  %v3503_v17 = vunpack.i.h.bf16 %v3501_v61  ;;  %v3502_v26 = vunpack.i.l.bf16 %v3501_v61  ;;  %v6852_v54 = vld [vmem:[#allocation31_spill] sm:$0xff]  ;;  %v2077_v61 = vsel %vm612_vm2, %v6854_v52, %v2076_v8  ;;  %v4887_v52 = vld [vmem:[%s6690_s2 + $0x2] ss:$0 sm:$0xff] }
 0x157   :  { %v6853_v63 = vunpack.c.l.bf16 %v6852_v54  ;;  %v4889_v42 = vpack.i.bf16 %v2076_v8, %v2077_v61  ;;  %v3086_v8 = vld [vmem:[%s6690_s2] ss:$0 sm:$0xff] }
 0x158   :  { %3780 = vrot.lane.b32.xlu1 %v3769_v3, %s3966_s0  ;;  %v676_v51 = vsel %vm674_vm4, %v3493_v55, %v3503_v17  ;;  %v675_v50 = vsel %vm674_vm4, %v3492_v37, %v3502_v26  ;;  %v4878_v3 = vpack.i.bf16 %v2452_v4, %v2453_v47  ;;  %v3497_v55 = vunpack.i.l.bf16 %v3496_v16  ;;  %v6859_v47 = vld [vmem:[#allocation8_spill] sm:$0xff] }
 0x159   :  { %v3794_v30 = vpack.i.bf16 %v6853_v63, %v2075_v24  ;;  %v692_v13 = vmul.f32 %v4857_v57, %v675_v50  ;;  %v3506_v34 = vpop.permute.xlu0 %3505  ;;  %v693_v37 = vmul.f32 %v4857_v57, %v676_v51  ;;  %v4893_v4 = vpack.i.bf16 %v4328_v21, %v6858_v22  ;;  %v6861_v22 = vld [vmem:[#allocation26_spill] sm:$0xff] }
 0x15a   :  { %v4880_v17 = vpop.permute.xlu1 %3510  ;;  %v3508_v26 = vunpack.i.h.bf16 %v3506_v34  ;;  %v3507_v24 = vunpack.i.l.bf16 %v3506_v34  ;;  %v6860_v16 = vrot.slane %v6859_v47, 4  ;;  %v6862_v47 = vrot.slane %v6861_v22, 4 }
 0x15b   :  { %3795 = vrot.lane.b32.xlu0 %v3794_v30, %s3966_s0  ;;  %v704_v61 = vadd.f32 %v692_v13, %v537_v41  ;;  %v4917_v41 = vmul.f32 %v4286_v2, %v3086_v8  ;;  %v4920_v62 = vmul.f32 %v6864_v6, %v3086_v8  ;;  %v6866_v2 = vld [vmem:[#allocation13_spill] sm:$0xff]  ;;  %v4939_v6 = vmul.f32 %v4397_v7, %v3086_v8 }
 0x15c   :  { %v4898_v50 = vsel %vm1154_vm3, %v6860_v16, %v1158_v9  ;;  %3790 = vrot.lane.b32.xlu1 %v3794_v30, %s3967_s16  ;;  %v790_v54 = vsel %vm788_vm5, %v3498_v0, %v3508_v26  ;;  %v789_v63 = vsel %vm788_vm5, %v3497_v55, %v3507_v24  ;;  %v4911_v16 = vsel %vm1154_vm3, %v1158_v9, %v6862_v47  ;;  %v4925_v9 = vld [vmem:[%s6690_s2 + $0x4] ss:$0 sm:$0xff] }
 0x15d   :  { %v807_v34 = vmul.f32 %v4887_v52, %v790_v54  ;;  %v806_v21 = vmul.f32 %v4887_v52, %v789_v63  ;;  %v3516_v40 = vpop.permute.xlu0 %3515  ;;  %v705_v30 = vadd.f32 %v693_v37, %v4798_v53  ;;  %6863 = vst [vmem:[#allocation12_spill] sm:$0xff] %v4917_v41  ;;  %6865 = vst [vmem:[#allocation31_spill] sm:$0xff] %v4920_v62  ;;  %v4930_v53 = vld [vmem:[%s6690_s2 + $0x5] ss:$0 sm:$0xff]  ;;  %v3512_v36 = vunpack.i.l.bf16 %v4880_v17 }
 0x15e   :  { %v3521_v0 = vpop.permute.xlu1 %3520  ;;  %v3518_v55 = vunpack.i.h.bf16 %v3516_v40  ;;  %v3517_v26 = vunpack.i.l.bf16 %v3516_v40  ;;  %6868 = vst [vmem:[#allocation33_spill] sm:$0xff] %v4939_v6  ;;  %v4976_v20 = vmul.f32 %v4930_v53, %v790_v54  ;;  %v3483_v54 = vunpack.i.h.bf16 %v4790_v32 }
 0x15f   :  { %3805 = vrot.lane.b32.xlu0 %v4876_v14, %s3967_s16  ;;  %v3523_v13 = vunpack.i.h.bf16 %v3521_v0  ;;  %v3522_v24 = vunpack.i.l.bf16 %v3521_v0  ;;  %v818_v63 = vadd.f32 %v806_v21, %v704_v61  ;;  %v819_v37 = vadd.f32 %v807_v34, %v705_v30  ;;  %v6869_v21 = vld [vmem:[#allocation4_spill] sm:$0xff] }
 0x160   :  { %3800 = vrot.lane.b32.xlu1 %v6866_v2, %s3967_s16  ;;  %v1036_v40 = vsel %vm788_vm5, %v3517_v26, %v3518_v55  ;;  %v4936_v61 = vmul.f32 %v4254_v48, %v3086_v8  ;;  %v4948_v34 = vmul.f32 %v4326_v18, %v3086_v8  ;;  %v4951_v30 = vmul.f32 %v4413_v31, %v3086_v8  ;;  %v4956_v48 = vld [vmem:[%s6690_s2 + $0x8] ss:$0 sm:$0xff]  ;;  %v6872_v55 = vld [vmem:[#allocation3_spill] sm:$0xff]  ;;  %v6874_v31 = vld [vmem:[#allocation9_spill] sm:$0xff] }
 0x161   :  { %v4942_v22 = vadd.f32 %v6869_v21, %v818_v63  ;;  %v1044_v47 = vmul.f32 %v4930_v53, %v1036_v40  ;;  %v4945_v0 = vpop.permute.xlu0 %3530  ;;  %v1332_v7 = vsel %vm788_vm5, %v3522_v24, %v3523_v13  ;;  %v4960_v26 = vadd.f32 %v6872_v55, %v819_v37  ;;  %v6878_v55 = vld [vmem:[#allocation10_spill] sm:$0xff] }
 0x162   :  { %6867 = vst [vmem:[#allocation15_spill] sm:$0xff] %v4936_v61  ;;  %6870 = vst [vmem:[#allocation14_spill] sm:$0xff] %v4948_v34  ;;  %v4962_v63 = vpop.permute.xlu1 %3525  ;;  %v4967_v18 = vmul.f32 %v4410_v46, %v3086_v8  ;;  %v4970_v40 = vmul.f32 %v6874_v31, %v3086_v8  ;;  %v4973_v21 = vmul.f32 %v4925_v9, %v676_v51  ;;  %v3488_v37 = vunpack.i.h.bf16 %v4794_v59  ;;  %v5012_v46 = vld [vmem:[%s6690_s2 + $0x7] ss:$0 sm:$0xff] }
 0x163   :  { %6871 = vst [vmem:[#allocation18_spill] sm:$0xff] %v4951_v30  ;;  %3815 = vrot.lane.b32.xlu0 %v4863_v33, %s3967_s16  ;;  %v4979_v13 = vmul.f32 %v4378_v11, %v3086_v8  ;;  %v4982_v24 = vmul.f32 %v4279_v15, %v3086_v8  ;;  %v4989_v31 = vmul.f32 %v4337_v25, %v3086_v8  ;;  %v3482_v11 = vunpack.i.l.bf16 %v4790_v32 }
 0x164   :  { %6873 = vst [vmem:[#allocation8_spill] sm:$0xff] %v4967_v18  ;;  %6875 = vst [vmem:[#allocation26_spill] sm:$0xff] %v4970_v40  ;;  %3810 = vrot.lane.b32.xlu1 %v6878_v55, %s3967_s16  ;;  %v4992_v51 = vmul.f32 %v4335_v23, %v3086_v8  ;;  %v4997_v15 = vmul.f32 %v4956_v48, %v1332_v7  ;;  %v1070_v28 = vrot.slane %v1044_v47, 6  ;;  %v973_v8 = vrot.slane %v4973_v21, 6 }
 0x165   :  { %6876 = vst [vmem:[#allocation7_spill] sm:$0xff] %v4979_v13  ;;  %6877 = vst [vmem:[#allocation13_spill] sm:$0xff] %v4982_v24  ;;  %v3546_v12 = vpop.permute.xlu0 %3545  ;;  %v6720_v32 = vrot.slane %v4976_v20, 6 }
 0x166   :  { %6879 = vst [vmem:[#allocation4_spill] sm:$0xff] %v4989_v31  ;;  %6880 = vst [vmem:[#allocation3_spill] sm:$0xff] %v4992_v51  ;;  %v5001_v45 = vpop.permute.xlu1 %3535  ;;  %v3548_v23 = vunpack.i.h.bf16 %v3546_v12  ;;  %v3547_v25 = vunpack.i.l.bf16 %v3546_v12 }
 0x167   :  { %3825 = vrot.lane.b32.xlu0 %v4863_v33, %s3966_s0  ;;  %v3537_v47 = vunpack.i.l.bf16 %v5001_v45  ;;  %v5024_v7 = vsel %vm191_vm0, %v1070_v28, %v6720_v32 }
 0x168   :  { %3820 = vrot.lane.b32.xlu1 %v6878_v55, %s3966_s0  ;;  %v938_v12 = vsel %vm674_vm4, %v3548_v23, %v3512_v36  ;;  %v6881_v23 = vld [vmem:[#allocation11_spill] sm:$0xff] }
 0x169   :  { %v946_v60 = vmul.f32 %v4925_v9, %v938_v12  ;;  %v679_v51 = vsel %vm674_vm4, %v3537_v47, %v3547_v25  ;;  %v3551_v58 = vpop.permute.xlu0 %3550 }
 0x16a   :  { %v696_v10 = vmul.f32 %v4857_v57, %v679_v51  ;;  %v5030_v33 = vmul.f32 %v4925_v9, %v679_v51  ;;  %v5033_v35 = vmul.f32 %v5012_v46, %v679_v51  ;;  %v3541_v36 = vpop.permute.xlu1 %3540  ;;  %v3553_v21 = vunpack.i.h.bf16 %v3551_v58 }
 0x16b   :  { %3835 = vrot.lane.b32.xlu0 %v6881_v23, %s3967_s16  ;;  %v972_v32 = vrot.slane %v946_v60, 6  ;;  %v3543_v12 = vunpack.i.h.bf16 %v3541_v36  ;;  %v3542_v44 = vunpack.i.l.bf16 %v3541_v36  ;;  %v3552_v24 = vunpack.i.l.bf16 %v3551_v58 }
 0x16c   :  { %v5039_v25 = vadd.f32 %v696_v10, %v4815_v49  ;;  %3830 = vrot.lane.b32.xlu1 %v6878_v55, %s3967_s16  ;;  %v792_v51 = vsel %vm788_vm5, %v3488_v37, %v3553_v21 }
 0x16d   :  { %v974_v31 = vsel %vm191_vm0, %v972_v32, %v973_v8  ;;  %v678_v28 = vsel %vm674_vm4, %v3483_v54, %v3543_v12  ;;  %v677_v60 = vsel %vm674_vm4, %v3482_v11, %v3542_v44  ;;  %v3561_v36 = vpop.permute.xlu0 %3560  ;;  %v809_v40 = vmul.f32 %v4887_v52, %v792_v51 }
 0x16e   :  { %v695_v10 = vmul.f32 %v4857_v57, %v678_v28  ;;  %v949_v49 = vmul.f32 %v4925_v9, %v678_v28  ;;  %v5052_v47 = vmul.f32 %v5012_v46, %v678_v28  ;;  %v3556_v37 = vpop.permute.xlu1 %3555  ;;  %v694_v58 = vmul.f32 %v4857_v57, %v677_v60 }
 0x16f   :  { %3845 = vrot.lane.b32.xlu0 %v6881_v23, %s3966_s0  ;;  %v948_v54 = vmul.f32 %v4925_v9, %v677_v60  ;;  %v5060_v44 = vmul.f32 %v5012_v46, %v677_v60  ;;  %v1047_v11 = vmul.f32 %v4930_v53, %v792_v51  ;;  %v5064_v32 = vadd.f32 %v974_v31, %v4942_v22  ;;  %v6884_v23 = vld [vmem:[#allocation20_spill] sm:$0xff] }
 0x170   :  { %v707_v21 = vadd.f32 %v695_v10, %v4810_v43  ;;  %v977_v28 = vrot.slane %v949_v49, 6  ;;  %v5068_v12 = vmul.f32 %v4956_v48, %v792_v51  ;;  %3840 = vrot.lane.b32.xlu1 %v6878_v55, %s3966_s0  ;;  %v706_v13 = vadd.f32 %v694_v58, %v4802_v56 }
 0x171   :  { %v975_v60 = vrot.slane %v948_v54, 6  ;;  %v5075_v18 = vpop.permute.xlu0 %3565  ;;  %v6882_v22 = vrot.slane %v5030_v33, 6  ;;  %v1075_v31 = vrot.slane %v1047_v11, 6  ;;  %v6883_v51 = vunpack.i.l.bf16 %v4794_v59 }
 0x172   :  { %v821_v49 = vadd.f32 %v809_v40, %v707_v21  ;;  %v5083_v55 = vpop.permute.xlu1 %3570  ;;  %v3558_v40 = vunpack.i.h.bf16 %v3556_v37  ;;  %v3557_v11 = vunpack.i.l.bf16 %v3556_v37  ;;  %v3562_v58 = vunpack.i.l.bf16 %v3561_v36  ;;  %v6885_v37 = vld [vmem:[#allocation24_spill] sm:$0xff] }
 0x173   :  { %v980_v43 = vsel %vm191_vm0, %v977_v28, %v6882_v22  ;;  %v791_v10 = vsel %vm788_vm5, %v6883_v51, %v3552_v24  ;;  %3855 = vrot.lane.b32.xlu0 %v6884_v23, %s3967_s16  ;;  %v5088_v56 = vsel %vm191_vm0, %v973_v8, %v975_v60  ;;  %v3563_v51 = vunpack.i.h.bf16 %v3561_v36 }
 0x174   :  { %v808_v54 = vmul.f32 %v4887_v52, %v791_v10  ;;  %v5093_v22 = vmul.f32 %v4930_v53, %v791_v10  ;;  %v905_v59 = vadd.f32 %v4832_v38, %v821_v49  ;;  %v5097_v24 = vmul.f32 %v4956_v48, %v791_v10  ;;  %3850 = vrot.lane.b32.xlu1 %v4878_v3, %s3967_s16 }
 0x175   :  { %v5102_v30 = vpop.permute.xlu0 %3575  ;;  %v978_v34 = vsel %vm191_vm0, %v975_v60, %v977_v28  ;;  %v793_v10 = vsel %vm788_vm5, %v3557_v11, %v3558_v40  ;;  %v6889_v11 = vld [vmem:[#allocation21_spill] sm:$0xff] }
 0x176   :  { %v820_v21 = vadd.f32 %v808_v54, %v706_v13  ;;  %v6721_v8 = vrot.slane %v5093_v22, 6  ;;  %v1012_v6 = vadd.f32 %v980_v43, %v905_v59  ;;  %v3586_v49 = vpop.permute.xlu1 %3585  ;;  %v810_v13 = vmul.f32 %v4887_v52, %v793_v10 }
 0x177   :  { %3865 = vrot.lane.b32.xlu0 %v6885_v37, %s3967_s16  ;;  %v5112_v54 = vmul.f32 %v4930_v53, %v793_v10  ;;  %v5119_v60 = vmul.f32 %v4956_v48, %v793_v10  ;;  %v6887_v43 = vunpack.i.h.bf16 %v5001_v45 }
 0x178   :  { %v904_v61 = vadd.f32 %v4827_v19, %v820_v21  ;;  %v1076_v28 = vsel %vm191_vm0, %v6721_v8, %v1075_v31  ;;  %v6888_v19 = vunpack.i.h.bf16 %v4880_v17  ;;  %3860 = vrot.lane.b32.xlu1 %v6889_v11, %s3967_s16  ;;  %v822_v38 = vadd.f32 %v810_v13, %v5039_v25  ;;  %v6891_v25 = vld [vmem:[#allocation5_spill] sm:$0xff] }
 0x179   :  { %6886 = vst [vmem:[#allocation9_spill] sm:$0xff] %v5119_v60  ;;  %v680_v59 = vsel %vm674_vm4, %v6887_v43, %v3563_v51  ;;  %v1077_v36 = vrot.slane %v5112_v54, 6  ;;  %v5132_v10 = vpop.permute.xlu0 %3580  ;;  %v6895_v43 = vunpack.i.l.bf16 %v4962_v63 }
 0x17a   :  { %v1231_v40 = vsel %vm674_vm4, %v6888_v19, %v3562_v58  ;;  %v1011_v21 = vadd.f32 %v978_v34, %v904_v61  ;;  %v697_v8 = vmul.f32 %v4857_v57, %v680_v59  ;;  %v5135_v45 = vmul.f32 %v4925_v9, %v680_v59  ;;  %v5144_v61 = vpop.permute.xlu1 %3590 }
 0x17b   :  { %v5138_v51 = vmul.f32 %v5012_v46, %v680_v59  ;;  %v5141_v17 = vmul.f32 %v5012_v46, %v1231_v40  ;;  %3870 = vrot.lane.b32.xlu0 %v6884_v23, %s3966_s0  ;;  %v906_v13 = vadd.f32 %v6891_v25, %v822_v38  ;;  %v1078_v54 = vsel %vm191_vm0, %v1075_v31, %v1077_v36 }
 0x17c   :  { %v5148_v34 = vadd.f32 %v1076_v28, %v1011_v21  ;;  %v5153_v59 = vadd.f32 %v1078_v54, %v1012_v6  ;;  %v709_v19 = vadd.f32 %v697_v8, %v4819_v29  ;;  %v981_v40 = vrot.slane %v5135_v45, 6  ;;  %3880 = vrot.lane.b32.xlu1 %v6889_v11, %s3966_s0  ;;  %v5165_v6 = vld [vmem:[%s6691_s5 + $0x38] sm:$0xff]  }
 0x17d   :  { %6890 = vst [vmem:[#allocation10_spill] sm:$0xff] %v5138_v51  ;;  %v3568_v23 = vunpack.i.h.bf16 %v5075_v18  ;;  %v3567_v28 = vunpack.i.l.bf16 %v5075_v18  ;;  %v3588_v38 = vunpack.i.h.bf16 %v3586_v49  ;;  %v3587_v21 = vunpack.i.l.bf16 %v3586_v49  ;;  %6892 = vst [vmem:[#allocation11_spill] sm:$0xff] %v5165_v6  ;;  %v5177_v18 = vpop.permute.xlu0 %3595  ;;  %3432 = vmatprep.subr.bf16.mxu0 %v5165_v6  ;;  %3460 = vmatprep.subr.bf16.mxu1 %v5165_v6 }
 0x17e   :  { %v6893_v29 = vrot.slane %v5030_v33, 6  ;;  %v3593_v11 = vunpack.i.h.bf16 %v5144_v61  ;;  %v5173_v25 = vpop.permute.xlu1 %3600  ;;  %v6894_v33 = vunpack.i.h.bf16 %v4962_v63  ;;  %v5200_v63 = vld [vmem:[%s6691_s5 + $0x30] sm:$0xff]   ;;  %3433 = vmatpush3.bf16.msra.mxu0 %v5165_v6 }
 0x17f   :  { %3875 = vrot.lane.b32.xlu0 %v4893_v4, %s3967_s16  ;;  %v794_v54 = vsel %vm788_vm5, %v3567_v28, %v3568_v23  ;;  %v681_v58 = vsel %vm674_vm4, %v6895_v43, %v3587_v21  ;;  %6897 = vst [vmem:[#allocation24_spill] sm:$0xff] %v5200_v63  ;;  %3434 = vmatprep.subr.bf16.mxu0 %v5200_v63 }
 0x180   :  { %v982_v31 = vsel %vm191_vm0, %v6893_v29, %v981_v40  ;;  %v682_v29 = vsel %vm674_vm4, %v6894_v33, %v3588_v38  ;;  %v811_v8 = vmul.f32 %v4887_v52, %v794_v54  ;;  %v5189_v45 = vmul.f32 %v4930_v53, %v794_v54  ;;  %3890 = vrot.lane.b32.xlu1 %v4889_v42, %s3967_s16 }
 0x181   :  { %v1013_v49 = vadd.f32 %v982_v31, %v906_v13  ;;  %v5192_v62 = vmul.f32 %v4956_v48, %v794_v54  ;;  %v699_v13 = vmul.f32 %v4857_v57, %v682_v29  ;;  %v5203_v43 = vmul.f32 %v4925_v9, %v682_v29 }
 0x182   :  { %v5206_v23 = vmul.f32 %v5012_v46, %v682_v29  ;;  %v698_v28 = vmul.f32 %v4857_v57, %v681_v58  ;;  %v952_v38 = vmul.f32 %v4925_v9, %v681_v58  ;;  %v823_v21 = vadd.f32 %v811_v8, %v709_v19  ;;  %v5214_v41 = vpop.permute.xlu1 %3605  ;;  %v6899_v8 = vld [vmem:[#allocation6_spill] sm:$0xff]  ;;  %3435 = vmatpush3.bf16.msra.mxu0 %v5200_v63 }
 0x183   :  { %6896 = vst [vmem:[#allocation20_spill] sm:$0xff] %v5192_v62  ;;  %v6728_v31 = vrot.slane %v5189_v45, 6  ;;  %3885 = vrot.lane.b32.xlu0 %v6885_v37, %s3966_s0  ;;  %v711_v29 = vadd.f32 %v699_v13, %v4843_v1  ;;  %v6729_v60 = vrot.slane %v5203_v43, 6  ;;  %v5228_v62 = vmul.f32 %v5012_v46, %v681_v58  ;;  %v5235_v13 = vpop.permute.xlu0 %3610  ;;  %v5246_v58 = vld [vmem:[%s6691_s5 + $0x28] sm:$0xff]  }
 0x184   :  { %6898 = vst [vmem:[#allocation21_spill] sm:$0xff] %v5206_v23  ;;  %v983_v19 = vrot.slane %v952_v38, 6  ;;  %v907_v54 = vadd.f32 %v6899_v8, %v823_v21  ;;  %v6900_v37 = vunpack.i.h.bf16 %v4945_v0  ;;  %3895 = vrot.lane.b32.xlu1 %v4893_v4, %s3966_s0  ;;  %v710_v21 = vadd.f32 %v698_v28, %v4836_v5  ;;  %6901 = vst [vmem:[#allocation5_spill] sm:$0xff] %v5246_v58  ;;  %v6903_v28 = vld [vmem:[#allocation29_spill] sm:$0xff] }
 0x185   :  { %v1080_v33 = vsel %vm191_vm0, %v1077_v36, %v6728_v31  ;;  %v3583_v31 = vunpack.i.h.bf16 %v5132_v10  ;;  %3436 = vmatprep.subr.bf16.mxu0 %v5246_v58 }
 0x186   :  { %v796_v1 = vsel %vm788_vm5, %v6900_v37, %v3593_v11  ;;  %v5237_v38 = vadd.f32 %v1080_v33, %v1013_v49  ;;  %v984_v8 = vsel %vm191_vm0, %v981_v40, %v983_v19  ;;  %v986_v4 = vsel %vm191_vm0, %v983_v19, %v6729_v60  ;;  %v5255_v40 = vpop.permute.xlu1 %3615  ;;  %3437 = vmatpush3.bf16.msra.mxu0 %v5246_v58 }
 0x187   :  { %v813_v36 = vmul.f32 %v4887_v52, %v796_v1  ;;  %v1014_v11 = vadd.f32 %v984_v8, %v907_v54  ;;  %v1051_v49 = vmul.f32 %v4930_v53, %v796_v1  ;;  %v5253_v5 = vmul.f32 %v4956_v48, %v796_v1  ;;  %3910 = vrot.lane.b32.xlu0 %v6903_v28, %s3967_s16 }
 0x188   :  { %v3592_v37 = vunpack.i.l.bf16 %v5144_v61  ;;  %v3582_v19 = vunpack.i.l.bf16 %v5132_v10  ;;  %v3603_v1 = vunpack.i.h.bf16 %v5173_v25  ;;  %v3602_v8 = vunpack.i.l.bf16 %v5173_v25  ;;  %3900 = vrot.lane.b32.xlu1 %v4889_v42, %s3966_s0  ;;  %v5268_v60 = vpop.permute.xlu0 %3620 }
 0x189   :  { %6902 = vst [vmem:[#allocation6_spill] sm:$0xff] %v5253_v5  ;;  %v825_v51 = vadd.f32 %v813_v36, %v711_v29  ;;  %v1083_v54 = vrot.slane %v1051_v49, 6  ;;  %v6904_v61 = vunpack.i.l.bf16 %v4945_v0  ;;  %v6905_v36 = vld [vmem:[#allocation17_spill] sm:$0xff]  ;;  %v3598_v10 = vunpack.i.h.bf16 %v5177_v18 }
 0x18a   :  { %v797_v33 = vsel %vm788_vm5, %v3602_v8, %v3603_v1  ;;  %v5285_v5 = vpop.permute.xlu1 %3640 }
 0x18b   :  { %v795_v29 = vsel %vm788_vm5, %v6904_v61, %v3592_v37  ;;  %v5275_v63 = vadd.f32 %v6905_v36, %v825_v51  ;;  %3915 = vrot.lane.b32.xlu0 %v6903_v28, %s3966_s0  ;;  %v5290_v0 = vmul.f32 %v4930_v53, %v797_v33  ;;  %v5293_v51 = vmul.f32 %v4956_v48, %v797_v33 }
 0x18c   :  { %v812_v25 = vmul.f32 %v4887_v52, %v795_v29  ;;  %v1050_v49 = vmul.f32 %v4930_v53, %v795_v29  ;;  %v5282_v42 = vmul.f32 %v4956_v48, %v795_v29  ;;  %v684_v37 = vsel %vm674_vm4, %v3583_v31, %v3598_v10  ;;  %3905 = vrot.lane.b32.xlu1 %v6866_v2, %s3966_s0  ;;  %v5301_v28 = vpop.permute.xlu0 %3625 }
 0x18d   :  { %6906 = vst [vmem:[#allocation29_spill] sm:$0xff] %v5293_v51  ;;  %v3597_v61 = vunpack.i.l.bf16 %v5177_v18  ;;  %v814_v58 = vmul.f32 %v4887_v52, %v797_v33  ;;  %v701_v1 = vmul.f32 %v4857_v57, %v684_v37  ;;  %v1085_v23 = vrot.slane %v5290_v0, 6  ;;  %v6907_v18 = vld [vmem:[#allocation16_spill] sm:$0xff] }
 0x18e   :  { %v824_v36 = vadd.f32 %v812_v25, %v710_v21  ;;  %v1081_v29 = vrot.slane %v1050_v49, 6  ;;  %v5307_v31 = vmul.f32 %v4925_v9, %v684_v37  ;;  %v6908_v33 = vrot.slane %v5189_v45, 6  ;;  %v5317_v49 = vpop.permute.xlu1 %3645 }
 0x18f   :  { %v5315_v2 = vmul.f32 %v5012_v46, %v684_v37  ;;  %3920 = vrot.lane.b32.xlu0 %v4876_v14, %s3966_s0  ;;  %v5324_v6 = vsel %vm191_vm0, %v1083_v54, %v1085_v23  ;;  %v3608_v37 = vunpack.i.h.bf16 %v5214_v41 }
 0x190   :  { %v908_v21 = vadd.f32 %v6907_v18, %v824_v36  ;;  %v1082_v10 = vsel %vm191_vm0, %v6908_v33, %v1081_v29  ;;  %v1084_v25 = vsel %vm191_vm0, %v1081_v29, %v1083_v54  ;;  %v713_v36 = vadd.f32 %v701_v1, %v4847_v39  ;;  %3925 = vrot.lane.b32.xlu1 %v4878_v3, %s3966_s0  ;;  %v5333_v14 = vpop.permute.xlu0 %3630 }
 0x191   :  { %6909 = vst [vmem:[#allocation17_spill] sm:$0xff] %v5315_v2  ;;  %v5321_v0 = vadd.f32 %v1082_v10, %v1014_v11  ;;  %v683_v29 = vsel %vm674_vm4, %v3582_v19, %v3597_v61  ;;  %v3607_v33 = vunpack.i.l.bf16 %v5214_v41  ;;  %v3617_v61 = vunpack.i.l.bf16 %v5255_v40 }
 0x192   :  { %v1015_v18 = vadd.f32 %v986_v4, %v908_v21  ;;  %v700_v11 = vmul.f32 %v4857_v57, %v683_v29  ;;  %v954_v54 = vmul.f32 %v4925_v9, %v683_v29  ;;  %v5338_v39 = vmul.f32 %v5012_v46, %v683_v29  ;;  %v5346_v3 = vpop.permute.xlu1 %3670 }
 0x193   :  { %v3618_v4 = vunpack.i.h.bf16 %v5255_v40  ;;  %v798_v41 = vsel %vm788_vm5, %v3607_v33, %v3608_v37  ;;  %v3613_v29 = vunpack.i.h.bf16 %v5235_v13  ;;  %v6912_v40 = vunpack.i.l.bf16 %v5102_v30 }
 0x194   :  { %6910 = vst [vmem:[#allocation16_spill] sm:$0xff] %v5338_v39  ;;  %v5341_v1 = vadd.f32 %v1084_v25, %v1015_v18  ;;  %v712_v21 = vadd.f32 %v700_v11, %v4851_v27  ;;  %v987_v10 = vrot.slane %v954_v54, 6  ;;  %v815_v8 = vmul.f32 %v4887_v52, %v798_v41  ;;  %v5361_v19 = vpop.permute.xlu0 %3635 }
 0x195   :  { %v1053_v45 = vmul.f32 %v4930_v53, %v798_v41  ;;  %v5353_v25 = vmul.f32 %v4956_v48, %v798_v41  ;;  %v6911_v18 = vunpack.i.h.bf16 %v5102_v30  ;;  %v799_v33 = vsel %vm788_vm5, %v6912_v40, %v3617_v61  ;;  %v5370_v41 = vld [vmem:[%s6691_s5 + $0x20] sm:$0xff]   ;;  %v6916_v40 = vld [vmem:[#allocation19_spill] sm:$0xff] }
 0x196   :  { %v826_v27 = vadd.f32 %v814_v58, %v712_v21  ;;  %v6913_v11 = vrot.slane %v5203_v43, 6  ;;  %v827_v2 = vadd.f32 %v815_v8, %v713_v36  ;;  %6914 = vst [vmem:[#allocation66_spill] sm:$0xff] %v5370_v41  ;;  %v5379_v21 = vpop.permute.xlu1 %3675  ;;  %v6917_v8 = vld [vmem:[#allocation25_spill] sm:$0xff]  ;;  %v5385_v39 = vmul.f32 %v4930_v53, %v799_v33  ;;  %3438 = vmatprep.subr.bf16.mxu0 %v5370_v41 }
 0x197   :  { %v800_v37 = vsel %vm788_vm5, %v6911_v18, %v3618_v4  ;;  %v6915_v4 = vrot.slane %v5307_v31, 6  ;;  %v1087_v58 = vrot.slane %v1053_v45, 6  ;;  %v6918_v45 = vunpack.i.h.bf16 %v5083_v55  ;;  %3439 = vmatpush3.bf16.msra.mxu0 %v5370_v41 }
 0x198   :  { %v988_v54 = vsel %vm191_vm0, %v6913_v11, %v987_v10  ;;  %v910_v11 = vadd.f32 %v6916_v40, %v826_v27  ;;  %v911_v36 = vadd.f32 %v6917_v8, %v827_v2  ;;  %v817_v51 = vmul.f32 %v4887_v52, %v800_v37 }
 0x199   :  { %v990_v18 = vsel %vm191_vm0, %v987_v10, %v6915_v4  ;;  %v5376_v61 = vadd.f32 %v988_v54, %v5275_v63  ;;  %v1088_v10 = vsel %vm191_vm0, %v1085_v23, %v1087_v58  ;;  %v5390_v63 = vmul.f32 %v4956_v48, %v799_v33  ;;  %v5396_v4 = vpop.permute.xlu0 %3650 }
 0x19a   :  { %v686_v54 = vsel %vm674_vm4, %v6918_v45, %v3613_v29  ;;  %v3612_v27 = vunpack.i.l.bf16 %v5235_v13  ;;  %v1017_v2 = vadd.f32 %v990_v18, %v910_v11  ;;  %v1010_v23 = vadd.f32 %v5088_v56, %v4960_v26  ;;  %v5410_v41 = vpop.permute.xlu1 %3680  ;;  %v6920_v11 = vld [vmem:[#allocation23_spill] sm:$0xff] }
 0x19b   :  { %v703_v40 = vmul.f32 %v4857_v57, %v686_v54  ;;  %v816_v8 = vmul.f32 %v4887_v52, %v799_v33  ;;  %v6919_v29 = vunpack.i.l.bf16 %v5083_v55  ;;  %v1107_v45 = vadd.f32 %v5024_v7, %v5064_v32  ;;  %v6923_v32 = vld [vmem:[#allocation30_spill] sm:$0xff] }
 0x19c   :  { %v5412_v18 = vadd.f32 %v1088_v10, %v1017_v2  ;;  %v6921_v26 = vrot.slane %v5093_v22, 6  ;;  %v6922_v52 = vrot.slane %v4976_v20, 6  ;;  %v6925_v20 = vld [vmem:[#allocation22_spill] sm:$0xff] }
 0x19d   :  { %v685_v13 = vsel %vm674_vm4, %v6919_v29, %v3612_v27  ;;  %v715_v54 = vadd.f32 %v703_v40, %v6920_v11  ;;  %v1192_v10 = vadd.f32 %v6923_v32, %v1107_v45  ;;  %v5428_v2 = vpop.permute.xlu0 %3655  ;;  %v6924_v40 = vrot.slane %v5385_v39, 6 }
 0x19e   :  { %v702_v37 = vmul.f32 %v4857_v57, %v685_v13  ;;  %v1074_v56 = vsel %vm191_vm0, %v6922_v52, %v6921_v26  ;;  %v5422_v33 = vmul.f32 %v4925_v9, %v685_v13  ;;  %v5425_v27 = vmul.f32 %v5012_v46, %v685_v13 }
 0x19f   :  { %v1108_v7 = vadd.f32 %v1074_v56, %v1010_v23  ;;  %v5433_v57 = vsel %vm191_vm0, %v1087_v58, %v6924_v40  ;;  %v829_v22 = vadd.f32 %v817_v51, %v715_v54  ;;  %v6926_v11 = vrot.slane %v5060_v44, 4  ;;  %v5448_v51 = vpop.permute.xlu1 %3685  ;;  %v5462_v44 = vld [vmem:[%s6692_s3] ss:$0 sm:$0xff] }
 0x1a0   :  { %v714_v29 = vadd.f32 %v702_v37, %v6925_v20  ;;  %v6927_v26 = vrot.slane %v5141_v17, 4  ;;  %v991_v23 = vrot.slane %v5422_v33, 6  ;;  %v6928_v52 = vrot.slane %v5052_v47, 4  ;;  %v6930_v37 = vld [vmem:[#allocation28_spill] sm:$0xff] }
 0x1a1   :  { %v1193_v45 = vadd.f32 %v4898_v50, %v1108_v7  ;;  %v6929_v56 = vmov %v6926_v11  ;;  %v5451_v54 = vadd.f32 %v6930_v37, %v829_v22  ;;  %v6931_v20 = vrot.slane %v5097_v24, 4  ;;  %v5482_v24 = vld [vmem:[%s6693_s4] ss:$0 sm:$0xff] }
 0x1a2   :  { %v1267_v13 = vsel %vm1154_vm3, %v6927_v26, %v6926_v11  ;;  %v1269_v58 = vsel %vm1154_vm3, %v6929_v56, %v6928_v52  ;;  %v828_v40 = vadd.f32 %v816_v8, %v714_v29  ;;  %v6932_v11 = vrot.slane %v4997_v15, 4  ;;  %v6935_v15 = vld [vmem:[#allocation27_spill] sm:$0xff] }
 0x1a3   :  { %v1302_v32 = vadd.f32 %v1267_v13, %v1192_v10  ;;  %v1303_v7 = vadd.f32 %v1269_v58, %v1193_v45  ;;  %v6933_v10 = vrot.slane %v5068_v12, 4  ;;  %v6934_v22 = vmov %v6931_v20  ;;  %v5471_v13 = vpop.permute.xlu0 %3660  ;;  %v6937_v58 = vld [vmem:[#allocation32_spill] sm:$0xff] }
 0x1a4   :  { %v1368_v50 = vsel %vm1154_vm3, %v6932_v11, %v6931_v20  ;;  %v1194_v26 = vadd.f32 %v4911_v16, %v5148_v34  ;;  %v912_v52 = vadd.f32 %v6935_v15, %v828_v40  ;;  %v6936_v56 = vrot.slane %v5307_v31, 6  ;;  %v5494_v31 = vld [vmem:[%s6691_s5 + $0x18] sm:$0xff]   ;;  %v6940_v11 = vld [vmem:[#allocation10_spill] sm:$0xff]  ;;  %v5502_v15 = vpop.permute.xlu1 %3690 }
 0x1a5   :  { %v1370_v8 = vsel %vm1154_vm3, %v6934_v22, %v6933_v10  ;;  %v1403_v29 = vadd.f32 %v1368_v50, %v1302_v32  ;;  %v1195_v32 = vadd.f32 %v6937_v58, %v5153_v59  ;;  %v6938_v16 = vrot.slane %v5033_v35, 4  ;;  %v6943_v58 = vld [vmem:[#allocation9_spill] sm:$0xff]  ;;  %3440 = vmatprep.subr.bf16.mxu0 %v5494_v31 }
 0x1a6   :  { %v992_v45 = vsel %vm191_vm0, %v6936_v56, %v991_v23  ;;  %v6939_v34 = vrot.slane %v5052_v47, 4  ;;  %v1404_v40 = vadd.f32 %v1370_v8, %v1303_v7  ;;  %v6941_v50 = vrot.slane %v6940_v11, 4  ;;  %3441 = vmatpush3.bf16.msra.mxu0 %v5494_v31 }
 0x1a7   :  { %v1422_v20 = vmul.f32 %v5462_v44, %v1403_v29  ;;  %v6942_v10 = vmov %v6938_v16  ;;  %v5504_v47 = vadd.f32 %v992_v45, %v911_v36  ;;  %v3623_v8 = vunpack.i.h.bf16 %v5268_v60 }
 0x1a8   :  { %v1271_v37 = vsel %vm1154_vm3, %v6939_v34, %v6938_v16  ;;  %v1273_v59 = vsel %vm1154_vm3, %v6942_v10, %v6941_v50  ;;  %v6944_v16 = vrot.slane %v6943_v58, 4  ;;  %v6945_v34 = vrot.slane %v5068_v12, 4  ;;  %v5520_v50 = vpop.permute.xlu0 %3665 }
 0x1a9   :  { %v1304_v22 = vadd.f32 %v1271_v37, %v1194_v26  ;;  %v1305_v56 = vadd.f32 %v1273_v59, %v1195_v32  ;;  %v1423_v35 = vmul.f32 %v5462_v44, %v1404_v40  ;;  %v1441_v29 = vadd.f32 %v5482_v24, %v1422_v20  ;;  %v6946_v26 = vld [vmem:[#allocation20_spill] sm:$0xff] }
 0x1aa   :  { %v1372_v7 = vsel %vm1154_vm3, %v6945_v34, %v6944_v16  ;;  %v6947_v37 = vrot.slane %v6946_v26, 4  ;;  %v6948_v36 = vmov %v6944_v16  ;;  %v6949_v10 = vunpack.i.h.bf16 %v5083_v55 }
 0x1ab   :  { %v1405_v32 = vadd.f32 %v1372_v7, %v1304_v22  ;;  %v3622_v40 = vunpack.i.l.bf16 %v5268_v60  ;;  %v3642_v20 = vunpack.i.l.bf16 %v5285_v5  ;;  %v1442_v16 = vadd.f32 %v5482_v24, %v1423_v35  ;;  %v5531_v7 = vpop.permute.xlu1 %3695 }
 0x1ac   :  { %v1374_v45 = vsel %vm1154_vm3, %v6948_v36, %v6947_v37  ;;  %v939_v59 = vsel %vm674_vm4, %v6949_v10, %v3623_v8  ;;  %v1453_v34 = vmax.f32 %v1441_v29, 0.0  ;;  %v3628_v35 = vunpack.i.h.bf16 %v5301_v28 }
 0x1ad   :  { %v1406_v12 = vadd.f32 %v1374_v45, %v1305_v56  ;;  %v1424_v58 = vmul.f32 %v5462_v44, %v1405_v32  ;;  %v957_v22 = vmul.f32 %v4925_v9, %v939_v59  ;;  %v5536_v56 = vld [vmem:[%s6691_s5 + $0x10] sm:$0xff]   ;;  %v5540_v60 = vmul.f32 %v5012_v46, %v939_v59  ;;  %v5546_v32 = vpop.permute.xlu0 %3700 }
 0x1ae   :  { %v940_v8 = vsel %vm674_vm4, %v3622_v40, %v3642_v20  ;;  %v1454_v29 = vmax.f32 %v1442_v16, 0.0  ;;  %3442 = vmatprep.subr.bf16.mxu0 %v5536_v56  ;;  %v6950_v20 = vunpack.i.h.bf16 %v5102_v30  ;;  %v3627_v30 = vunpack.i.l.bf16 %v5301_v28 }
 0x1af   :  { %v1425_v55 = vmul.f32 %v5462_v44, %v1406_v12  ;;  %v1443_v37 = vadd.f32 %v5482_v24, %v1424_v58  ;;  %v993_v36 = vrot.slane %v957_v22, 6  ;;  %v958_v45 = vmul.f32 %v4925_v9, %v940_v8  ;;  %v5552_v12 = vld [vmem:[%s6691_s5 + $0x8] sm:$0xff]   ;;  %3443 = vmatpush3.bf16.msra.mxu0 %v5536_v56  ;;  %v5564_v43 = vpop.permute.xlu1 %3710 }
 0x1b0   :  { %v6747_v59 = vrot.slane %v5540_v60, 4  ;;  %v1037_v16 = vsel %vm788_vm5, %v6950_v20, %v3628_v35  ;;  %v1465_v9 = vpack.c.bf16 %v1454_v29, %v1453_v34  ;;  %3444 = vmatprep.subr.bf16.mxu0 %v5552_v12  ;;  %v6951_v34 = vrot.slane %v5425_v27, 4 }
 0x1b1   :  { %v1444_v10 = vadd.f32 %v5482_v24, %v1425_v55  ;;  %v1455_v58 = vmax.f32 %v1443_v37, 0.0  ;;  %v994_v22 = vsel %vm191_vm0, %v991_v23, %v993_v36  ;;  %v995_v8 = vrot.slane %v958_v45, 6 }
 0x1b2   :  { %v1019_v17 = vadd.f32 %v994_v22, %v912_v52  ;;  %v1055_v40 = vmul.f32 %v4930_v53, %v1037_v16  ;;  %3420 = vmatprep.mubr.bf16.mxu1 %v1465_v9  ;;  %v5574_v33 = vsel %vm1154_vm3, %v6951_v34, %v6747_v59  ;;  %v5578_v35 = vmul.f32 %v4956_v48, %v1037_v16  ;;  %v5581_v52 = vpop.permute.xlu0 %3705  ;;  %v6973_v22 = vld [vmem:[#allocation17_spill] sm:$0xff] }
 0x1b3   :  { %v1456_v55 = vmax.f32 %v1444_v10, 0.0  ;;  %v996_v23 = vsel %vm191_vm0, %v993_v36, %v995_v8  ;;  %v3647_v29 = vunpack.i.l.bf16 %v5317_v49  ;;  %6952 = vst [vmem:[#allocation19_spill] sm:$0xff] %v5581_v52  ;;  %3445 = vmatpush3.bf16.msra.mxu0 %v5552_v12  ;;  %v5590_v16 = vpop.permute.xlu1 %3725  ;;  %v6954_v8 = vld [vmem:[#allocation34_spill] sm:$0xff]  ;;  %v6959_v36 = vld [vmem:[#allocation21_spill] sm:$0xff] }
 0x1b4   :  { %v1020_v28 = vadd.f32 %v996_v23, %v5451_v54  ;;  %v1091_v45 = vrot.slane %v1055_v40, 6  ;;  %v6955_v23 = vld [vmem:[#allocation35_spill] sm:$0xff] }
 0x1b5   :  { %v1466_v37 = vpack.c.bf16 %v1456_v55, %v1455_v58  ;;  %v1038_v9 = vsel %vm788_vm5, %v3627_v30, %v3647_v29  ;;  %v6953_v58 = vrot.slane %v5385_v39, 6  ;;  %v1196_v55 = vadd.f32 %v6954_v8, %v5237_v38  ;;  %v6964_v30 = vld [vmem:[#allocation24_spill] sm:$0xff] }
 0x1b6   :  { %v1056_v40 = vmul.f32 %v4930_v53, %v1038_v9  ;;  %v1197_v29 = vadd.f32 %v6955_v23, %v5321_v0  ;;  %v6957_v39 = vrot.slane %v6940_v11, 4  ;;  %v5609_v59 = vpop.permute.xlu0 %3715  ;;  %v6958_v53 = vld [vmem:[#allocation11_spill] sm:$0xff]  ;;  %v6960_v38 = vrot.slane %v6959_v36, 4 }
 0x1b7   :  { %3421 = vmatmul.mubr.bf16.vlgmr.msra.gmra.mxu1 %v1466_v37  ;;  %v1092_v54 = vsel %vm191_vm0, %v6953_v58, %v1091_v45  ;;  %v6956_v37 = vrot.slane %v5228_v62, 4  ;;  %v6962_v0 = vrot.slane %v5282_v42, 4  ;;  %v6963_v23 = vrot.slane %v6946_v26, 4 }
 0x1b8   :  { %v5599_v34 = vadd.f32 %v1092_v54, %v1019_v17  ;;  %3468 = vmatpush3.bf16.msra.mxu1 %v6958_v53  ;;  %v1093_v9 = vrot.slane %v1056_v40, 6 }
 0x1b9   :  { %v1275_v58 = vsel %vm1154_vm3, %v6957_v39, %v6956_v37  ;;  %v6961_v17 = vmov %v6956_v37  ;;  %v1376_v11 = vsel %vm1154_vm3, %v6963_v23, %v6962_v0  ;;  %3461 = vmatprep.subr.bf16.mxu1 %v6964_v30  ;;  %v5626_v37 = vld [vmem:[%s6691_s5] sm:$0xff]   ;;  %v6965_v39 = vld [vmem:[#allocation6_spill] sm:$0xff]  ;;  %v6967_v62 = vmov %v6962_v0 }
 0x1ba   :  { %v1277_v54 = vsel %vm1154_vm3, %v6961_v17, %v6960_v38  ;;  %v1306_v8 = vadd.f32 %v1275_v58, %v1196_v55  ;;  %v6966_v53 = vrot.slane %v6965_v39, 4  ;;  %v5635_v38 = vpop.permute.xlu1 %3730  ;;  %v1094_v17 = vsel %vm191_vm0, %v1091_v45, %v1093_v9  ;;  %3446 = vmatprep.subr.bf16.mxu0 %v5626_v37 }
 0x1bb   :  { %v1307_v40 = vadd.f32 %v1277_v54, %v1197_v29  ;;  %v5641_v29 = vadd.f32 %v1094_v17, %v1020_v28  ;;  %v3653_v54 = vunpack.i.h.bf16 %v5396_v4  ;;  %3447 = vmatpush3.bf16.msra.mxu0 %v5626_v37  ;;  %v3682_v9 = vunpack.i.l.bf16 %v5410_v41  ;;  %v6968_v28 = vld [vmem:[#allocation36_spill] sm:$0xff] }
 0x1bc   :  { %v1378_v55 = vsel %vm1154_vm3, %v6967_v62, %v6966_v53  ;;  %v1407_v0 = vadd.f32 %v1376_v11, %v1306_v8  ;;  %v5645_v62 = vpop.permute.xlu0 %3720  ;;  %3469 = vmatpush3.bf16.msra.mxu1 %v6964_v30  ;;  %v1114_v8 = vadd.f32 %v5324_v6, %v5376_v61  ;;  %v1198_v11 = vadd.f32 %v6968_v28, %v5341_v1  ;;  %v6970_v53 = vld [vmem:[#allocation16_spill] sm:$0xff]  ;;  %v6976_v28 = vld [vmem:[#allocation37_spill] sm:$0xff] }
 0x1bd   :  { %v1408_v42 = vadd.f32 %v1378_v55, %v1307_v40  ;;  %v6969_v40 = vld [vmem:[#allocation5_spill] sm:$0xff]  ;;  %v6971_v30 = vrot.slane %v6970_v53, 4  ;;  %v6972_v58 = vrot.slane %v6959_v36, 4  ;;  %v6974_v23 = vrot.slane %v6973_v22, 4 }
 0x1be   :  { %v1426_v45 = vmul.f32 %v5462_v44, %v1407_v0  ;;  %3462 = vmatprep.subr.bf16.mxu1 %v6969_v40  ;;  %v5668_v61 = vpop.permute.xlu1 %3740  ;;  %v1199_v17 = vadd.f32 %v6976_v28, %v1114_v8  ;;  %v6979_v53 = vrot.slane %v6965_v39, 4  ;;  %v6984_v28 = vrot.slane %v5425_v27, 4 }
 0x1bf   :  { %v1427_v55 = vmul.f32 %v5462_v44, %v1408_v42  ;;  %v1279_v0 = vsel %vm1154_vm3, %v6972_v58, %v6971_v30  ;;  %v6975_v26 = vmov %v6971_v30  ;;  %v2494_v42 = vsel %vm674_vm4, %v3653_v54, %v3682_v9  ;;  %v6977_v58 = vld [vmem:[#allocation29_spill] sm:$0xff] }
 0x1c0   :  { %v1281_v6 = vsel %vm1154_vm3, %v6975_v26, %v6974_v23  ;;  %v1445_v1 = vadd.f32 %v5482_v24, %v1426_v45  ;;  %v1308_v10 = vadd.f32 %v1279_v0, %v1198_v11  ;;  %v5675_v36 = vmul.f32 %v5012_v46, %v2494_v42  ;;  %v5687_v9 = vpop.permute.xlu0 %3735  ;;  %3470 = vmatpush3.bf16.msra.mxu1 %v6969_v40  ;;  %v6982_v42 = vld [vmem:[#allocation66_spill] sm:$0xff] }
 0x1c1   :  { %v1446_v48 = vadd.f32 %v5482_v24, %v1427_v55  ;;  %v6978_v30 = vrot.slane %v6977_v58, 4  ;;  %v6980_v23 = vrot.slane %v5353_v25, 4  ;;  %v1309_v11 = vadd.f32 %v1281_v6, %v1199_v17  ;;  %3463 = vmatprep.subr.bf16.mxu1 %v6982_v42  ;;  %v5697_v58 = vld [vmem:[%s6690_s2 + $0x8] ss:$0 sm:$0xff] }
 0x1c2   :  { %v1457_v8 = vmax.f32 %v1445_v1, 0.0  ;;  %v3658_v0 = vunpack.i.h.bf16 %v5428_v2  ;;  %v5700_v40 = vpop.permute.xlu1 %3750  ;;  %v1116_v6 = vadd.f32 %v5433_v57, %v5504_v47  ;;  %v3663_v25 = vunpack.i.h.bf16 %v5471_v13 }
 0x1c3   :  { %v1380_v26 = vsel %vm1154_vm3, %v6979_v53, %v6978_v30  ;;  %v6981_v45 = vmov %v6978_v30  ;;  %v1458_v39 = vmax.f32 %v1446_v48, 0.0  ;;  %v3687_v53 = vunpack.i.l.bf16 %v5448_v51  ;;  %v6983_v48 = vld [vmem:[#allocation38_spill] sm:$0xff] }
 0x1c4   :  { %v1382_v54 = vsel %vm1154_vm3, %v6981_v45, %v6980_v23  ;;  %v1409_v55 = vadd.f32 %v1380_v26, %v1308_v10  ;;  %v1200_v1 = vadd.f32 %v6983_v48, %v5412_v18  ;;  %v6985_v30 = vrot.slane %v6973_v22, 4  ;;  %3471 = vmatpush3.bf16.msra.mxu1 %v6982_v42 }
 0x1c5   :  { %v1410_v17 = vadd.f32 %v1382_v54, %v1309_v11  ;;  %v1467_v26 = vpack.c.bf16 %v1458_v39, %v1457_v8  ;;  %v2665_v45 = vsel %vm788_vm5, %v3658_v0, %v3687_v53  ;;  %v5714_v54 = vpop.permute.xlu0 %3745  ;;  %v6987_v8 = vld [vmem:[#allocation39_spill] sm:$0xff]  ;;  %3464 = vmatprep.subr.bf16.mxu1 %v5494_v31  ;;  %v6988_v22 = vrot.slane %v5390_v63, 4 }
 0x1c6   :  { %v1428_v10 = vmul.f32 %v5462_v44, %v1409_v55  ;;  %v1283_v20 = vsel %vm1154_vm3, %v6985_v30, %v6984_v28  ;;  %v5720_v18 = vmul.f32 %v5697_v58, %v2665_v45  ;;  %v1201_v11 = vadd.f32 %v6987_v8, %v1116_v6  ;;  %v5737_v30 = vld [vmem:[%s6690_s2 + $0x1] ss:$0 sm:$0xff]  ;;  %v5745_v53 = vpop.permute.xlu1 %3755 }
 0x1c7   :  { %v1429_v57 = vmul.f32 %v5462_v44, %v1410_v17  ;;  %3424 = vmatprep.mubr.bf16.mxu1 %v1467_v26  ;;  %v1310_v27 = vadd.f32 %v1283_v20, %v1200_v1  ;;  %v6989_v55 = vmov %v6980_v23  ;;  %v6990_v42 = vrot.slane %v5578_v35, 4  ;;  %v5742_v20 = vld [vmem:[%s6690_s2 + $0x4] ss:$0 sm:$0xff] }
 0x1c8   :  { %v1447_v47 = vadd.f32 %v5482_v24, %v1428_v10  ;;  %6986 = vst [vmem:[#allocation25_spill] sm:$0xff] %v5720_v18  ;;  %v1384_v0 = vsel %vm1154_vm3, %v6989_v55, %v6988_v22  ;;  %v6991_v39 = vmov %v6988_v22  ;;  %v1311_v63 = vadd.f32 %v5574_v33, %v1201_v11  ;;  %3472 = vmatpush3.bf16.msra.mxu1 %v5494_v31  ;;  %v5771_v31 = vld [vmem:[%s6690_s2 + $0x2] ss:$0 sm:$0xff] }
 0x1c9   :  { %v1386_v28 = vsel %vm1154_vm3, %v6991_v39, %v6990_v42  ;;  %v1448_v17 = vadd.f32 %v5482_v24, %v1429_v57  ;;  %v1411_v1 = vadd.f32 %v1384_v0, %v1310_v27  ;;  %v6992_v26 = vunpack.i.h.bf16 %v5285_v5  ;;  %v5760_v33 = vpop.permute.xlu0 %3760  ;;  %3465 = vmatprep.subr.bf16.mxu1 %v5536_v56  ;;  %v5776_v42 = vld [vmem:[%s6690_s2 + $0x5] ss:$0 sm:$0xff] }
 0x1ca   :  { %v1459_v10 = vmax.f32 %v1447_v47, 0.0  ;;  %v3692_v8 = vunpack.i.l.bf16 %v5502_v15  ;;  %v1412_v55 = vadd.f32 %v1386_v28, %v1311_v63  ;;  %v6994_v27 = vunpack.i.l.bf16 %v5333_v14  ;;  %6995 = vst [vmem:[#allocation30_spill] sm:$0xff] %v5776_v42  ;;  %v5779_v28 = vpop.permute.xlu1 %3765  ;;  %v6996_v63 = vld [vmem:[#allocation12_spill] sm:$0xff]  ;;  %v7007_v18 = vld [vmem:[#allocation41_spill] sm:$0xff] }
 0x1cb   :  { %v1829_v45 = vsel %vm674_vm4, %v6992_v26, %v3663_v25  ;;  %v1460_v22 = vmax.f32 %v1448_v17, 0.0  ;;  %v1430_v11 = vmul.f32 %v5462_v44, %v1411_v1  ;;  %v3668_v39 = vunpack.i.h.bf16 %v5520_v50 }
 0x1cc   :  { %v1846_v57 = vmul.f32 %v5737_v30, %v1829_v45  ;;  %v5758_v47 = vmul.f32 %v5742_v20, %v1829_v45  ;;  %v1233_v0 = vsel %vm674_vm4, %v6994_v27, %v3692_v8  ;;  %v1431_v17 = vmul.f32 %v5462_v44, %v1412_v55  ;;  %3473 = vmatpush3.bf16.msra.mxu1 %v5536_v56 }
 0x1cd   :  { %v1468_v25 = vpack.c.bf16 %v1460_v22, %v1459_v10  ;;  %v1449_v45 = vadd.f32 %v5482_v24, %v1430_v11  ;;  %v5787_v27 = vmul.f32 %v5012_v46, %v1233_v0  ;;  %v6997_v48 = vunpack.i.h.bf16 %v5317_v49  ;;  %3466 = vmatprep.subr.bf16.mxu1 %v5552_v12 }
 0x1ce   :  { %6993 = vst [vmem:[#allocation23_spill] sm:$0xff] %v5758_v47  ;;  %v1858_v1 = vadd.f32 %v1846_v57, %v6996_v63  ;;  %v1450_v10 = vadd.f32 %v5482_v24, %v1431_v17  ;;  %v3697_v57 = vunpack.i.l.bf16 %v5531_v7  ;;  %v3698_v49 = vunpack.i.h.bf16 %v5531_v7  ;;  %v5803_v56 = vpop.permute.xlu1 %3775  ;;  %v5809_v63 = vpop.permute.xlu0 %3770  ;;  %v5815_v7 = vld [vmem:[%s6690_s2 + $0x8] ss:$0 sm:$0xff] }
 0x1cf   :  { %v1942_v23 = vsel %vm788_vm5, %v6997_v48, %v3668_v39  ;;  %3425 = vmatmul.mubr.bf16.gmra.mxu1 %v1468_v25  ;;  %v1461_v46 = vmax.f32 %v1449_v45, 0.0  ;;  %v3702_v48 = vunpack.i.l.bf16 %v5546_v32  ;;  %v6998_v25 = vunpack.i.l.bf16 %v5361_v19 }
 0x1d0   :  { %v1959_v22 = vmul.f32 %v5771_v31, %v1942_v23  ;;  %v5796_v55 = vmul.f32 %v5776_v42, %v1942_v23  ;;  %v1462_v0 = vmax.f32 %v1450_v10, 0.0  ;;  %3474 = vmatpush3.bf16.msra.mxu1 %v5552_v12  ;;  %v7004_v8 = vunpack.i.l.bf16 %v5379_v21 }
 0x1d1   :  { %v1334_v23 = vsel %vm788_vm5, %v6998_v25, %v3697_v57  ;;  %v7000_v25 = vld [vmem:[#allocation40_spill] sm:$0xff]  ;;  %3467 = vmatprep.subr.bf16.mxu1 %v5626_v37  ;;  %v3743_v5 = vunpack.i.h.bf16 %v5668_v61 }
 0x1d2   :  { %v1971_v39 = vadd.f32 %v1959_v22, %v1858_v1  ;;  %v5818_v26 = vmul.f32 %v5815_v7, %v1334_v23  ;;  %v6999_v1 = vunpack.i.h.bf16 %v5346_v3  ;;  %v1469_v57 = vpack.c.bf16 %v1462_v0, %v1461_v46  ;;  %v5837_v12 = vpop.permute.xlu1 %3780  ;;  %v7002_v46 = vld [vmem:[#allocation31_spill] sm:$0xff] }
 0x1d3   :  { %v7003_v22 = vunpack.i.h.bf16 %v5379_v21 }
 0x1d4   :  { %v1826_v10 = vsel %vm674_vm4, %v3702_v48, %v6999_v1  ;;  %v5826_v17 = vadd.f32 %v7000_v25, %v1971_v39  ;;  %v3707_v48 = vunpack.i.l.bf16 %v5581_v52  ;;  %v3728_v1 = vunpack.i.h.bf16 %v5590_v16  ;;  %3428 = vmatprep.mubr.bf16.mxu1 %v1469_v57  ;;  %3475 = vmatpush3.bf16.msra.mxu1 %v5626_v37  ;;  %v7012_v39 = vld [vmem:[#allocation33_spill] sm:$0xff] }
 0x1d5   :  { %v1843_v45 = vmul.f32 %v5737_v30, %v1826_v10  ;;  %v5830_v11 = vmul.f32 %v5742_v20, %v1826_v10  ;;  %v3727_v25 = vunpack.i.l.bf16 %v5590_v16  ;;  %v3723_v37 = vunpack.i.h.bf16 %v5645_v62 }
 0x1d6   :  { %v1939_v23 = vsel %vm788_vm5, %v3707_v48, %v7003_v22  ;;  %v1938_v6 = vsel %vm788_vm5, %v3728_v1, %v7004_v8  ;;  %v5858_v22 = vpop.permute.xlu0 %3785  ;;  %v7006_v57 = vunpack.i.l.bf16 %v5346_v3  ;;  %v5875_v10 = vpop.permute.xlu1 %3790 }
 0x1d7   :  { %7001 = vst [vmem:[#allocation22_spill] sm:$0xff] %v5830_v11  ;;  %v1855_v0 = vadd.f32 %v1843_v45, %v7002_v46  ;;  %v1956_v45 = vmul.f32 %v5771_v31, %v1939_v23  ;;  %v5854_v46 = vmul.f32 %v5776_v42, %v1939_v23  ;;  %v1946_v16 = vsel %vm788_vm5, %v3698_v49, %v3727_v25 }
 0x1d8   :  { %v1955_v21 = vmul.f32 %v5771_v31, %v1938_v6  ;;  %v1963_v8 = vmul.f32 %v5771_v31, %v1946_v16  ;;  %v5863_v48 = vmul.f32 %v5776_v42, %v1946_v16  ;;  %v3722_v49 = vunpack.i.l.bf16 %v5645_v62 }
 0x1d9   :  { %7005 = vst [vmem:[#allocation28_spill] sm:$0xff] %v5854_v46  ;;  %v1968_v1 = vadd.f32 %v1956_v45, %v1855_v0  ;;  %v1825_v6 = vsel %vm674_vm4, %v3723_v37, %v7006_v57  ;;  %v3742_v16 = vunpack.i.l.bf16 %v5668_v61  ;;  %v7009_v23 = vunpack.i.h.bf16 %v5502_v15 }
 0x1da   :  { %v1842_v45 = vmul.f32 %v5737_v30, %v1825_v6  ;;  %v7010_v61 = vunpack.i.l.bf16 %v5471_v13 }
 0x1db   :  { %v5878_v0 = vadd.f32 %v7007_v18, %v1968_v1  ;;  %v1833_v62 = vsel %vm674_vm4, %v7009_v23, %v3722_v49  ;;  %v3753_v18 = vunpack.i.h.bf16 %v5700_v40  ;;  %v7011_v1 = vld [vmem:[#allocation15_spill] sm:$0xff]  ;;  %v5897_v49 = vpop.permute.xlu0 %3795 }
 0x1dc   :  { %v1850_v3 = vmul.f32 %v5737_v30, %v1833_v62  ;;  %v5887_v57 = vmul.f32 %v5742_v20, %v1833_v62  ;;  %v1830_v37 = vsel %vm674_vm4, %v7010_v61, %v3742_v16  ;;  %v1854_v25 = vadd.f32 %v1842_v45, %v7011_v1  ;;  %v7014_v45 = vld [vmem:[#allocation14_spill] sm:$0xff] }
 0x1dd   :  { %7008 = vst [vmem:[#allocation27_spill] sm:$0xff] %v5878_v0  ;;  %v1847_v6 = vmul.f32 %v5737_v30, %v1830_v37  ;;  %v2100_v15 = vmul.f32 %v5742_v20, %v1830_v37  ;;  %v7013_v62 = vunpack.i.h.bf16 %v5333_v14  ;;  %v3752_v16 = vunpack.i.l.bf16 %v5700_v40  ;;  %v5909_v37 = vld [vmem:[%s6690_s2 + $0x7] ss:$0 sm:$0xff] }
 0x1de   :  { %v1862_v46 = vadd.f32 %v1850_v3, %v7012_v39  ;;  %v3748_v61 = vunpack.i.h.bf16 %v5714_v54  ;;  %v1967_v52 = vadd.f32 %v1955_v21, %v1854_v25  ;;  %v3747_v3 = vunpack.i.l.bf16 %v5714_v54  ;;  %v7015_v21 = vld [vmem:[#allocation42_spill] sm:$0xff] }
 0x1df   :  { %v1232_v13 = vsel %vm674_vm4, %v3753_v18, %v7013_v62  ;;  %v1859_v1 = vadd.f32 %v1847_v6, %v7014_v45  ;;  %v2130_v0 = vrot.slane %v2100_v15, 6  ;;  %v5915_v18 = vpop.permute.xlu1 %3800  ;;  %v7017_v6 = vrot.slane %v5758_v47, 6 }
 0x1e0   :  { %v1250_v23 = vmul.f32 %v5909_v37, %v1232_v13  ;;  %v1975_v39 = vadd.f32 %v1963_v8, %v1862_v46  ;;  %v1831_v40 = vsel %vm674_vm4, %v3743_v5, %v3748_v61  ;;  %v5918_v25 = vadd.f32 %v7015_v21, %v1967_v52  ;;  %v7018_v13 = vld [vmem:[#allocation43_spill] sm:$0xff] }
 0x1e1   :  { %v2131_v15 = vsel %vm191_vm0, %v7017_v6, %v2130_v0  ;;  %v1848_v45 = vmul.f32 %v5737_v30, %v1831_v40  ;;  %v1832_v54 = vsel %vm674_vm4, %v3747_v3, %v3752_v16  ;;  %v2101_v5 = vmul.f32 %v5742_v20, %v1831_v40  ;;  %v7022_v40 = vld [vmem:[#allocation8_spill] sm:$0xff] }
 0x1e2   :  { %7016 = vst [vmem:[#allocation32_spill] sm:$0xff] %v5918_v25  ;;  %v1286_v62 = vrot.slane %v1250_v23, 4  ;;  %v5925_v46 = vadd.f32 %v7018_v13, %v1975_v39  ;;  %v2162_v8 = vadd.f32 %v2131_v15, %v5826_v17  ;;  %v7020_v61 = vrot.slane %v5540_v60, 4  ;;  %v5942_v13 = vpop.permute.xlu0 %3805 }
 0x1e3   :  { %v7021_v21 = vrot.slane %v5787_v27, 4  ;;  %v1849_v6 = vmul.f32 %v5737_v30, %v1832_v54  ;;  %v3758_v39 = vunpack.i.h.bf16 %v5745_v53  ;;  %v2102_v17 = vmul.f32 %v5742_v20, %v1832_v54 }
 0x1e4   :  { %7019 = vst [vmem:[#allocation10_spill] sm:$0xff] %v5925_v46  ;;  %v5933_v52 = vsel %vm1154_vm3, %v7020_v61, %v1286_v62  ;;  %v2132_v16 = vrot.slane %v2101_v5, 6  ;;  %v3757_v3 = vunpack.i.l.bf16 %v5745_v53  ;;  %v3763_v60 = vunpack.i.h.bf16 %v5760_v33  ;;  %v7023_v61 = vld [vmem:[#allocation18_spill] sm:$0xff]  ;;  %v5956_v53 = vpop.permute.xlu1 %3810 }
 0x1e5   :  { %v5938_v23 = vsel %vm1154_vm3, %v1286_v62, %v7021_v21  ;;  %v1860_v15 = vadd.f32 %v1848_v45, %v7022_v40  ;;  %v1861_v27 = vadd.f32 %v1849_v6, %v7023_v61  ;;  %v3768_v62 = vunpack.i.h.bf16 %v5779_v28 }
 0x1e6   :  { %v3767_v21 = vunpack.i.l.bf16 %v5779_v28  ;;  %v2134_v14 = vrot.slane %v2102_v17, 6  ;;  %v7024_v25 = vunpack.i.l.bf16 %v5520_v50  ;;  %v3762_v54 = vunpack.i.l.bf16 %v5760_v33  ;;  %v5968_v11 = vpop.permute.xlu0 %3815 }
 0x1e7   :  { %v1944_v5 = vsel %vm788_vm5, %v3758_v39, %v3763_v60  ;;  %v2133_v28 = vsel %vm191_vm0, %v2130_v0, %v2132_v16 }
 0x1e8   :  { %v1943_v47 = vsel %vm788_vm5, %v7024_v25, %v3757_v3  ;;  %v1961_v6 = vmul.f32 %v5771_v31, %v1944_v5  ;;  %v2199_v40 = vmul.f32 %v5776_v42, %v1944_v5  ;;  %v2135_v50 = vsel %vm191_vm0, %v2132_v16, %v2134_v14 }
 0x1e9   :  { %v1960_v46 = vmul.f32 %v5771_v31, %v1943_v47  ;;  %v2198_v45 = vmul.f32 %v5776_v42, %v1943_v47  ;;  %v7025_v25 = vunpack.i.h.bf16 %v5361_v19  ;;  %v1945_v39 = vsel %vm788_vm5, %v3762_v54, %v3767_v21  ;;  %v7027_v21 = vld [vmem:[#allocation44_spill] sm:$0xff]  ;;  %v7029_v54 = vld [vmem:[#allocation45_spill] sm:$0xff] }
 0x1ea   :  { %v1973_v60 = vadd.f32 %v1961_v6, %v1860_v15  ;;  %v2230_v61 = vrot.slane %v2199_v40, 6  ;;  %v1962_v5 = vmul.f32 %v5771_v31, %v1945_v39  ;;  %v2200_v0 = vmul.f32 %v5776_v42, %v1945_v39 }
 0x1eb   :  { %v1333_v33 = vsel %vm788_vm5, %v3768_v62, %v7025_v25  ;;  %v1972_v17 = vadd.f32 %v1960_v46, %v1859_v1  ;;  %v2228_v3 = vrot.slane %v2198_v45, 6  ;;  %v3773_v16 = vunpack.i.h.bf16 %v5809_v63 }
 0x1ec   :  { %v5971_v47 = vmul.f32 %v5815_v7, %v1333_v33  ;;  %v7026_v19 = vrot.slane %v5887_v57, 6  ;;  %v7028_v46 = vrot.slane %v5796_v55, 6  ;;  %v2057_v45 = vadd.f32 %v7029_v54, %v1973_v60  ;;  %v5987_v33 = vpop.permute.xlu1 %3820 }
 0x1ed   :  { %v2056_v1 = vadd.f32 %v7027_v21, %v1972_v17  ;;  %v2231_v6 = vsel %vm191_vm0, %v2228_v3, %v2230_v61  ;;  %v1974_v40 = vadd.f32 %v1962_v5, %v1861_v27  ;;  %v2232_v25 = vrot.slane %v2200_v0, 6  ;;  %v7031_v21 = vld [vmem:[#allocation46_spill] sm:$0xff] }
 0x1ee   :  { %v2137_v62 = vsel %vm191_vm0, %v2134_v14, %v7026_v19  ;;  %v2229_v15 = vsel %vm191_vm0, %v7028_v46, %v2228_v3  ;;  %v2164_v42 = vadd.f32 %v2135_v50, %v2057_v45  ;;  %v1387_v14 = vrot.slane %v5971_v47, 4  ;;  %v6003_v47 = vpop.permute.xlu0 %3825 }
 0x1ef   :  { %v5984_v7 = vadd.f32 %v2229_v15, %v2162_v8  ;;  %v2163_v39 = vadd.f32 %v2133_v28, %v2056_v1  ;;  %v7030_v17 = vunpack.i.l.bf16 %v5564_v43  ;;  %v2058_v46 = vadd.f32 %v7031_v21, %v1974_v40 }
 0x1f0   :  { %v2233_v60 = vsel %vm191_vm0, %v2230_v61, %v2232_v25  ;;  %v3778_v28 = vunpack.i.h.bf16 %v5803_v56  ;;  %v3777_v50 = vunpack.i.l.bf16 %v5803_v56  ;;  %v3788_v61 = vunpack.i.h.bf16 %v5858_v22  ;;  %v6027_v21 = vpop.permute.xlu1 %3830 }
 0x1f1   :  { %v2498_v19 = vsel %vm674_vm4, %v7030_v17, %v3773_v16  ;;  %v5999_v3 = vadd.f32 %v2231_v6, %v2163_v39  ;;  %v2262_v5 = vadd.f32 %v2233_v60, %v2164_v42  ;;  %v2165_v0 = vadd.f32 %v2137_v62, %v2058_v46  ;;  %v7034_v42 = vld [vmem:[#allocation47_spill] sm:$0xff] }
 0x1f2   :  { %v5996_v8 = vmul.f32 %v5909_v37, %v2498_v19  ;;  %v7032_v16 = vrot.slane %v5863_v48, 6  ;;  %v3787_v15 = vunpack.i.l.bf16 %v5858_v22  ;;  %v7033_v54 = vunpack.i.h.bf16 %v5635_v38 }
 0x1f3   :  { %v2368_v6 = vadd.f32 %v7034_v42, %v2262_v5  ;;  %v7035_v40 = vunpack.i.h.bf16 %v5564_v43  ;;  %v3783_v62 = vunpack.i.h.bf16 %v5837_v12  ;;  %v7036_v22 = vunpack.i.h.bf16 %v5687_v9  ;;  %v7041_v42 = vld [vmem:[#allocation48_spill] sm:$0xff] }
 0x1f4   :  { %v2235_v1 = vsel %vm191_vm0, %v2232_v25, %v7032_v16  ;;  %v2500_v45 = vsel %vm674_vm4, %v3778_v28, %v7033_v54  ;;  %v6761_v46 = vrot.slane %v5996_v8, 4  ;;  %v7037_v60 = vunpack.i.h.bf16 %v5609_v59 }
 0x1f5   :  { %v2499_v56 = vsel %vm674_vm4, %v7035_v40, %v3777_v50  ;;  %v6018_v39 = vadd.f32 %v2235_v1, %v2165_v0  ;;  %v6021_v25 = vmul.f32 %v5909_v37, %v2500_v45  ;;  %v2671_v19 = vsel %vm788_vm5, %v3788_v61, %v7036_v22  ;;  %v7042_v45 = vld [vmem:[#allocation49_spill] sm:$0xff] }
 0x1f6   :  { %v2517_v17 = vmul.f32 %v5909_v37, %v2499_v56  ;;  %v6031_v43 = vmul.f32 %v5697_v58, %v2671_v19  ;;  %v2670_v5 = vsel %vm788_vm5, %v7037_v60, %v3787_v15  ;;  %v7038_v28 = vunpack.i.l.bf16 %v5609_v59  ;;  %v6050_v59 = vpop.permute.xlu0 %3835 }
 0x1f7   :  { %v6758_v0 = vrot.slane %v6021_v25, 4  ;;  %v6041_v1 = vmul.f32 %v5697_v58, %v2670_v5  ;;  %v3808_v5 = vunpack.i.h.bf16 %v5942_v13  ;;  %v3803_v19 = vunpack.i.h.bf16 %v5915_v18 }
 0x1f8   :  { %v2669_v50 = vsel %vm788_vm5, %v7038_v28, %v3783_v62  ;;  %v2548_v16 = vrot.slane %v2517_v17, 4  ;;  %v6760_v54 = vrot.slane %v6031_v43, 4  ;;  %v1203_v15 = vadd.f32 %v7042_v45, %v5641_v29 }
 0x1f9   :  { %7039 = vst [vmem:[#allocation9_spill] sm:$0xff] %v6041_v1  ;;  %v6044_v61 = vmul.f32 %v5697_v58, %v2669_v50  ;;  %v6759_v62 = vrot.slane %v6041_v1, 4  ;;  %v3807_v50 = vunpack.i.l.bf16 %v5942_v13  ;;  %v7043_v60 = vrot.slane %v5578_v35, 4 }
 0x1fa   :  { %v6055_v40 = vsel %vm1154_vm3, %v6761_v46, %v2548_v16  ;;  %v2551_v56 = vsel %vm1154_vm3, %v2548_v16, %v6758_v0  ;;  %v3802_v16 = vunpack.i.l.bf16 %v5915_v18  ;;  %v1202_v0 = vadd.f32 %v7041_v42, %v5599_v34  ;;  %v6096_v45 = vpop.permute.xlu0 %3845 }
 0x1fb   :  { %7040 = vst [vmem:[#allocation20_spill] sm:$0xff] %v6055_v40  ;;  %v2580_v22 = vadd.f32 %v2551_v56, %v2368_v6  ;;  %v2722_v28 = vsel %vm1154_vm3, %v6759_v62, %v6760_v54  ;;  %v6074_v6 = vpop.permute.xlu1 %3840  ;;  %v1388_v17 = vsel %vm1154_vm3, %v7043_v60, %v1387_v14  ;;  %v7044_v54 = vrot.slane %v5818_v26, 4 }
 0x1fc   :  { %v2496_v62 = vsel %vm674_vm4, %v3802_v16, %v3808_v5  ;;  %v1312_v13 = vadd.f32 %v5933_v52, %v1202_v0  ;;  %v3818_v42 = vunpack.i.h.bf16 %v5968_v11  ;;  %v1313_v35 = vadd.f32 %v5938_v23, %v1203_v15 }
 0x1fd   :  { %v2751_v56 = vadd.f32 %v2722_v28, %v2580_v22  ;;  %v1390_v34 = vsel %vm1154_vm3, %v1387_v14, %v7044_v54  ;;  %v6092_v18 = vmul.f32 %v5909_v37, %v2496_v62  ;;  %v3813_v52 = vunpack.i.h.bf16 %v5956_v53 }
 0x1fe   :  { %v1413_v60 = vadd.f32 %v1388_v17, %v1312_v13  ;;  %v3812_v26 = vunpack.i.l.bf16 %v5956_v53  ;;  %v1414_v54 = vadd.f32 %v1390_v34, %v1313_v35  ;;  %v3838_v28 = vunpack.i.h.bf16 %v6050_v59  ;;  %v3856_v29 = vpop.permute.xlu0 %3855 }
 0x1ff   :  { %v6089_v22 = vmul.f32 %v5462_v44, %v2751_v56  ;;  %v6762_v0 = vrot.slane %v6092_v18, 4  ;;  %v3851_v16 = vpop.permute.xlu1 %3850  ;;  %v3832_v46 = vunpack.i.l.bf16 %v6027_v21  ;;  %v3848_v34 = vunpack.i.h.bf16 %v6096_v45 }
 0x200   :  { %v1432_v23 = vmul.f32 %v5462_v44, %v1413_v60  ;;  %v1433_v56 = vmul.f32 %v5462_v44, %v1414_v54  ;;  %v7046_v5 = vunpack.i.l.bf16 %v5396_v4  ;;  %v3842_v15 = vunpack.i.l.bf16 %v6074_v6 }
 0x201   :  { %7045 = vst [vmem:[#allocation34_spill] sm:$0xff] %v6089_v22  ;;  %v7047_v54 = vunpack.i.h.bf16 %v5410_v41  ;;  %v7048_v62 = vunpack.i.l.bf16 %v5428_v2  ;;  %v7050_v14 = vunpack.i.h.bf16 %v5448_v51  ;;  %v7057_v51 = vld [vmem:[#allocation26_spill] sm:$0xff] }
 0x202   :  { %v1451_v35 = vadd.f32 %v5482_v24, %v1432_v23  ;;  %v2493_v60 = vsel %vm674_vm4, %v7046_v5, %v3838_v28  ;;  %v1452_v17 = vadd.f32 %v5482_v24, %v1433_v56 }
 0x203   :  { %v2511_v44 = vmul.f32 %v5909_v37, %v2493_v60  ;;  %v2495_v13 = vsel %vm674_vm4, %v3832_v46, %v7047_v54  ;;  %v2664_v23 = vsel %vm788_vm5, %v7048_v62, %v3848_v34  ;;  %v2666_v24 = vsel %vm788_vm5, %v3842_v15, %v7050_v14  ;;  %v3861_v54 = vpop.permute.xlu1 %3860 }
 0x204   :  { %v1463_v4 = vmax.f32 %v1451_v35, 0.0  ;;  %v2513_v5 = vmul.f32 %v5909_v37, %v2495_v13  ;;  %v6128_v28 = vmul.f32 %v5697_v58, %v2664_v23  ;;  %v1464_v56 = vmax.f32 %v1452_v17, 0.0 }
 0x205   :  { %v2537_v60 = vrot.slane %v2511_v44, 4  ;;  %v6134_v41 = vmul.f32 %v5697_v58, %v2666_v24  ;;  %v3853_v46 = vunpack.i.h.bf16 %v3851_v16  ;;  %v3852_v34 = vunpack.i.l.bf16 %v3851_v16 }
 0x206   :  { %7049 = vst [vmem:[#allocation35_spill] sm:$0xff] %v6128_v28  ;;  %v2540_v2 = vrot.slane %v2513_v5, 4  ;;  %v3858_v35 = vunpack.i.h.bf16 %v3856_v29  ;;  %v1470_v13 = vpack.c.bf16 %v1464_v56, %v1463_v4  ;;  %v7052_v23 = vrot.slane %v5675_v36, 4 }
 0x207   :  { %7051 = vst [vmem:[#allocation11_spill] sm:$0xff] %v6134_v41  ;;  %v2505_v14 = vsel %vm674_vm4, %v3807_v50, %v3853_v46  ;;  %v2504_v4 = vsel %vm674_vm4, %v3803_v19, %v3852_v34  ;;  %v3857_v56 = vunpack.i.l.bf16 %v3856_v29  ;;  %v3866_v50 = vpop.permute.xlu0 %3865  ;;  %v3881_v62 = vpop.permute.xlu1 %3880 }
 0x208   :  { %v6140_v27 = vsel %vm1154_vm3, %v2537_v60, %v7052_v23  ;;  %v7054_v15 = vmov %v7052_v23  ;;  %v2523_v16 = vmul.f32 %v5909_v37, %v2505_v14  ;;  %3429 = vmatmul.mubr.bf16.gmra.mxu1 %v1470_v13  ;;  %v6153_v5 = vmul.f32 %v5909_v37, %v2504_v4 }
 0x209   :  { %7053 = vst [vmem:[#allocation21_spill] sm:$0xff] %v6140_v27  ;;  %v6147_v17 = vsel %vm1154_vm3, %v7054_v15, %v2540_v2  ;;  %v1827_v24 = vsel %vm674_vm4, %v3858_v35, %v3818_v42  ;;  %v3863_v60 = vunpack.i.h.bf16 %v3861_v54  ;;  %v6159_v36 = vsel %vm1154_vm3, %v2540_v2, %v6762_v0 }
 0x20a   :  { %7055 = vst [vmem:[#allocation24_spill] sm:$0xff] %v6147_v17  ;;  %v1844_v46 = vmul.f32 %v5737_v30, %v1827_v24  ;;  %v2097_v23 = vmul.f32 %v5742_v20, %v1827_v24  ;;  %v3862_v14 = vunpack.i.l.bf16 %v3861_v54  ;;  %v2560_v19 = vrot.slane %v2523_v16, 4  ;;  %v7058_v16 = vld [vmem:[#allocation22_spill] sm:$0xff] }
 0x20b   :  { %v6764_v34 = vrot.slane %v6153_v5, 4  ;;  %v7056_v13 = vunpack.i.h.bf16 %v5546_v32  ;;  %v1835_v29 = vsel %vm674_vm4, %v3813_v52, %v3863_v60  ;;  %v3868_v4 = vunpack.i.h.bf16 %v3866_v50  ;;  %v7060_v60 = vld [vmem:[#allocation7_spill] sm:$0xff] }
 0x20c   :  { %v2124_v35 = vrot.slane %v2097_v23, 6  ;;  %v1856_v44 = vadd.f32 %v1844_v46, %v7057_v51  ;;  %v1852_v24 = vmul.f32 %v5737_v30, %v1835_v29  ;;  %v6173_v54 = vmul.f32 %v5742_v20, %v1835_v29  ;;  %v7062_v46 = vld [vmem:[#allocation27_spill] sm:$0xff] }
 0x20d   :  { %v1834_v42 = vsel %vm674_vm4, %v7056_v13, %v3857_v56  ;;  %v1828_v32 = vsel %vm674_vm4, %v3812_v26, %v3862_v14  ;;  %v7059_v56 = vrot.slane %v7058_v16, 6  ;;  %v6186_v51 = vsel %vm1154_vm3, %v6764_v34, %v2560_v19  ;;  %v3871_v14 = vpop.permute.xlu0 %3870  ;;  %v7066_v19 = vld [vmem:[#allocation10_spill] sm:$0xff] }
 0x20e   :  { %v1851_v15 = vmul.f32 %v5737_v30, %v1834_v42  ;;  %v2104_v2 = vmul.f32 %v5742_v20, %v1834_v42  ;;  %v1845_v42 = vmul.f32 %v5737_v30, %v1828_v32  ;;  %7061 = vst [vmem:[#allocation6_spill] sm:$0xff] %v6186_v51  ;;  %v2098_v26 = vmul.f32 %v5742_v20, %v1828_v32  ;;  %v7067_v51 = vld [vmem:[#allocation13_spill] sm:$0xff] }
 0x20f   :  { %v2125_v52 = vsel %vm191_vm0, %v7059_v56, %v2124_v35  ;;  %v7063_v56 = vrot.slane %v5887_v57, 6  ;;  %v7065_v0 = vunpack.i.l.bf16 %v5809_v63  ;;  %v3867_v17 = vunpack.i.l.bf16 %v3866_v50  ;;  %v7069_v63 = vld [vmem:[#allocation23_spill] sm:$0xff] }
 0x210   :  { %v1863_v23 = vadd.f32 %v1851_v15, %v7060_v60  ;;  %v2138_v13 = vrot.slane %v2104_v2, 6  ;;  %v2159_v29 = vadd.f32 %v2125_v52, %v7062_v46  ;;  %v7064_v2 = vld [vmem:[#allocation4_spill] sm:$0xff]  ;;  %v1857_v52 = vadd.f32 %v1845_v42, %v7067_v51 }
 0x211   :  { %v1864_v60 = vadd.f32 %v1852_v24, %v7064_v2  ;;  %v2497_v28 = vsel %vm674_vm4, %v3868_v4, %v7065_v0  ;;  %v2126_v46 = vrot.slane %v2098_v26, 6  ;;  %v7068_v32 = vunpack.i.l.bf16 %v5968_v11 }
 0x212   :  { %v2139_v15 = vsel %vm191_vm0, %v7063_v56, %v2138_v13  ;;  %v2515_v53 = vmul.f32 %v5909_v37, %v2497_v28  ;;  %v3883_v27 = vunpack.i.h.bf16 %v3881_v62  ;;  %v3882_v56 = vunpack.i.l.bf16 %v3881_v62 }
 0x213   :  { %v2166_v34 = vadd.f32 %v2139_v15, %v7066_v19  ;;  %v1836_v57 = vsel %vm674_vm4, %v7068_v32, %v3867_v17  ;;  %v3873_v41 = vunpack.i.h.bf16 %v3871_v14  ;;  %v2127_v24 = vsel %vm191_vm0, %v2124_v35, %v2126_v46  ;;  %v3891_v19 = vpop.permute.xlu1 %3890 }
 0x214   :  { %v7070_v2 = vrot.slane %v7069_v63, 6  ;;  %v7071_v50 = vrot.slane %v6173_v54, 6  ;;  %v2544_v42 = vrot.slane %v2515_v53, 4  ;;  %v7072_v28 = vunpack.i.h.bf16 %v5987_v33 }
 0x215   :  { %v7073_v17 = vunpack.i.l.bf16 %v5987_v33  ;;  %v7074_v26 = vunpack.i.h.bf16 %v6003_v47  ;;  %v3872_v15 = vunpack.i.l.bf16 %v3871_v14  ;;  %v1853_v33 = vmul.f32 %v5737_v30, %v1836_v57  ;;  %v7084_v30 = vld [vmem:[#allocation28_spill] sm:$0xff] }
 0x216   :  { %v2129_v0 = vsel %vm191_vm0, %v2126_v46, %v7070_v2  ;;  %v2141_v4 = vsel %vm191_vm0, %v2138_v13, %v7071_v50  ;;  %v1948_v51 = vsel %vm788_vm5, %v7072_v28, %v3883_v27  ;;  %v7075_v46 = vrot.slane %v6092_v18, 4 }
 0x217   :  { %v1941_v62 = vsel %vm788_vm5, %v7073_v17, %v3882_v56  ;;  %v1940_v35 = vsel %vm788_vm5, %v3873_v41, %v7074_v26  ;;  %v7076_v13 = vrot.slane %v5996_v8, 4  ;;  %v1965_v27 = vmul.f32 %v5771_v31, %v1948_v51  ;;  %v7077_v56 = vld [vmem:[#allocation30_spill] sm:$0xff]  ;;  %v7078_v8 = vld [vmem:[#allocation19_spill] sm:$0xff] }
 0x218   :  { %v6223_v32 = vsel %vm1154_vm3, %v7075_v46, %v2544_v42  ;;  %v6233_v63 = vmul.f32 %v7077_v56, %v1948_v51  ;;  %v1958_v41 = vmul.f32 %v5771_v31, %v1941_v62  ;;  %v2196_v14 = vmul.f32 %v7077_v56, %v1941_v62  ;;  %v3876_v46 = vpop.permute.xlu0 %3875 }
 0x219   :  { %v6228_v53 = vsel %vm1154_vm3, %v2544_v42, %v7076_v13  ;;  %v1957_v18 = vmul.f32 %v5771_v31, %v1940_v35  ;;  %v1977_v2 = vadd.f32 %v1965_v27, %v1864_v60  ;;  %v2195_v50 = vmul.f32 %v7077_v56, %v1940_v35  ;;  %v7080_v13 = vld [vmem:[#allocation53_spill] sm:$0xff]  ;;  %v7081_v35 = vld [vmem:[#allocation51_spill] sm:$0xff] }
 0x21a   :  { %v7079_v28 = vunpack.i.h.bf16 %v7078_v8  ;;  %v3893_v17 = vunpack.i.h.bf16 %v3891_v19  ;;  %v1970_v57 = vadd.f32 %v1958_v41, %v1857_v52  ;;  %v2224_v26 = vrot.slane %v2196_v14, 6  ;;  %v3896_v14 = vpop.permute.xlu1 %3895 }
 0x21b   :  { %v6245_v22 = vadd.f32 %v7080_v13, %v1977_v2  ;;  %v2222_v62 = vrot.slane %v2195_v50, 6  ;;  %v1969_v1 = vadd.f32 %v1957_v18, %v1856_v44  ;;  %v7082_v8 = vrot.slane %v5796_v55, 6  ;;  %v7086_v18 = vld [vmem:[#allocation52_spill] sm:$0xff]  ;;  %v7087_v13 = vld [vmem:[#allocation54_spill] sm:$0xff] }
 0x21c   :  { %v1947_v42 = vsel %vm788_vm5, %v7079_v28, %v3872_v15  ;;  %v2054_v27 = vadd.f32 %v7081_v35, %v1970_v57  ;;  %v7083_v52 = vunpack.i.h.bf16 %v5875_v10  ;;  %v7085_v40 = vrot.slane %v7084_v30, 6 }
 0x21d   :  { %v1964_v51 = vmul.f32 %v5771_v31, %v1947_v42  ;;  %v2202_v60 = vmul.f32 %v7077_v56, %v1947_v42  ;;  %v2227_v15 = vsel %vm191_vm0, %v2224_v26, %v7082_v8  ;;  %v2225_v44 = vsel %vm191_vm0, %v2222_v62, %v2224_v26 }
 0x21e   :  { %v2089_v41 = vsel %vm674_vm4, %v7083_v52, %v3893_v17  ;;  %v2223_v2 = vsel %vm191_vm0, %v7085_v40, %v2222_v62  ;;  %v2053_v50 = vadd.f32 %v7086_v18, %v1969_v1  ;;  %v2161_v57 = vadd.f32 %v2129_v0, %v2054_v27  ;;  %v3886_v27 = vpop.permute.xlu0 %3885  ;;  %v7092_v18 = vld [vmem:[#allocation56_spill] sm:$0xff] }
 0x21f   :  { %v1976_v28 = vadd.f32 %v1964_v51, %v1863_v23  ;;  %v2236_v42 = vrot.slane %v2202_v60, 6  ;;  %v6261_v35 = vadd.f32 %v2223_v2, %v2159_v29  ;;  %v2107_v23 = vmul.f32 %v5742_v20, %v2089_v41 }
 0x220   :  { %v2160_v51 = vadd.f32 %v2127_v24, %v2053_v50  ;;  %v7088_v17 = vrot.slane %v5863_v48, 6  ;;  %v7089_v52 = vrot.slane %v6233_v63, 6  ;;  %v3892_v26 = vunpack.i.l.bf16 %v3891_v19  ;;  %v7091_v48 = vld [vmem:[#allocation50_spill] sm:$0xff]  ;;  %v3901_v19 = vpop.permute.xlu1 %3900 }
 0x221   :  { %v2060_v55 = vadd.f32 %v7087_v13, %v1976_v28  ;;  %v2259_v62 = vadd.f32 %v2227_v15, %v2161_v57  ;;  %v2144_v0 = vrot.slane %v2107_v23, 6  ;;  %v7090_v28 = vunpack.i.l.bf16 %v5968_v11  ;;  %v7093_v15 = vld [vmem:[#allocation57_spill] sm:$0xff] }
 0x222   :  { %v2237_v8 = vsel %vm191_vm0, %v7088_v17, %v2236_v42  ;;  %v2239_v40 = vsel %vm191_vm0, %v2236_v42, %v7089_v52  ;;  %v2258_v29 = vadd.f32 %v2225_v44, %v2160_v51  ;;  %v2369_v41 = vadd.f32 %v7091_v48, %v6018_v39 }
 0x223   :  { %v2167_v1 = vadd.f32 %v2141_v4, %v2060_v55  ;;  %v6270_v60 = vadd.f32 %v2237_v8, %v2166_v34  ;;  %v2088_v24 = vsel %vm674_vm4, %v7090_v28, %v3892_v26  ;;  %v3878_v2 = vunpack.i.h.bf16 %v3876_v46 }
 0x224   :  { %v6278_v50 = vadd.f32 %v7092_v18, %v2259_v62  ;;  %v2106_v4 = vmul.f32 %v5742_v20, %v2088_v24  ;;  %v3877_v34 = vunpack.i.l.bf16 %v3876_v46  ;;  %v6284_v57 = vadd.f32 %v7093_v15, %v2258_v29  ;;  %v7098_v62 = vld [vmem:[#allocation3_spill] sm:$0xff]  ;;  %v3911_v24 = vpop.permute.xlu0 %3910 }
 0x225   :  { %v6280_v42 = vadd.f32 %v2239_v40, %v2167_v1  ;;  %v7094_v11 = vunpack.i.l.bf16 %v5875_v10  ;;  %v3898_v13 = vunpack.i.h.bf16 %v3896_v14  ;;  %v3897_v55 = vunpack.i.l.bf16 %v3896_v14 }
 0x226   :  { %v2142_v39 = vrot.slane %v2106_v4, 6  ;;  %v7095_v51 = vunpack.i.l.bf16 %v5635_v38  ;;  %v3888_v8 = vunpack.i.h.bf16 %v3886_v27  ;;  %v7096_v52 = vunpack.i.l.bf16 %v5897_v49 }
 0x227   :  { %v2087_v44 = vsel %vm674_vm4, %v3878_v2, %v7094_v11  ;;  %v7097_v10 = vunpack.i.l.bf16 %v5687_v9  ;;  %v3887_v14 = vunpack.i.l.bf16 %v3886_v27  ;;  %v1865_v1 = vadd.f32 %v1853_v33, %v7098_v62  ;;  %v6324_v11 = vpop.permute.xlu1 %3905 }
 0x228   :  { %v2095_v23 = vmul.f32 %v5742_v20, %v2087_v44  ;;  %v2501_v17 = vsel %vm674_vm4, %v7095_v51, %v3877_v34  ;;  %v2185_v40 = vsel %vm788_vm5, %v3898_v13, %v7096_v52  ;;  %v7099_v20 = vrot.slane %v6173_v54, 6  ;;  %v7103_v44 = vld [vmem:[#allocation32_spill] sm:$0xff]  ;;  %v3916_v62 = vpop.permute.xlu0 %3915 }
 0x229   :  { %v6294_v46 = vmul.f32 %v5909_v37, %v2501_v17  ;;  %v2672_v26 = vsel %vm788_vm5, %v7097_v10, %v3897_v55  ;;  %v2193_v28 = vmul.f32 %v7077_v56, %v2185_v40  ;;  %v2145_v48 = vsel %vm191_vm0, %v2142_v39, %v2144_v0 }
 0x22a   :  { %v2143_v38 = vsel %vm191_vm0, %v7099_v20, %v2142_v39  ;;  %v2121_v29 = vrot.slane %v2095_v23, 6  ;;  %v6310_v18 = vmul.f32 %v5697_v58, %v2672_v26  ;;  %v7100_v9 = vunpack.i.l.bf16 %v5837_v12 }
 0x22b   :  { %v2552_v2 = vrot.slane %v6294_v46, 4  ;;  %v7101_v33 = vrot.slane %v7058_v16, 6  ;;  %v2219_v4 = vrot.slane %v2193_v28, 6  ;;  %v7102_v15 = vunpack.i.l.bf16 %v6003_v47 }
 0x22c   :  { %v2668_v27 = vsel %vm788_vm5, %v3888_v8, %v7100_v9  ;;  %v7104_v12 = vrot.slane %v6021_v25, 4  ;;  %v2723_v16 = vrot.slane %v6310_v18, 4  ;;  %v2168_v23 = vadd.f32 %v2143_v38, %v6245_v22  ;;  %v7108_v38 = vld [vmem:[#allocation55_spill] sm:$0xff]  ;;  %v7138_v18 = vld [vmem:[#allocation64_spill] sm:$0xff] }
 0x22d   :  { %v2123_v54 = vsel %vm191_vm0, %v2121_v29, %v7101_v33  ;;  %v6319_v34 = vmul.f32 %v5697_v58, %v2668_v27  ;;  %v1949_v0 = vsel %vm788_vm5, %v7102_v15, %v3887_v14  ;;  %v7105_v17 = vrot.slane %v7084_v30, 6 }
 0x22e   :  { %v2158_v13 = vadd.f32 %v2123_v54, %v7103_v44  ;;  %v2553_v55 = vsel %vm1154_vm3, %v7104_v12, %v2552_v2  ;;  %v1966_v39 = vmul.f32 %v5771_v31, %v1949_v0  ;;  %v3903_v46 = vunpack.i.h.bf16 %v3901_v19  ;;  %v3926_v54 = vpop.permute.xlu1 %3925 }
 0x22f   :  { %v2581_v51 = vadd.f32 %v2553_v55, %v2369_v41  ;;  %v2221_v8 = vsel %vm191_vm0, %v2219_v4, %v7105_v17  ;;  %v7106_v25 = vrot.slane %v6031_v43, 4  ;;  %v3902_v26 = vunpack.i.l.bf16 %v3901_v19  ;;  %v6363_v4 = vld [vmem:[%s6692_s3] ss:$0 sm:$0xff] }
 0x230   :  { %v6336_v52 = vadd.f32 %v2221_v8, %v2158_v13  ;;  %v1978_v10 = vadd.f32 %v1966_v39, %v1865_v1  ;;  %v7107_v31 = vunpack.i.h.bf16 %v5897_v49  ;;  %v3913_v41 = vunpack.i.h.bf16 %v3911_v24 }
 0x231   :  { %v2724_v40 = vsel %vm1154_vm3, %v7106_v25, %v2723_v16  ;;  %v3912_v30 = vunpack.i.l.bf16 %v3911_v24  ;;  %v2715_v20 = vrot.slane %v6319_v34, 4  ;;  %v7109_v43 = vmov %v7102_v15 }
 0x232   :  { %v2752_v14 = vadd.f32 %v2724_v40, %v2581_v51  ;;  %v2187_v22 = vsel %vm788_vm5, %v7107_v31, %v3903_v46  ;;  %v2062_v29 = vadd.f32 %v7108_v38, %v1978_v10  ;;  %v2186_v9 = vsel %vm788_vm5, %v7109_v43, %v3902_v26  ;;  %v3921_v10 = vpop.permute.xlu0 %3920 }
 0x233   :  { %v2205_v28 = vmul.f32 %v7077_v56, %v2187_v22  ;;  %v2204_v19 = vmul.f32 %v7077_v56, %v2186_v9  ;;  %v7110_v1 = vunpack.i.l.bf16 %v6050_v59  ;;  %v7111_v27 = vunpack.i.h.bf16 %v6027_v21 }
 0x234   :  { %v3908_v33 = vunpack.i.h.bf16 %v6324_v11  ;;  %v2771_v47 = vmul.f32 %v6363_v4, %v2752_v14  ;;  %v2169_v0 = vadd.f32 %v2145_v48, %v2062_v29  ;;  %v3918_v21 = vunpack.i.h.bf16 %v3916_v62 }
 0x235   :  { %v2503_v49 = vsel %vm674_vm4, %v7110_v1, %v3913_v41  ;;  %v2502_v24 = vsel %vm674_vm4, %v7111_v27, %v3912_v30  ;;  %v2242_v15 = vrot.slane %v2205_v28, 6  ;;  %v2240_v44 = vrot.slane %v2204_v19, 6 }
 0x236   :  { %v2521_v56 = vmul.f32 %v5909_v37, %v2503_v49  ;;  %v2520_v59 = vmul.f32 %v5909_v37, %v2502_v24  ;;  %v3917_v13 = vunpack.i.l.bf16 %v3916_v62  ;;  %v3907_v39 = vunpack.i.l.bf16 %v6324_v11  ;;  %v7117_v49 = vld [vmem:[#allocation59_spill] sm:$0xff] }
 0x237   :  { %v3927_v51 = vunpack.i.l.bf16 %v3926_v54  ;;  %v7112_v17 = vrot.slane %v6233_v63, 6  ;;  %v2243_v46 = vsel %vm191_vm0, %v2240_v44, %v2242_v15  ;;  %v7113_v25 = vunpack.i.l.bf16 %v6096_v45  ;;  %v7119_v15 = vld [vmem:[#allocation20_spill] sm:$0xff] }
 0x238   :  { %v2556_v12 = vrot.slane %v2521_v56, 4  ;;  %v2554_v55 = vrot.slane %v2520_v59, 4  ;;  %v7114_v37 = vunpack.i.h.bf16 %v6074_v6  ;;  %v6381_v14 = vadd.f32 %v2243_v46, %v2169_v0  ;;  %v7120_v59 = vld [vmem:[#allocation9_spill] sm:$0xff]  ;;  %v7126_v46 = vld [vmem:[#allocation11_spill] sm:$0xff] }
 0x239   :  { %v2241_v8 = vsel %vm191_vm0, %v7112_v17, %v2240_v44  ;;  %v2674_v40 = vsel %vm788_vm5, %v7113_v25, %v3918_v21  ;;  %v7115_v11 = vrot.slane %v6153_v5, 4  ;;  %v3928_v31 = vunpack.i.h.bf16 %v3926_v54  ;;  %v7125_v17 = vld [vmem:[#allocation61_spill] sm:$0xff] }
 0x23a   :  { %v2673_v48 = vsel %vm788_vm5, %v7114_v37, %v3917_v13  ;;  %v6379_v26 = vadd.f32 %v2241_v8, %v2168_v23  ;;  %v2555_v22 = vsel %vm1154_vm3, %v2552_v2, %v2554_v55  ;;  %v2692_v45 = vmul.f32 %v5697_v58, %v2674_v40  ;;  %v7116_v2 = vld [vmem:[#allocation58_spill] sm:$0xff] }
 0x23b   :  { %v6386_v63 = vsel %vm1154_vm3, %v2556_v12, %v7115_v11  ;;  %v2691_v41 = vmul.f32 %v5697_v58, %v2673_v48  ;;  %v2675_v6 = vsel %vm788_vm5, %v3908_v33, %v3927_v51  ;;  %v3923_v23 = vunpack.i.h.bf16 %v3921_v10 }
 0x23c   :  { %v6393_v30 = vmul.f32 %v5697_v58, %v2675_v6  ;;  %v3922_v62 = vunpack.i.l.bf16 %v3921_v10  ;;  %v2576_v5 = vadd.f32 %v6159_v36, %v6284_v57  ;;  %v2557_v38 = vsel %vm1154_vm3, %v2554_v55, %v2556_v12  ;;  %v7129_v6 = vld [vmem:[#allocation24_spill] sm:$0xff] }
 0x23d   :  { %v2727_v29 = vrot.slane %v2692_v45, 4  ;;  %v2725_v28 = vrot.slane %v2691_v41, 4  ;;  %v2366_v43 = vadd.f32 %v7116_v2, %v5984_v7  ;;  %v2667_v19 = vsel %vm788_vm5, %v3907_v39, %v3923_v23  ;;  %v7124_v39 = vld [vmem:[#allocation60_spill] sm:$0xff]  ;;  %v7128_v41 = vld [vmem:[#allocation21_spill] sm:$0xff] }
 0x23e   :  { %v2729_v9 = vrot.slane %v6393_v30, 4  ;;  %v2676_v1 = vsel %vm788_vm5, %v3922_v62, %v3928_v31  ;;  %v2367_v27 = vadd.f32 %v7117_v49, %v5999_v3  ;;  %v2685_v24 = vmul.f32 %v5697_v58, %v2667_v19  ;;  %v7130_v62 = vld [vmem:[#allocation25_spill] sm:$0xff] }
 0x23f   :  { %v2694_v36 = vmul.f32 %v5697_v58, %v2676_v1  ;;  %v2578_v57 = vadd.f32 %v6228_v53, %v2366_v43  ;;  %v7118_v33 = vrot.slane %v6044_v61, 4  ;;  %v2577_v54 = vadd.f32 %v6223_v32, %v6278_v50  ;;  %v6424_v58 = vld [vmem:[%s6693_s4] ss:$0 sm:$0xff]  ;;  %v7123_v53 = vld [vmem:[#allocation34_spill] sm:$0xff]  ;;  %v7132_v43 = vld [vmem:[#allocation35_spill] sm:$0xff] }
 0x240   :  { %v2579_v56 = vadd.f32 %v7119_v15, %v2367_v27  ;;  %v7121_v0 = vrot.slane %v7120_v59, 4  ;;  %v2789_v21 = vadd.f32 %v6424_v58, %v7123_v53  ;;  %v2730_v32 = vsel %vm1154_vm3, %v2727_v29, %v2729_v9  ;;  %v7137_v59 = vld [vmem:[#allocation63_spill] sm:$0xff] }
 0x241   :  { %v2718_v7 = vsel %vm1154_vm3, %v2715_v20, %v7118_v33  ;;  %v7122_v3 = vmov %v7118_v33  ;;  %v2713_v50 = vrot.slane %v2685_v24, 4  ;;  %v2790_v12 = vadd.f32 %v6424_v58, %v2771_v47 }
 0x242   :  { %v2720_v44 = vsel %vm1154_vm3, %v7122_v3, %v7121_v0  ;;  %v2749_v13 = vadd.f32 %v2718_v7, %v2578_v57  ;;  %v2731_v55 = vrot.slane %v2694_v36, 4  ;;  %v2362_v51 = vadd.f32 %v7124_v39, %v6336_v52  ;;  %v7136_v7 = vld [vmem:[#allocation62_spill] sm:$0xff] }
 0x243   :  { %v2750_v61 = vadd.f32 %v2720_v44, %v2579_v56  ;;  %v2363_v8 = vadd.f32 %v7125_v17, %v6261_v35  ;;  %v7127_v25 = vrot.slane %v7126_v46, 4  ;;  %v2716_v37 = vsel %vm1154_vm3, %v2713_v50, %v2715_v20 }
 0x244   :  { %v2768_v48 = vmul.f32 %v6363_v4, %v2749_v13  ;;  %v2801_v10 = vmax.f32 %v2789_v21, 0.0  ;;  %v2748_v11 = vadd.f32 %v2716_v37, %v2577_v54  ;;  %v2802_v45 = vmax.f32 %v2790_v12, 0.0 }
 0x245   :  { %v2714_v40 = vsel %vm1154_vm3, %v7127_v25, %v2713_v50  ;;  %v2769_v31 = vmul.f32 %v6363_v4, %v2750_v61  ;;  %v2574_v35 = vadd.f32 %v7128_v41, %v2362_v51  ;;  %v2575_v23 = vadd.f32 %v7129_v6, %v2363_v8 }
 0x246   :  { %v2747_v47 = vadd.f32 %v2714_v40, %v2576_v5  ;;  %v2787_v52 = vadd.f32 %v6424_v58, %v2768_v48  ;;  %v7131_v2 = vrot.slane %v7130_v62, 4  ;;  %v7133_v34 = vrot.slane %v7132_v43, 4 }
 0x247   :  { %v2767_v5 = vmul.f32 %v6363_v4, %v2748_v11  ;;  %v2788_v1 = vadd.f32 %v6424_v58, %v2769_v31  ;;  %v2810_v49 = vpack.c.bf16 %v2802_v45, %v2801_v10  ;;  %v7134_v24 = vmov %v7127_v25  ;;  %v7140_v10 = vld [vmem:[#allocation6_spill] sm:$0xff] }
 0x248   :  { %v2710_v20 = vsel %vm1154_vm3, %v7133_v34, %v7131_v2  ;;  %v2766_v19 = vmul.f32 %v6363_v4, %v2747_v47  ;;  %v2799_v27 = vmax.f32 %v2787_v52, 0.0  ;;  %v7135_v36 = vmov %v7131_v2  ;;  %v6494_v2 = vld [vmem:[%s6694_s6] ss:$0 sm:$0xff] }
 0x249   :  { %v2712_v57 = vsel %vm1154_vm3, %v7135_v36, %v7134_v24  ;;  %v2745_v33 = vadd.f32 %v2710_v20, %v2574_v35  ;;  %v2370_v54 = vadd.f32 %v7136_v7, %v6270_v60  ;;  %v2800_v15 = vmax.f32 %v2788_v1, 0.0 }
 0x24a   :  { %v2746_v56 = vadd.f32 %v2712_v57, %v2575_v23  ;;  %v2371_v0 = vadd.f32 %v7137_v59, %v6280_v42  ;;  %v2726_v3 = vsel %vm1154_vm3, %v2723_v16, %v2725_v28  ;;  %v2728_v21 = vsel %vm1154_vm3, %v2725_v28, %v2727_v29  ;;  %v7139_v28 = vld [vmem:[#allocation65_spill] sm:$0xff]  ;;  %v1624_v57 = vld [vmem:[%s6695_s7 + $0x8] sm:$0xff] }
 0x24b   :  { %v2764_v44 = vmul.f32 %v6363_v4, %v2745_v33  ;;  %v2582_v53 = vadd.f32 %v2555_v22, %v2370_v54  ;;  %v2785_v50 = vadd.f32 %v6424_v58, %v2766_v19  ;;  %v2809_v13 = vpack.c.bf16 %v2800_v15, %v2799_v27 }
 0x24c   :  { %v2765_v12 = vmul.f32 %v6363_v4, %v2746_v56  ;;  %v2583_v60 = vadd.f32 %v2557_v38, %v2371_v0  ;;  %v2786_v61 = vadd.f32 %v6424_v58, %v2767_v5  ;;  %v2372_v16 = vadd.f32 %v7138_v18, %v6379_v26  ;;  %v1629_v56 = vld [vmem:[%s6695_s7 + $0x30] sm:$0xff] }
 0x24d   :  { %v2783_v39 = vadd.f32 %v6424_v58, %v2764_v44  ;;  %v2753_v42 = vadd.f32 %v2726_v3, %v2582_v53  ;;  %v2797_v51 = vmax.f32 %v2785_v50, 0.0  ;;  %3452 = vmatprep.mubr.bf16.mxu1 %v2809_v13  ;;  %v2373_v8 = vadd.f32 %v7139_v28, %v6381_v14  ;;  %v1627_v3 = vld [vmem:[%s6695_s7 + $0x20] sm:$0xff]  ;;  %v1630_v50 = vld [vmem:[%s6695_s7 + $0x38] sm:$0xff] }
 0x24e   :  { %v2784_v22 = vadd.f32 %v6424_v58, %v2765_v12  ;;  %v2754_v17 = vadd.f32 %v2728_v21, %v2583_v60  ;;  %v2798_v29 = vmax.f32 %v2786_v61, 0.0  ;;  %v2732_v38 = vsel %vm1154_vm3, %v2729_v9, %v2731_v55  ;;  %3453 = vmatmul.mubr.bf16.vlgmr.msra.gmra.mxu1 %v2810_v49  ;;  %v1626_v49 = vld [vmem:[%s6695_s7 + $0x18] sm:$0xff]  ;;  %v1628_v61 = vld [vmem:[%s6695_s7 + $0x28] sm:$0xff] }
 0x24f   :  { %v2795_v46 = vmax.f32 %v2783_v39, 0.0  ;;  %v2772_v25 = vmul.f32 %v6363_v4, %v2753_v42  ;;  %v2584_v40 = vadd.f32 %v6386_v63, %v2372_v16  ;;  %v2585_v47 = vadd.f32 %v7140_v10, %v2373_v8  ;;  %v1633_v16 = vld [vmem:[%s6695_s7 + $0x50] sm:$0xff] }
 0x250   :  { %v2796_v37 = vmax.f32 %v2784_v22, 0.0  ;;  %v2773_v26 = vmul.f32 %v6363_v4, %v2754_v17  ;;  %v2808_v48 = vpack.c.bf16 %v2798_v29, %v2797_v51  ;;  %v1631_v29 = vld [vmem:[%s6695_s7 + $0x40] sm:$0xff] }
 0x251   :  { %v2791_v11 = vadd.f32 %v6424_v58, %v2772_v25  ;;  %v2755_v31 = vadd.f32 %v2730_v32, %v2584_v40  ;;  %v2756_v45 = vadd.f32 %v2732_v38, %v2585_v47 }
 0x252   :  { %v2807_v14 = vpack.c.bf16 %v2796_v37, %v2795_v46  ;;  %v2792_v30 = vadd.f32 %v6424_v58, %v2773_v26  ;;  %v1634_v46 = vld [vmem:[%s6695_s7 + $0x58] sm:$0xff]  ;;  %v1632_v26 = vld [vmem:[%s6695_s7 + $0x48] sm:$0xff] }
 0x253   :  { %v2803_v9 = vmax.f32 %v2791_v11, 0.0  ;;  %v2774_v55 = vmul.f32 %v6363_v4, %v2755_v31  ;;  %v2775_v63 = vmul.f32 %v6363_v4, %v2756_v45  ;;  %v1625_v4 = vld [vmem:[%s6695_s7 + $0x10] sm:$0xff]  ;;  %v3110_v45 = vld [vmem:[%s6695_s7 + $0x80] sm:$0xff] }
 0x254   :  { %3448 = vmatprep.mubr.bf16.mxu0 %v2807_v14  ;;  %v2804_v52 = vmax.f32 %v2792_v30, 0.0  ;;  %v3112_v31 = vld [vmem:[%s6695_s7 + $0x90] sm:$0xff] }
 0x255   :  { %3449 = vmatmul.mubr.bf16.vlgmr.msra.gmra.mxu0 %v2808_v48  ;;  %v2793_v41 = vadd.f32 %v6424_v58, %v2774_v55  ;;  %v2794_v6 = vadd.f32 %v6424_v58, %v2775_v63  ;;  %v1623_v58 = vld [vmem:[%s6695_s7] sm:$0xff]  ;;  %v3113_v63 = vld [vmem:[%s6695_s7 + $0x98] sm:$0xff] }
 0x256   :  { %v2811_v35 = vpack.c.bf16 %v2804_v52, %v2803_v9 }
 0x257   :  { %v2805_v23 = vmax.f32 %v2793_v41, 0.0  ;;  %v2806_v32 = vmax.f32 %v2794_v6, 0.0 }
 0x258   :  { %3456 = vmatprep.mubr.bf16.mxu1 %v2811_v35 }
 0x259   :  { %v2812_v62 = vpack.c.bf16 %v2806_v32, %v2805_v23  ;;  %v3111_v23 = vld [vmem:[%s6695_s7 + $0x88] sm:$0xff] }
 0x25b   :  { %3457 = vmatmul.mubr.bf16.gmra.mxu1 %v2812_v62  ;;  %v3108_v62 = vld [vmem:[%s6695_s7 + $0x70] sm:$0xff] }
 0x277   :  { %v3422_v43 = vpop.f32.mrf.mxu1 }
 0x278   :  { %v1585_v34 = vadd.f32 %v3422_v43, %v6494_v2 }
 0x279   :  { %v1576_v20 = vpop.f32.mrf.mxu1 }
 0x27a   :  { %v1637_v19 = vadd.f32 %v1625_v4, %v1585_v34  ;;  %v1577_v5 = vadd.f32 %v6494_v2, %v1576_v20 }
 0x27b   :  { %v3423_v1 = vpop.f32.mrf.mxu1 }
 0x27c   :  { %1650 = vst.msk [vmem:[%s6696_s8 + $0x10] sm:$0xff] %vm1647_vm6, %v1637_v19  ;;  %v1635_v27 = vadd.f32 %v1623_v58, %v1577_v5  ;;  %v1588_v24 = vadd.f32 %v3423_v1, %v6494_v2  ;;  %v3106_v58 = vld [vmem:[%s6695_s7 + $0x60] sm:$0xff] }
 0x27d   :  { %v1579_v36 = vpop.f32.mrf.mxu1 }
 0x27e   :  { %1648 = vst.msk [vmem:[%s6696_s8] sm:$0xff] %vm1647_vm6, %v1635_v27  ;;  %v1638_v33 = vadd.f32 %v1626_v49, %v1588_v24  ;;  %v1580_v7 = vadd.f32 %v6494_v2, %v1579_v36  ;;  %v3109_v27 = vld [vmem:[%s6695_s7 + $0x78] sm:$0xff] }
 0x280   :  { %1651 = vst.msk [vmem:[%s6696_s8 + $0x18] sm:$0xff] %vm1647_vm6, %v1638_v33  ;;  %v1636_v54 = vadd.f32 %v1624_v57, %v1580_v7  ;;  %v3107_v33 = vld [vmem:[%s6695_s7 + $0x68] sm:$0xff] }
 0x282   :  { %1649 = vst.msk [vmem:[%s6696_s8 + $0x8] sm:$0xff] %vm1647_vm6, %v1636_v54  ;;  %v3116_v54 = vld [vmem:[%s6695_s7 + $0xb0] sm:$0xff] }
 0x28f   :  { %v3426_v15 = vpop.f32.mrf.mxu1 }
 0x290   :  { %v1601_v59 = vadd.f32 %v3426_v15, %v6494_v2 }
 0x291   :  { %v1592_v0 = vpop.f32.mrf.mxu1 }
 0x292   :  { %v1641_v44 = vadd.f32 %v1629_v56, %v1601_v59  ;;  %v1593_v53 = vadd.f32 %v6494_v2, %v1592_v0 }
 0x293   :  { %v3427_v21 = vpop.f32.mrf.mxu1 }
 0x294   :  { %1654 = vst.msk [vmem:[%s6696_s8 + $0x30] sm:$0xff] %vm1647_vm6, %v1641_v44  ;;  %v1639_v13 = vadd.f32 %v1627_v3, %v1593_v53  ;;  %v1604_v12 = vadd.f32 %v3427_v21, %v6494_v2  ;;  %v3114_v3 = vld [vmem:[%s6695_s7 + $0xa0] sm:$0xff] }
 0x295   :  { %v1595_v60 = vpop.f32.mrf.mxu1 }
 0x296   :  { %1652 = vst.msk [vmem:[%s6696_s8 + $0x20] sm:$0xff] %vm1647_vm6, %v1639_v13  ;;  %v1642_v39 = vadd.f32 %v1630_v50, %v1604_v12  ;;  %v1596_v42 = vadd.f32 %v6494_v2, %v1595_v60  ;;  %v3117_v13 = vld [vmem:[%s6695_s7 + $0xb8] sm:$0xff] }
 0x298   :  { %1655 = vst.msk [vmem:[%s6696_s8 + $0x38] sm:$0xff] %vm1647_vm6, %v1642_v39  ;;  %v1640_v51 = vadd.f32 %v1628_v61, %v1596_v42  ;;  %v3115_v39 = vld [vmem:[%s6695_s7 + $0xa8] sm:$0xff] }
 0x29a   :  { %1653 = vst.msk [vmem:[%s6696_s8 + $0x28] sm:$0xff] %vm1647_vm6, %v1640_v51 }
 0x2c8   :  { %v3430_v18 = vpop.f32.mrf.mxu1 }
 0x2c9   :  { %v1617_v22 = vadd.f32 %v3430_v18, %v6494_v2 }
 0x2ca   :  { %v1608_v17 = vpop.f32.mrf.mxu1 }
 0x2cb   :  { %v1645_v28 = vadd.f32 %v1633_v16, %v1617_v22  ;;  %v1609_v8 = vadd.f32 %v6494_v2, %v1608_v17 }
 0x2cc   :  { %v3431_v38 = vpop.f32.mrf.mxu1 }
 0x2cd   :  { %1658 = vst.msk [vmem:[%s6696_s8 + $0x50] sm:$0xff] %vm1647_vm6, %v1645_v28  ;;  %v1643_v25 = vadd.f32 %v1631_v29, %v1609_v8  ;;  %v1620_v40 = vadd.f32 %v3431_v38, %v6494_v2 }
 0x2ce   :  { %v1611_v37 = vpop.f32.mrf.mxu1 }
 0x2cf   :  { %1656 = vst.msk [vmem:[%s6696_s8 + $0x40] sm:$0xff] %vm1647_vm6, %v1643_v25  ;;  %v1646_v48 = vadd.f32 %v1634_v46, %v1620_v40  ;;  %v1612_v10 = vadd.f32 %v6494_v2, %v1611_v37 }
 0x2d1   :  { %1659 = vst.msk [vmem:[%s6696_s8 + $0x58] sm:$0xff] %vm1647_vm6, %v1646_v48  ;;  %v1644_v47 = vadd.f32 %v1632_v26, %v1612_v10 }
 0x2d3   :  { %1657 = vst.msk [vmem:[%s6696_s8 + $0x48] sm:$0xff] %vm1647_vm6, %v1644_v47 }
 0x30e   :  { %v3454_v11 = vpop.f32.mrf.mxu1 }
 0x30f   :  { %v2943_v14 = vadd.f32 %v3454_v11, %v6494_v2 }
 0x310   :  { %v2934_v30 = vpop.f32.mrf.mxu1 }
 0x311   :  { %v2984_v9 = vadd.f32 %v3112_v31, %v2943_v14  ;;  %v2935_v55 = vadd.f32 %v6494_v2, %v2934_v30 }
 0x312   :  { %v3455_v52 = vpop.f32.mrf.mxu1 }
 0x313   :  { %3124 = vst.msk [vmem:[%s6696_s8 + $0x90] sm:$0xff] %vm1647_vm6, %v2984_v9  ;;  %v2982_v41 = vadd.f32 %v3110_v45, %v2935_v55  ;;  %v2946_v35 = vadd.f32 %v3455_v52, %v6494_v2 }
 0x314   :  { %v2937_v6 = vpop.f32.mrf.mxu1 }
 0x315   :  { %v3450_v32 = vpop.f32.mrf.mxu0  ;;  %3122 = vst.msk [vmem:[%s6696_s8 + $0x80] sm:$0xff] %vm1647_vm6, %v2982_v41  ;;  %v2985_v43 = vadd.f32 %v3113_v63, %v2946_v35  ;;  %v2938_v4 = vadd.f32 %v6494_v2, %v2937_v6 }
 0x316   :  { %v2927_v34 = vadd.f32 %v3450_v32, %v6494_v2 }
 0x317   :  { %v2918_v20 = vpop.f32.mrf.mxu0  ;;  %3125 = vst.msk [vmem:[%s6696_s8 + $0x98] sm:$0xff] %vm1647_vm6, %v2985_v43  ;;  %v2983_v19 = vadd.f32 %v3111_v23, %v2938_v4 }
 0x318   :  { %v2980_v5 = vadd.f32 %v3108_v62, %v2927_v34  ;;  %v2919_v1 = vadd.f32 %v6494_v2, %v2918_v20 }
 0x319   :  { %v3451_v49 = vpop.f32.mrf.mxu0  ;;  %3123 = vst.msk [vmem:[%s6696_s8 + $0x88] sm:$0xff] %vm1647_vm6, %v2983_v19 }
 0x31a   :  { %3120 = vst.msk [vmem:[%s6696_s8 + $0x70] sm:$0xff] %vm1647_vm6, %v2980_v5  ;;  %v2978_v24 = vadd.f32 %v3106_v58, %v2919_v1  ;;  %v2930_v36 = vadd.f32 %v3451_v49, %v6494_v2 }
 0x31b   :  { %v2921_v57 = vpop.f32.mrf.mxu0  ;;  %v3458_v7 = vpop.f32.mrf.mxu1 }
 0x31c   :  { %3118 = vst.msk [vmem:[%s6696_s8 + $0x60] sm:$0xff] %vm1647_vm6, %v2978_v24  ;;  %v2981_v15 = vadd.f32 %v3109_v27, %v2930_v36  ;;  %v2922_v56 = vadd.f32 %v6494_v2, %v2921_v57  ;;  %v2959_v59 = vadd.f32 %v3458_v7, %v6494_v2 }
 0x31d   :  { %v2950_v0 = vpop.f32.mrf.mxu1 }
 0x31e   :  { %3121 = vst.msk [vmem:[%s6696_s8 + $0x78] sm:$0xff] %vm1647_vm6, %v2981_v15  ;;  %v2979_v44 = vadd.f32 %v3107_v33, %v2922_v56  ;;  %v2988_v53 = vadd.f32 %v3116_v54, %v2959_v59  ;;  %v2951_v21 = vadd.f32 %v6494_v2, %v2950_v0 }
 0x31f   :  { %v3459_v50 = vpop.f32.mrf.mxu1 }
 0x320   :  { %3119 = vst.msk [vmem:[%s6696_s8 + $0x68] sm:$0xff] %vm1647_vm6, %v2979_v44  ;;  %3128 = vst.msk [vmem:[%s6696_s8 + $0xb0] sm:$0xff] %vm1647_vm6, %v2988_v53  ;;  %v2986_v12 = vadd.f32 %v3114_v3, %v2951_v21  ;;  %v2962_v60 = vadd.f32 %v3459_v50, %v6494_v2 }
 0x321   :  { %v2953_v61 = vpop.f32.mrf.mxu1 }
 0x322   :  { %3126 = vst.msk [vmem:[%s6696_s8 + $0xa0] sm:$0xff] %vm1647_vm6, %v2986_v12  ;;  %v2989_v42 = vadd.f32 %v3117_v13, %v2962_v60  ;;  %v2954_v51 = vadd.f32 %v6494_v2, %v2953_v61 }
 0x324   :  { %3129 = vst.msk [vmem:[%s6696_s8 + $0xb8] sm:$0xff] %vm1647_vm6, %v2989_v42  ;;  %v2987_v18 = vadd.f32 %v3115_v39, %v2954_v51 }
 0x326   :  { %3127 = vst.msk [vmem:[%s6696_s8 + $0xa8] sm:$0xff] %vm1647_vm6, %v2987_v18 }

</bundles_post_ra>
